<compile_context>
chip_gen: v6e
topology: v6e:2x2x1
jax: 0.10.0
libtpu: 0.0.40
codegen_flags: <defaults>
</compile_context>

<pallas_src>
import numpy as np
import jax
import jax.numpy as jnp
from jax import lax
from jax.experimental import pallas as pl
from jax.experimental.pallas import tpu as pltpu

GAUSS_K = 5
GAUSS_PAD = GAUSS_K // 2       # padding=2 in F.conv2d
MXU_POOL_MIN_W = 128           # column pool via MXU matmul only for wide levels


def gauss_kernel(size=5, sigma=2.0):
    """Verbatim re-implementation of GaussianConv.gauss_kernel (including its quirks)."""
    grid = np.float32(np.mgrid[0:size, 0:size].T)
    gaussian = lambda x: np.exp((x - size // 2) ** 2 / (-2 * sigma ** 2)) ** 2
    kernel = np.sum(gaussian(grid), axis=2)
    kernel /= np.sum(kernel)
    return kernel.astype(np.float32)


def gauss_kernel_1d(size=5, sigma=2.0):
    """1-D weights gn with  K2d[i, j] == gn[i] + gn[j]  (the quirky kernel is rank-2)."""
    x = np.arange(size, dtype=np.float64)
    g = np.exp((x - size // 2) ** 2 / (-2.0 * sigma ** 2)) ** 2
    return g / (2.0 * size * np.sum(g))


def _level_shapes(H, W, max_level):
    """Spatial shape of each pyramid level (max_level-1 diffs + final pooled)."""
    shapes = []
    h, w = H, W
    for _ in range(max_level - 1):
        if h % 2 or w % 2:
            raise ValueError(
                f"spatial dims must stay even through the pyramid, got {h}x{w}")
        shapes.append((h, w))
        h, w = h // 2, w // 2
    shapes.append((h, w))
    return shapes


def _pick_tn(N, H, W, max_level):
    """Images per grid step, from the real f32 working set (not a guess)."""
    P = GAUSS_PAD
    out_elems = sum(h * w for h, w in _level_shapes(H, W, max_level))
    per_image = 4 * (2 * H * W                       # input block, double buffered
                     + 2 * out_elems                 # output blocks, double buffered
                     + 2 * (H + 2 * P) * (W + 2 * P)  # pad_ref + box_ref scratch
                     + 3 * H * W)                    # cur / conv / box value live ranges
    budget = 24 * 1024 * 1024
    tn = max(1, min(N, budget // max(per_image, 1)))
    if N > 1:
        # Keep >= 2 grid steps so "parallel" can shard across both TensorCores (v7x).
        tn = min(tn, (N + 1) // 2)
    return int(tn)


def _build_pyramid_call(Npad, TN, H, W, max_level, dtype):
    shapes = _level_shapes(H, W, max_level)
    gn = [float(v) for v in gauss_kernel_1d(GAUSS_K, 2.0)]
    P, K, L = GAUSS_PAD, GAUSS_K, max_level

    # Which pooled levels use the MXU column pool vs. the transpose fallback.
    pool_dims = shapes[:L - 1]
    tr_dims = [(h, w) for h, w in pool_dims if w < MXU_POOL_MIN_W]
    need_t = bool(tr_dims)
    if need_t:
        t_w = max(w for _, w in tr_dims)
        t_h = max(h for h, _ in tr_dims) // 2

    def kernel(x_ref, *refs):
        out_refs = refs[:L]
        pad_ref, box_ref = refs[L], refs[L + 1]
        t_ref = refs[L + 2] if need_t else None

        cur = x_ref[...].astype(jnp.float32)                    # (TN, H, W)
        h, w = H, W
        for lvl in range(L - 1):
            # --- zero padding in VMEM: only the four border strips (interior is
            #     fully overwritten by `cur` just below).
            zr = jnp.zeros((TN, P, w + 2 * P), jnp.float32)
            pad_ref[:, 0:P, 0:w + 2 * P] = zr
            pad_ref[:, P + h:2 * P + h, 0:w + 2 * P] = zr
            zc = jnp.zeros((TN, h, P), jnp.float32)
            pad_ref[:, P:P + h, 0:P] = zc
            pad_ref[:, P:P + h, P + w:2 * P + w] = zc
            pad_ref[:, P:P + h, P:P + w] = cur

            # --- 5x5 "same" gaussian conv via the rank-2 structure K[i,j]=gn[i]+gn[j]:
            #       conv = sum_i gn[i]*boxH(pad)[y+i, x] + sum_j gn[j]*boxV(pad)[y, x+j]
            # horizontal box sums over all padded rows
            bh = pad_ref[:, 0:h + 2 * P, 0:w]
            for j in range(1, K):
                bh = bh + pad_ref[:, 0:h + 2 * P, j:j + w]
            box_ref[:, 0:h + 2 * P, 0:w] = bh
            conv = gn[0] * box_ref[:, 0:h, 0:w]                 # init from first tap
            for i in range(1, K):
                conv = conv + gn[i] * box_ref[:, i:i + h, 0:w]
            # vertical box sums over all padded columns
            bv = pad_ref[:, 0:h, 0:w + 2 * P]
            for i in range(1, K):
                bv = bv + pad_ref[:, i:i + h, 0:w + 2 * P]
            box_ref[:, 0:h, 0:w + 2 * P] = bv
            for j in range(K):
                conv = conv + gn[j] * box_ref[:, 0:h, j:j + w]

            # --- Laplacian residual for this level.
            out_refs[lvl][...] = (cur - conv).astype(out_refs[lvl].dtype)

            # --- avg_pool2d(conv, 2).
            hp, wp = h // 2, w // 2
            # Row pool: sublane-strided pair sums; staging reuses pad_ref (the padded
            # input is dead here), so no dedicated pool scratch.
            pad_ref[:, 0:h, 0:w] = conv
            rows = (pad_ref[:, pl.ds(0, hp, stride=2), pl.ds(0, w)]
                    + pad_ref[:, pl.ds(1, hp, stride=2), pl.ds(0, w)])        # (TN, hp, w)
            if w >= MXU_POOL_MIN_W:
                # Column pool on the otherwise idle MXU: batched matmul against a
                # constant 0.25-banded pooling matrix built in-kernel (no new inputs).
                jj = lax.broadcasted_iota(jnp.int32, (w, wp), 0)
                kk = lax.broadcasted_iota(jnp.int32, (w, wp), 1)
                pool_mat = jnp.where(jj // 2 == kk, jnp.float32(0.25), jnp.float32(0.0))
                cur = jnp.einsum("nhw,nwk->nhk", rows,
                                 jnp.broadcast_to(pool_mat, (TN, w, wp)),
                                 preferred_element_type=jnp.float32)          # (TN, hp, wp)
            else:
                # Narrow level: MXU tiles would be nearly empty; minor-dim transpose
                # + sublane-strided pair sum (known-good path).
                t_ref[:, 0:w, 0:hp] = jnp.swapaxes(rows, 1, 2)                # (TN, w, hp)
                cols = (t_ref[:, pl.ds(0, wp, stride=2), pl.ds(0, hp)]
                        + t_ref[:, pl.ds(1, wp, stride=2), pl.ds(0, hp)])     # (TN, wp, hp)
                cur = 0.25 * jnp.swapaxes(cols, 1, 2)                         # (TN, hp, wp)
            h, w = hp, wp

        out_refs[L - 1][...] = cur.astype(out_refs[L - 1].dtype)

    out_shape = tuple(jax.ShapeDtypeStruct((Npad, hs, ws), dtype) for hs, ws in shapes)
    out_specs = tuple(pl.BlockSpec((TN, hs, ws), lambda n: (n, 0, 0)) for hs, ws in shapes)

    scratch_shapes = [
        pltpu.VMEM((TN, H + 2 * P, W + 2 * P), jnp.float32),   # zero-padded image / pool staging
        pltpu.VMEM((TN, H + 2 * P, W + 2 * P), jnp.float32),   # separable box-sum staging
    ]
    if need_t:
        scratch_shapes.append(pltpu.VMEM((TN, t_w, t_h), jnp.float32))  # transpose-pool staging

    return pl.pallas_call(
        kernel,
        out_shape=out_shape,
        grid=(Npad // TN,),
        in_specs=[pl.BlockSpec((TN, H, W), lambda n: (n, 0, 0))],
        out_specs=out_specs,
        scratch_shapes=scratch_shapes,
        compiler_params=pltpu.CompilerParams(
            dimension_semantics=("parallel",),
            vmem_limit_bytes=40 * 1024 * 1024,   # safe on v5e/v6e (128 MiB) and v7x (64 MiB/TC)
        ),
    )


def laplacian_pyramid(X, max_level=5):
    """JAX/Pallas equivalent of LaplacianPyramid.forward (NCHW input)."""
    B, C, H, W = X.shape
    shapes = _level_shapes(H, W, max_level)
    N = B * C
    TN = _pick_tn(N, H, W, max_level)
    Npad = ((N + TN - 1) // TN) * TN

    x = X.reshape(N, H, W)
    if Npad != N:
        x = jnp.concatenate([x, jnp.zeros((Npad - N, H, W), X.dtype)], axis=0)

    outs = _build_pyramid_call(Npad, TN, H, W, max_level, X.dtype)(x)
    return [o[:N].reshape(B, C, hs, ws) for o, (hs, ws) in zip(outs, shapes)]


def _reference_pyramid(X, max_level=5):
    """Pure-JAX reference (25-tap 2-D conv, same math as the PyTorch module)."""
    w = jnp.asarray(gauss_kernel(GAUSS_K, 2.0))
    pyr = []
    current = X
    for _ in range(max_level - 1):
        B, C, H, W = current.shape
        xp = jnp.pad(current, ((0, 0), (0, 0), (GAUSS_PAD, GAUSS_PAD), (GAUSS_PAD, GAUSS_PAD)))
        g = jnp.zeros_like(current)
        for di in range(GAUSS_K):
            for dj in range(GAUSS_K):
                g = g + w[di, dj] * xp[:, :, di:di + H, dj:dj + W]
        pyr.append(current - g)
        current = g.reshape(B, C, H // 2, 2, W // 2, 2).mean(axis=(3, 5))
    pyr.append(current)
    return pyr


if __name__ == "__main__":
    key = jax.random.PRNGKey(0)
    # GaussianConv is hard-wired to channels=3; spatial 16 gives a 5-level pyramid
    # with resolutions 16, 8, 4, 2, 1.
    x = jax.random.normal(key, (2, 3, 16, 16), dtype=jnp.float32)

    pyr = laplacian_pyramid(x, max_level=5)
    pyr = jax.block_until_ready(pyr)

    ref = _reference_pyramid(x, max_level=5)
    expected_shapes = [(2, 3, 16, 16), (2, 3, 8, 8), (2, 3, 4, 4), (2, 3, 2, 2), (2, 3, 1, 1)]
    assert len(pyr) == 5
    for lvl, (got, want, shp) in enumerate(zip(pyr, ref, expected_shapes)):
        assert got.shape == shp, (lvl, got.shape, shp)
        np.testing.assert_allclose(np.asarray(got), np.asarray(want), rtol=1e-3, atol=1e-3)

    print("KERNEL_OK")
</pallas_src>

<mosaic_0001>
module attributes {stable_mosaic.version = 11 : i64} {
  func.func @kernel(%arg0: i32, %arg1: memref<3x16x16xf32, #tpu.memory_space<vmem>>, %arg2: memref<3x16x16xf32, #tpu.memory_space<vmem>>, %arg3: memref<3x8x8xf32, #tpu.memory_space<vmem>>, %arg4: memref<3x4x4xf32, #tpu.memory_space<vmem>>, %arg5: memref<3x2x2xf32, #tpu.memory_space<vmem>>, %arg6: memref<3x1x1xf32, #tpu.memory_space<vmem>>, %arg7: memref<3x20x20xf32, #tpu.memory_space<vmem>>, %arg8: memref<3x20x20xf32, #tpu.memory_space<vmem>>, %arg9: memref<3x16x8xf32, #tpu.memory_space<vmem>>) attributes {dimension_semantics = [#tpu.dimension_semantics<parallel>], iteration_bounds = array<i64: 2>, scalar_prefetch = 0 : i64, scratch_operands = 3 : i64, tpu.core_type = #tpu.core_type<tc>, window_params = [{transform_indices = @transform_0, window_bounds = array<i64: 3, 16, 16>}, {transform_indices = @transform_1, window_bounds = array<i64: 3, 16, 16>}, {transform_indices = @transform_2, window_bounds = array<i64: 3, 8, 8>}, {transform_indices = @transform_3, window_bounds = array<i64: 3, 4, 4>}, {transform_indices = @transform_4, window_bounds = array<i64: 3, 2, 2>}, {transform_indices = @transform_5, window_bounds = array<i64: 3, 1, 1>}]} {
    %c0 = arith.constant 0 : index
    %c0_0 = arith.constant 0 : index
    %c0_1 = arith.constant 0 : index
    %0 = vector.load %arg1[%c0, %c0_0, %c0_1] : memref<3x16x16xf32, #tpu.memory_space<vmem>>, vector<3x16x16xf32>
    %cst = arith.constant 0.000000e+00 : f32
    %1 = vector.broadcast %cst : f32 to vector<3x2x20xf32>
    %c0_2 = arith.constant 0 : index
    %c0_3 = arith.constant 0 : index
    %c0_4 = arith.constant 0 : index
    %2 = vector.load %arg7[%c0_2, %c0_3, %c0_4] : memref<3x20x20xf32, #tpu.memory_space<vmem>>, vector<3x2x20xf32>
    tpu.vector_store %arg7[%c0_2, %c0_3, %c0_4], %1 {strides = array<i32>} : memref<3x20x20xf32, #tpu.memory_space<vmem>>, vector<3x2x20xf32>,
    %c0_5 = arith.constant 0 : index
    %c18 = arith.constant 18 : index
    %c0_6 = arith.constant 0 : index
    %3 = vector.load %arg7[%c0_5, %c18, %c0_6] : memref<3x20x20xf32, #tpu.memory_space<vmem>>, vector<3x2x20xf32>
    tpu.vector_store %arg7[%c0_5, %c18, %c0_6], %1 {strides = array<i32>} : memref<3x20x20xf32, #tpu.memory_space<vmem>>, vector<3x2x20xf32>,
    %cst_7 = arith.constant 0.000000e+00 : f32
    %4 = vector.broadcast %cst_7 : f32 to vector<3x16x2xf32>
    %c0_8 = arith.constant 0 : index
    %c2 = arith.constant 2 : index
    %c0_9 = arith.constant 0 : index
    %5 = vector.load %arg7[%c0_8, %c2, %c0_9] : memref<3x20x20xf32, #tpu.memory_space<vmem>>, vector<3x16x2xf32>
    tpu.vector_store %arg7[%c0_8, %c2, %c0_9], %4 {strides = array<i32>} : memref<3x20x20xf32, #tpu.memory_space<vmem>>, vector<3x16x2xf32>,
    %c0_10 = arith.constant 0 : index
    %c2_11 = arith.constant 2 : index
    %c18_12 = arith.constant 18 : index
    %6 = vector.load %arg7[%c0_10, %c2_11, %c18_12] : memref<3x20x20xf32, #tpu.memory_space<vmem>>, vector<3x16x2xf32>
    tpu.vector_store %arg7[%c0_10, %c2_11, %c18_12], %4 {strides = array<i32>} : memref<3x20x20xf32, #tpu.memory_space<vmem>>, vector<3x16x2xf32>,
    %c0_13 = arith.constant 0 : index
    %c2_14 = arith.constant 2 : index
    %c2_15 = arith.constant 2 : index
    %7 = vector.load %arg7[%c0_13, %c2_14, %c2_15] : memref<3x20x20xf32, #tpu.memory_space<vmem>>, vector<3x16x16xf32>
    tpu.vector_store %arg7[%c0_13, %c2_14, %c2_15], %0 {strides = array<i32>} : memref<3x20x20xf32, #tpu.memory_space<vmem>>, vector<3x16x16xf32>,
    %c0_16 = arith.constant 0 : index
    %c0_17 = arith.constant 0 : index
    %c0_18 = arith.constant 0 : index
    %8 = vector.load %arg7[%c0_16, %c0_17, %c0_18] : memref<3x20x20xf32, #tpu.memory_space<vmem>>, vector<3x20x16xf32>
    %c0_19 = arith.constant 0 : index
    %c0_20 = arith.constant 0 : index
    %c1 = arith.constant 1 : index
    %9 = vector.load %arg7[%c0_19, %c0_20, %c1] : memref<3x20x20xf32, #tpu.memory_space<vmem>>, vector<3x20x16xf32>
    %10 = arith.addf %8, %9 : vector<3x20x16xf32>
    %c0_21 = arith.constant 0 : index
    %c0_22 = arith.constant 0 : index
    %c2_23 = arith.constant 2 : index
    %11 = vector.load %arg7[%c0_21, %c0_22, %c2_23] : memref<3x20x20xf32, #tpu.memory_space<vmem>>, vector<3x20x16xf32>
    %12 = arith.addf %10, %11 : vector<3x20x16xf32>
    %c0_24 = arith.constant 0 : index
    %c0_25 = arith.constant 0 : index
    %c3 = arith.constant 3 : index
    %13 = vector.load %arg7[%c0_24, %c0_25, %c3] : memref<3x20x20xf32, #tpu.memory_space<vmem>>, vector<3x20x16xf32>
    %14 = arith.addf %12, %13 : vector<3x20x16xf32>
    %c0_26 = arith.constant 0 : index
    %c0_27 = arith.constant 0 : index
    %c4 = arith.constant 4 : index
    %15 = vector.load %arg7[%c0_26, %c0_27, %c4] : memref<3x20x20xf32, #tpu.memory_space<vmem>>, vector<3x20x16xf32>
    %16 = arith.addf %14, %15 : vector<3x20x16xf32>
    %c0_28 = arith.constant 0 : index
    %c0_29 = arith.constant 0 : index
    %c0_30 = arith.constant 0 : index
    %17 = vector.load %arg8[%c0_28, %c0_29, %c0_30] : memref<3x20x20xf32, #tpu.memory_space<vmem>>, vector<3x20x16xf32>
    tpu.vector_store %arg8[%c0_28, %c0_29, %c0_30], %16 {strides = array<i32>} : memref<3x20x20xf32, #tpu.memory_space<vmem>>, vector<3x20x16xf32>,
    %c0_31 = arith.constant 0 : index
    %c0_32 = arith.constant 0 : index
    %c0_33 = arith.constant 0 : index
    %18 = vector.load %arg8[%c0_31, %c0_32, %c0_33] : memref<3x20x20xf32, #tpu.memory_space<vmem>>, vector<3x16x16xf32>
    %cst_34 = arith.constant 0.011170336 : f32
    %19 = vector.broadcast %cst_34 : f32 to vector<3x16x16xf32>
    %20 = arith.mulf %19, %18 : vector<3x16x16xf32>
    %c0_35 = arith.constant 0 : index
    %c1_36 = arith.constant 1 : index
    %c0_37 = arith.constant 0 : index
    %21 = vector.load %arg8[%c0_35, %c1_36, %c0_37] : memref<3x20x20xf32, #tpu.memory_space<vmem>>, vector<3x16x16xf32>
    %cst_38 = arith.constant 0.0236476026 : f32
    %22 = vector.broadcast %cst_38 : f32 to vector<3x16x16xf32>
    %23 = arith.mulf %22, %21 : vector<3x16x16xf32>
    %24 = arith.addf %20, %23 : vector<3x16x16xf32>
    %c0_39 = arith.constant 0 : index
    %c2_40 = arith.constant 2 : index
    %c0_41 = arith.constant 0 : index
    %25 = vector.load %arg8[%c0_39, %c2_40, %c0_41] : memref<3x20x20xf32, #tpu.memory_space<vmem>>, vector<3x16x16xf32>
    %cst_42 = arith.constant 0.0303641222 : f32
    %26 = vector.broadcast %cst_42 : f32 to vector<3x16x16xf32>
    %27 = arith.mulf %26, %25 : vector<3x16x16xf32>
    %28 = arith.addf %24, %27 : vector<3x16x16xf32>
    %c0_43 = arith.constant 0 : index
    %c3_44 = arith.constant 3 : index
    %c0_45 = arith.constant 0 : index
    %29 = vector.load %arg8[%c0_43, %c3_44, %c0_45] : memref<3x20x20xf32, #tpu.memory_space<vmem>>, vector<3x16x16xf32>
    %cst_46 = arith.constant 0.0236476026 : f32
    %30 = vector.broadcast %cst_46 : f32 to vector<3x16x16xf32>
    %31 = arith.mulf %30, %29 : vector<3x16x16xf32>
    %32 = arith.addf %28, %31 : vector<3x16x16xf32>
    %c0_47 = arith.constant 0 : index
    %c4_48 = arith.constant 4 : index
    %c0_49 = arith.constant 0 : index
    %33 = vector.load %arg8[%c0_47, %c4_48, %c0_49] : memref<3x20x20xf32, #tpu.memory_space<vmem>>, vector<3x16x16xf32>
    %cst_50 = arith.constant 0.011170336 : f32
    %34 = vector.broadcast %cst_50 : f32 to vector<3x16x16xf32>
    %35 = arith.mulf %34, %33 : vector<3x16x16xf32>
    %36 = arith.addf %32, %35 : vector<3x16x16xf32>
    %c0_51 = arith.constant 0 : index
    %c0_52 = arith.constant 0 : index
    %c0_53 = arith.constant 0 : index
    %37 = vector.load %arg7[%c0_51, %c0_52, %c0_53] : memref<3x20x20xf32, #tpu.memory_space<vmem>>, vector<3x16x20xf32>
    %c0_54 = arith.constant 0 : index
    %c1_55 = arith.constant 1 : index
    %c0_56 = arith.constant 0 : index
    %38 = vector.load %arg7[%c0_54, %c1_55, %c0_56] : memref<3x20x20xf32, #tpu.memory_space<vmem>>, vector<3x16x20xf32>
    %39 = arith.addf %37, %38 : vector<3x16x20xf32>
    %c0_57 = arith.constant 0 : index
    %c2_58 = arith.constant 2 : index
    %c0_59 = arith.constant 0 : index
    %40 = vector.load %arg7[%c0_57, %c2_58, %c0_59] : memref<3x20x20xf32, #tpu.memory_space<vmem>>, vector<3x16x20xf32>
    %41 = arith.addf %39, %40 : vector<3x16x20xf32>
    %c0_60 = arith.constant 0 : index
    %c3_61 = arith.constant 3 : index
    %c0_62 = arith.constant 0 : index
    %42 = vector.load %arg7[%c0_60, %c3_61, %c0_62] : memref<3x20x20xf32, #tpu.memory_space<vmem>>, vector<3x16x20xf32>
    %43 = arith.addf %41, %42 : vector<3x16x20xf32>
    %c0_63 = arith.constant 0 : index
    %c4_64 = arith.constant 4 : index
    %c0_65 = arith.constant 0 : index
    %44 = vector.load %arg7[%c0_63, %c4_64, %c0_65] : memref<3x20x20xf32, #tpu.memory_space<vmem>>, vector<3x16x20xf32>
    %45 = arith.addf %43, %44 : vector<3x16x20xf32>
    %c0_66 = arith.constant 0 : index
    %c0_67 = arith.constant 0 : index
    %c0_68 = arith.constant 0 : index
    %46 = vector.load %arg8[%c0_66, %c0_67, %c0_68] : memref<3x20x20xf32, #tpu.memory_space<vmem>>, vector<3x16x20xf32>
    tpu.vector_store %arg8[%c0_66, %c0_67, %c0_68], %45 {strides = array<i32>} : memref<3x20x20xf32, #tpu.memory_space<vmem>>, vector<3x16x20xf32>,
    %c0_69 = arith.constant 0 : index
    %c0_70 = arith.constant 0 : index
    %c0_71 = arith.constant 0 : index
    %47 = vector.load %arg8[%c0_69, %c0_70, %c0_71] : memref<3x20x20xf32, #tpu.memory_space<vmem>>, vector<3x16x16xf32>
    %cst_72 = arith.constant 0.011170336 : f32
    %48 = vector.broadcast %cst_72 : f32 to vector<3x16x16xf32>
    %49 = arith.mulf %48, %47 : vector<3x16x16xf32>
    %50 = arith.addf %36, %49 : vector<3x16x16xf32>
    %c0_73 = arith.constant 0 : index
    %c0_74 = arith.constant 0 : index
    %c1_75 = arith.constant 1 : index
    %51 = vector.load %arg8[%c0_73, %c0_74, %c1_75] : memref<3x20x20xf32, #tpu.memory_space<vmem>>, vector<3x16x16xf32>
    %cst_76 = arith.constant 0.0236476026 : f32
    %52 = vector.broadcast %cst_76 : f32 to vector<3x16x16xf32>
    %53 = arith.mulf %52, %51 : vector<3x16x16xf32>
    %54 = arith.addf %50, %53 : vector<3x16x16xf32>
    %c0_77 = arith.constant 0 : index
    %c0_78 = arith.constant 0 : index
    %c2_79 = arith.constant 2 : index
    %55 = vector.load %arg8[%c0_77, %c0_78, %c2_79] : memref<3x20x20xf32, #tpu.memory_space<vmem>>, vector<3x16x16xf32>
    %cst_80 = arith.constant 0.0303641222 : f32
    %56 = vector.broadcast %cst_80 : f32 to vector<3x16x16xf32>
    %57 = arith.mulf %56, %55 : vector<3x16x16xf32>
    %58 = arith.addf %54, %57 : vector<3x16x16xf32>
    %c0_81 = arith.constant 0 : index
    %c0_82 = arith.constant 0 : index
    %c3_83 = arith.constant 3 : index
    %59 = vector.load %arg8[%c0_81, %c0_82, %c3_83] : memref<3x20x20xf32, #tpu.memory_space<vmem>>, vector<3x16x16xf32>
    %cst_84 = arith.constant 0.0236476026 : f32
    %60 = vector.broadcast %cst_84 : f32 to vector<3x16x16xf32>
    %61 = arith.mulf %60, %59 : vector<3x16x16xf32>
    %62 = arith.addf %58, %61 : vector<3x16x16xf32>
    %c0_85 = arith.constant 0 : index
    %c0_86 = arith.constant 0 : index
    %c4_87 = arith.constant 4 : index
    %63 = vector.load %arg8[%c0_85, %c0_86, %c4_87] : memref<3x20x20xf32, #tpu.memory_space<vmem>>, vector<3x16x16xf32>
    %cst_88 = arith.constant 0.011170336 : f32
    %64 = vector.broadcast %cst_88 : f32 to vector<3x16x16xf32>
    %65 = arith.mulf %64, %63 : vector<3x16x16xf32>
    %66 = arith.addf %62, %65 : vector<3x16x16xf32>
    %67 = arith.subf %0, %66 : vector<3x16x16xf32>
    %c0_89 = arith.constant 0 : index
    %c0_90 = arith.constant 0 : index
    %c0_91 = arith.constant 0 : index
    %68 = vector.load %arg2[%c0_89, %c0_90, %c0_91] : memref<3x16x16xf32, #tpu.memory_space<vmem>>, vector<3x16x16xf32>
    tpu.vector_store %arg2[%c0_89, %c0_90, %c0_91], %67 {strides = array<i32>} : memref<3x16x16xf32, #tpu.memory_space<vmem>>, vector<3x16x16xf32>,
    %c0_92 = arith.constant 0 : index
    %c0_93 = arith.constant 0 : index
    %c0_94 = arith.constant 0 : index
    %69 = vector.load %arg7[%c0_92, %c0_93, %c0_94] : memref<3x20x20xf32, #tpu.memory_space<vmem>>, vector<3x16x16xf32>
    tpu.vector_store %arg7[%c0_92, %c0_93, %c0_94], %66 {strides = array<i32>} : memref<3x20x20xf32, #tpu.memory_space<vmem>>, vector<3x16x16xf32>,
    %c0_95 = arith.constant 0 : index
    %c0_96 = arith.constant 0 : index
    %c0_97 = arith.constant 0 : index
    %70 = tpu.strided_load %arg7[%c0_95, %c0_96, %c0_97] {strides = array<i32: 1, 2, 1>} : memref<3x20x20xf32, #tpu.memory_space<vmem>>, vector<3x8x16xf32>
    %c0_98 = arith.constant 0 : index
    %c1_99 = arith.constant 1 : index
    %c0_100 = arith.constant 0 : index
    %71 = tpu.strided_load %arg7[%c0_98, %c1_99, %c0_100] {strides = array<i32: 1, 2, 1>} : memref<3x20x20xf32, #tpu.memory_space<vmem>>, vector<3x8x16xf32>
    %72 = arith.addf %70, %71 : vector<3x8x16xf32>
    %73 = tpu.transpose %72, [0, 2, 1] : vector<3x8x16xf32> -> vector<3x16x8xf32>
    %c0_101 = arith.constant 0 : index
    %c0_102 = arith.constant 0 : index
    %c0_103 = arith.constant 0 : index
    %74 = vector.load %arg9[%c0_101, %c0_102, %c0_103] : memref<3x16x8xf32, #tpu.memory_space<vmem>>, vector<3x16x8xf32>
    tpu.vector_store %arg9[%c0_101, %c0_102, %c0_103], %73 {strides = array<i32>} : memref<3x16x8xf32, #tpu.memory_space<vmem>>, vector<3x16x8xf32>,
    %c0_104 = arith.constant 0 : index
    %c0_105 = arith.constant 0 : index
    %c0_106 = arith.constant 0 : index
    %75 = tpu.strided_load %arg9[%c0_104, %c0_105, %c0_106] {strides = array<i32: 1, 2, 1>} : memref<3x16x8xf32, #tpu.memory_space<vmem>>, vector<3x8x8xf32>
    %c0_107 = arith.constant 0 : index
    %c1_108 = arith.constant 1 : index
    %c0_109 = arith.constant 0 : index
    %76 = tpu.strided_load %arg9[%c0_107, %c1_108, %c0_109] {strides = array<i32: 1, 2, 1>} : memref<3x16x8xf32, #tpu.memory_space<vmem>>, vector<3x8x8xf32>
    %77 = arith.addf %75, %76 : vector<3x8x8xf32>
    %78 = tpu.transpose %77, [0, 2, 1] : vector<3x8x8xf32> -> vector<3x8x8xf32>
    %cst_110 = arith.constant 2.500000e-01 : f32
    %79 = vector.broadcast %cst_110 : f32 to vector<3x8x8xf32>
    %80 = arith.mulf %79, %78 : vector<3x8x8xf32>
    %cst_111 = arith.constant 0.000000e+00 : f32
    %81 = vector.broadcast %cst_111 : f32 to vector<3x2x12xf32>
    %c0_112 = arith.constant 0 : index
    %c0_113 = arith.constant 0 : index
    %c0_114 = arith.constant 0 : index
    %82 = vector.load %arg7[%c0_112, %c0_113, %c0_114] : memref<3x20x20xf32, #tpu.memory_space<vmem>>, vector<3x2x12xf32>
    tpu.vector_store %arg7[%c0_112, %c0_113, %c0_114], %81 {strides = array<i32>} : memref<3x20x20xf32, #tpu.memory_space<vmem>>, vector<3x2x12xf32>,
    %c0_115 = arith.constant 0 : index
    %c10 = arith.constant 10 : index
    %c0_116 = arith.constant 0 : index
    %83 = vector.load %arg7[%c0_115, %c10, %c0_116] : memref<3x20x20xf32, #tpu.memory_space<vmem>>, vector<3x2x12xf32>
    tpu.vector_store %arg7[%c0_115, %c10, %c0_116], %81 {strides = array<i32>} : memref<3x20x20xf32, #tpu.memory_space<vmem>>, vector<3x2x12xf32>,
    %cst_117 = arith.constant 0.000000e+00 : f32
    %84 = vector.broadcast %cst_117 : f32 to vector<3x8x2xf32>
    %c0_118 = arith.constant 0 : index
    %c2_119 = arith.constant 2 : index
    %c0_120 = arith.constant 0 : index
    %85 = vector.load %arg7[%c0_118, %c2_119, %c0_120] : memref<3x20x20xf32, #tpu.memory_space<vmem>>, vector<3x8x2xf32>
    tpu.vector_store %arg7[%c0_118, %c2_119, %c0_120], %84 {strides = array<i32>} : memref<3x20x20xf32, #tpu.memory_space<vmem>>, vector<3x8x2xf32>,
    %c0_121 = arith.constant 0 : index
    %c2_122 = arith.constant 2 : index
    %c10_123 = arith.constant 10 : index
    %86 = vector.load %arg7[%c0_121, %c2_122, %c10_123] : memref<3x20x20xf32, #tpu.memory_space<vmem>>, vector<3x8x2xf32>
    tpu.vector_store %arg7[%c0_121, %c2_122, %c10_123], %84 {strides = array<i32>} : memref<3x20x20xf32, #tpu.memory_space<vmem>>, vector<3x8x2xf32>,
    %c0_124 = arith.constant 0 : index
    %c2_125 = arith.constant 2 : index
    %c2_126 = arith.constant 2 : index
    %87 = vector.load %arg7[%c0_124, %c2_125, %c2_126] : memref<3x20x20xf32, #tpu.memory_space<vmem>>, vector<3x8x8xf32>
    tpu.vector_store %arg7[%c0_124, %c2_125, %c2_126], %80 {strides = array<i32>} : memref<3x20x20xf32, #tpu.memory_space<vmem>>, vector<3x8x8xf32>,
    %c0_127 = arith.constant 0 : index
    %c0_128 = arith.constant 0 : index
    %c0_129 = arith.constant 0 : index
    %88 = vector.load %arg7[%c0_127, %c0_128, %c0_129] : memref<3x20x20xf32, #tpu.memory_space<vmem>>, vector<3x12x8xf32>
    %c0_130 = arith.constant 0 : index
    %c0_131 = arith.constant 0 : index
    %c1_132 = arith.constant 1 : index
    %89 = vector.load %arg7[%c0_130, %c0_131, %c1_132] : memref<3x20x20xf32, #tpu.memory_space<vmem>>, vector<3x12x8xf32>
    %90 = arith.addf %88, %89 : vector<3x12x8xf32>
    %c0_133 = arith.constant 0 : index
    %c0_134 = arith.constant 0 : index
    %c2_135 = arith.constant 2 : index
    %91 = vector.load %arg7[%c0_133, %c0_134, %c2_135] : memref<3x20x20xf32, #tpu.memory_space<vmem>>, vector<3x12x8xf32>
    %92 = arith.addf %90, %91 : vector<3x12x8xf32>
    %c0_136 = arith.constant 0 : index
    %c0_137 = arith.constant 0 : index
    %c3_138 = arith.constant 3 : index
    %93 = vector.load %arg7[%c0_136, %c0_137, %c3_138] : memref<3x20x20xf32, #tpu.memory_space<vmem>>, vector<3x12x8xf32>
    %94 = arith.addf %92, %93 : vector<3x12x8xf32>
    %c0_139 = arith.constant 0 : index
    %c0_140 = arith.constant 0 : index
    %c4_141 = arith.constant 4 : index
    %95 = vector.load %arg7[%c0_139, %c0_140, %c4_141] : memref<3x20x20xf32, #tpu.memory_space<vmem>>, vector<3x12x8xf32>
    %96 = arith.addf %94, %95 : vector<3x12x8xf32>
    %c0_142 = arith.constant 0 : index
    %c0_143 = arith.constant 0 : index
    %c0_144 = arith.constant 0 : index
    %97 = vector.load %arg8[%c0_142, %c0_143, %c0_144] : memref<3x20x20xf32, #tpu.memory_space<vmem>>, vector<3x12x8xf32>
    tpu.vector_store %arg8[%c0_142, %c0_143, %c0_144], %96 {strides = array<i32>} : memref<3x20x20xf32, #tpu.memory_space<vmem>>, vector<3x12x8xf32>,
    %c0_145 = arith.constant 0 : index
    %c0_146 = arith.constant 0 : index
    %c0_147 = arith.constant 0 : index
    %98 = vector.load %arg8[%c0_145, %c0_146, %c0_147] : memref<3x20x20xf32, #tpu.memory_space<vmem>>, vector<3x8x8xf32>
    %cst_148 = arith.constant 0.011170336 : f32
    %99 = vector.broadcast %cst_148 : f32 to vector<3x8x8xf32>
    %100 = arith.mulf %99, %98 : vector<3x8x8xf32>
    %c0_149 = arith.constant 0 : index
    %c1_150 = arith.constant 1 : index
    %c0_151 = arith.constant 0 : index
    %101 = vector.load %arg8[%c0_149, %c1_150, %c0_151] : memref<3x20x20xf32, #tpu.memory_space<vmem>>, vector<3x8x8xf32>
    %cst_152 = arith.constant 0.0236476026 : f32
    %102 = vector.broadcast %cst_152 : f32 to vector<3x8x8xf32>
    %103 = arith.mulf %102, %101 : vector<3x8x8xf32>
    %104 = arith.addf %100, %103 : vector<3x8x8xf32>
    %c0_153 = arith.constant 0 : index
    %c2_154 = arith.constant 2 : index
    %c0_155 = arith.constant 0 : index
    %105 = vector.load %arg8[%c0_153, %c2_154, %c0_155] : memref<3x20x20xf32, #tpu.memory_space<vmem>>, vector<3x8x8xf32>
    %cst_156 = arith.constant 0.0303641222 : f32
    %106 = vector.broadcast %cst_156 : f32 to vector<3x8x8xf32>
    %107 = arith.mulf %106, %105 : vector<3x8x8xf32>
    %108 = arith.addf %104, %107 : vector<3x8x8xf32>
    %c0_157 = arith.constant 0 : index
    %c3_158 = arith.constant 3 : index
    %c0_159 = arith.constant 0 : index
    %109 = vector.load %arg8[%c0_157, %c3_158, %c0_159] : memref<3x20x20xf32, #tpu.memory_space<vmem>>, vector<3x8x8xf32>
    %cst_160 = arith.constant 0.0236476026 : f32
    %110 = vector.broadcast %cst_160 : f32 to vector<3x8x8xf32>
    %111 = arith.mulf %110, %109 : vector<3x8x8xf32>
    %112 = arith.addf %108, %111 : vector<3x8x8xf32>
    %c0_161 = arith.constant 0 : index
    %c4_162 = arith.constant 4 : index
    %c0_163 = arith.constant 0 : index
    %113 = vector.load %arg8[%c0_161, %c4_162, %c0_163] : memref<3x20x20xf32, #tpu.memory_space<vmem>>, vector<3x8x8xf32>
    %cst_164 = arith.constant 0.011170336 : f32
    %114 = vector.broadcast %cst_164 : f32 to vector<3x8x8xf32>
    %115 = arith.mulf %114, %113 : vector<3x8x8xf32>
    %116 = arith.addf %112, %115 : vector<3x8x8xf32>
    %c0_165 = arith.constant 0 : index
    %c0_166 = arith.constant 0 : index
    %c0_167 = arith.constant 0 : index
    %117 = vector.load %arg7[%c0_165, %c0_166, %c0_167] : memref<3x20x20xf32, #tpu.memory_space<vmem>>, vector<3x8x12xf32>
    %c0_168 = arith.constant 0 : index
    %c1_169 = arith.constant 1 : index
    %c0_170 = arith.constant 0 : index
    %118 = vector.load %arg7[%c0_168, %c1_169, %c0_170] : memref<3x20x20xf32, #tpu.memory_space<vmem>>, vector<3x8x12xf32>
    %119 = arith.addf %117, %118 : vector<3x8x12xf32>
    %c0_171 = arith.constant 0 : index
    %c2_172 = arith.constant 2 : index
    %c0_173 = arith.constant 0 : index
    %120 = vector.load %arg7[%c0_171, %c2_172, %c0_173] : memref<3x20x20xf32, #tpu.memory_space<vmem>>, vector<3x8x12xf32>
    %121 = arith.addf %119, %120 : vector<3x8x12xf32>
    %c0_174 = arith.constant 0 : index
    %c3_175 = arith.constant 3 : index
    %c0_176 = arith.constant 0 : index
    %122 = vector.load %arg7[%c0_174, %c3_175, %c0_176] : memref<3x20x20xf32, #tpu.memory_space<vmem>>, vector<3x8x12xf32>
    %123 = arith.addf %121, %122 : vector<3x8x12xf32>
    %c0_177 = arith.constant 0 : index
    %c4_178 = arith.constant 4 : index
    %c0_179 = arith.constant 0 : index
    %124 = vector.load %arg7[%c0_177, %c4_178, %c0_179] : memref<3x20x20xf32, #tpu.memory_space<vmem>>, vector<3x8x12xf32>
    %125 = arith.addf %123, %124 : vector<3x8x12xf32>
    %c0_180 = arith.constant 0 : index
    %c0_181 = arith.constant 0 : index
    %c0_182 = arith.constant 0 : index
    %126 = vector.load %arg8[%c0_180, %c0_181, %c0_182] : memref<3x20x20xf32, #tpu.memory_space<vmem>>, vector<3x8x12xf32>
    tpu.vector_store %arg8[%c0_180, %c0_181, %c0_182], %125 {strides = array<i32>} : memref<3x20x20xf32, #tpu.memory_space<vmem>>, vector<3x8x12xf32>,
    %c0_183 = arith.constant 0 : index
    %c0_184 = arith.constant 0 : index
    %c0_185 = arith.constant 0 : index
    %127 = vector.load %arg8[%c0_183, %c0_184, %c0_185] : memref<3x20x20xf32, #tpu.memory_space<vmem>>, vector<3x8x8xf32>
    %cst_186 = arith.constant 0.011170336 : f32
    %128 = vector.broadcast %cst_186 : f32 to vector<3x8x8xf32>
    %129 = arith.mulf %128, %127 : vector<3x8x8xf32>
    %130 = arith.addf %116, %129 : vector<3x8x8xf32>
    %c0_187 = arith.constant 0 : index
    %c0_188 = arith.constant 0 : index
    %c1_189 = arith.constant 1 : index
    %131 = vector.load %arg8[%c0_187, %c0_188, %c1_189] : memref<3x20x20xf32, #tpu.memory_space<vmem>>, vector<3x8x8xf32>
    %cst_190 = arith.constant 0.0236476026 : f32
    %132 = vector.broadcast %cst_190 : f32 to vector<3x8x8xf32>
    %133 = arith.mulf %132, %131 : vector<3x8x8xf32>
    %134 = arith.addf %130, %133 : vector<3x8x8xf32>
    %c0_191 = arith.constant 0 : index
    %c0_192 = arith.constant 0 : index
    %c2_193 = arith.constant 2 : index
    %135 = vector.load %arg8[%c0_191, %c0_192, %c2_193] : memref<3x20x20xf32, #tpu.memory_space<vmem>>, vector<3x8x8xf32>
    %cst_194 = arith.constant 0.0303641222 : f32
    %136 = vector.broadcast %cst_194 : f32 to vector<3x8x8xf32>
    %137 = arith.mulf %136, %135 : vector<3x8x8xf32>
    %138 = arith.addf %134, %137 : vector<3x8x8xf32>
    %c0_195 = arith.constant 0 : index
    %c0_196 = arith.constant 0 : index
    %c3_197 = arith.constant 3 : index
    %139 = vector.load %arg8[%c0_195, %c0_196, %c3_197] : memref<3x20x20xf32, #tpu.memory_space<vmem>>, vector<3x8x8xf32>
    %cst_198 = arith.constant 0.0236476026 : f32
    %140 = vector.broadcast %cst_198 : f32 to vector<3x8x8xf32>
    %141 = arith.mulf %140, %139 : vector<3x8x8xf32>
    %142 = arith.addf %138, %141 : vector<3x8x8xf32>
    %c0_199 = arith.constant 0 : index
    %c0_200 = arith.constant 0 : index
    %c4_201 = arith.constant 4 : index
    %143 = vector.load %arg8[%c0_199, %c0_200, %c4_201] : memref<3x20x20xf32, #tpu.memory_space<vmem>>, vector<3x8x8xf32>
    %cst_202 = arith.constant 0.011170336 : f32
    %144 = vector.broadcast %cst_202 : f32 to vector<3x8x8xf32>
    %145 = arith.mulf %144, %143 : vector<3x8x8xf32>
    %146 = arith.addf %142, %145 : vector<3x8x8xf32>
    %147 = arith.subf %80, %146 : vector<3x8x8xf32>
    %c0_203 = arith.constant 0 : index
    %c0_204 = arith.constant 0 : index
    %c0_205 = arith.constant 0 : index
    %148 = vector.load %arg3[%c0_203, %c0_204, %c0_205] : memref<3x8x8xf32, #tpu.memory_space<vmem>>, vector<3x8x8xf32>
    tpu.vector_store %arg3[%c0_203, %c0_204, %c0_205], %147 {strides = array<i32>} : memref<3x8x8xf32, #tpu.memory_space<vmem>>, vector<3x8x8xf32>,
    %c0_206 = arith.constant 0 : index
    %c0_207 = arith.constant 0 : index
    %c0_208 = arith.constant 0 : index
    %149 = vector.load %arg7[%c0_206, %c0_207, %c0_208] : memref<3x20x20xf32, #tpu.memory_space<vmem>>, vector<3x8x8xf32>
    tpu.vector_store %arg7[%c0_206, %c0_207, %c0_208], %146 {strides = array<i32>} : memref<3x20x20xf32, #tpu.memory_space<vmem>>, vector<3x8x8xf32>,
    %c0_209 = arith.constant 0 : index
    %c0_210 = arith.constant 0 : index
    %c0_211 = arith.constant 0 : index
    %150 = tpu.strided_load %arg7[%c0_209, %c0_210, %c0_211] {strides = array<i32: 1, 2, 1>} : memref<3x20x20xf32, #tpu.memory_space<vmem>>, vector<3x4x8xf32>
    %c0_212 = arith.constant 0 : index
    %c1_213 = arith.constant 1 : index
    %c0_214 = arith.constant 0 : index
    %151 = tpu.strided_load %arg7[%c0_212, %c1_213, %c0_214] {strides = array<i32: 1, 2, 1>} : memref<3x20x20xf32, #tpu.memory_space<vmem>>, vector<3x4x8xf32>
    %152 = arith.addf %150, %151 : vector<3x4x8xf32>
    %153 = tpu.transpose %152, [0, 2, 1] : vector<3x4x8xf32> -> vector<3x8x4xf32>
    %c0_215 = arith.constant 0 : index
    %c0_216 = arith.constant 0 : index
    %c0_217 = arith.constant 0 : index
    %154 = vector.load %arg9[%c0_215, %c0_216, %c0_217] : memref<3x16x8xf32, #tpu.memory_space<vmem>>, vector<3x8x4xf32>
    tpu.vector_store %arg9[%c0_215, %c0_216, %c0_217], %153 {strides = array<i32>} : memref<3x16x8xf32, #tpu.memory_space<vmem>>, vector<3x8x4xf32>,
    %c0_218 = arith.constant 0 : index
    %c0_219 = arith.constant 0 : index
    %c0_220 = arith.constant 0 : index
    %155 = tpu.strided_load %arg9[%c0_218, %c0_219, %c0_220] {strides = array<i32: 1, 2, 1>} : memref<3x16x8xf32, #tpu.memory_space<vmem>>, vector<3x4x4xf32>
    %c0_221 = arith.constant 0 : index
    %c1_222 = arith.constant 1 : index
    %c0_223 = arith.constant 0 : index
    %156 = tpu.strided_load %arg9[%c0_221, %c1_222, %c0_223] {strides = array<i32: 1, 2, 1>} : memref<3x16x8xf32, #tpu.memory_space<vmem>>, vector<3x4x4xf32>
    %157 = arith.addf %155, %156 : vector<3x4x4xf32>
    %158 = tpu.transpose %157, [0, 2, 1] : vector<3x4x4xf32> -> vector<3x4x4xf32>
    %cst_224 = arith.constant 2.500000e-01 : f32
    %159 = vector.broadcast %cst_224 : f32 to vector<3x4x4xf32>
    %160 = arith.mulf %159, %158 : vector<3x4x4xf32>
    %cst_225 = arith.constant 0.000000e+00 : f32
    %161 = vector.broadcast %cst_225 : f32 to vector<3x2x8xf32>
    %c0_226 = arith.constant 0 : index
    %c0_227 = arith.constant 0 : index
    %c0_228 = arith.constant 0 : index
    %162 = vector.load %arg7[%c0_226, %c0_227, %c0_228] : memref<3x20x20xf32, #tpu.memory_space<vmem>>, vector<3x2x8xf32>
    tpu.vector_store %arg7[%c0_226, %c0_227, %c0_228], %161 {strides = array<i32>} : memref<3x20x20xf32, #tpu.memory_space<vmem>>, vector<3x2x8xf32>,
    %c0_229 = arith.constant 0 : index
    %c6 = arith.constant 6 : index
    %c0_230 = arith.constant 0 : index
    %163 = vector.load %arg7[%c0_229, %c6, %c0_230] : memref<3x20x20xf32, #tpu.memory_space<vmem>>, vector<3x2x8xf32>
    tpu.vector_store %arg7[%c0_229, %c6, %c0_230], %161 {strides = array<i32>} : memref<3x20x20xf32, #tpu.memory_space<vmem>>, vector<3x2x8xf32>,
    %cst_231 = arith.constant 0.000000e+00 : f32
    %164 = vector.broadcast %cst_231 : f32 to vector<3x4x2xf32>
    %c0_232 = arith.constant 0 : index
    %c2_233 = arith.constant 2 : index
    %c0_234 = arith.constant 0 : index
    %165 = vector.load %arg7[%c0_232, %c2_233, %c0_234] : memref<3x20x20xf32, #tpu.memory_space<vmem>>, vector<3x4x2xf32>
    tpu.vector_store %arg7[%c0_232, %c2_233, %c0_234], %164 {strides = array<i32>} : memref<3x20x20xf32, #tpu.memory_space<vmem>>, vector<3x4x2xf32>,
    %c0_235 = arith.constant 0 : index
    %c2_236 = arith.constant 2 : index
    %c6_237 = arith.constant 6 : index
    %166 = vector.load %arg7[%c0_235, %c2_236, %c6_237] : memref<3x20x20xf32, #tpu.memory_space<vmem>>, vector<3x4x2xf32>
    tpu.vector_store %arg7[%c0_235, %c2_236, %c6_237], %164 {strides = array<i32>} : memref<3x20x20xf32, #tpu.memory_space<vmem>>, vector<3x4x2xf32>,
    %c0_238 = arith.constant 0 : index
    %c2_239 = arith.constant 2 : index
    %c2_240 = arith.constant 2 : index
    %167 = vector.load %arg7[%c0_238, %c2_239, %c2_240] : memref<3x20x20xf32, #tpu.memory_space<vmem>>, vector<3x4x4xf32>
    tpu.vector_store %arg7[%c0_238, %c2_239, %c2_240], %160 {strides = array<i32>} : memref<3x20x20xf32, #tpu.memory_space<vmem>>, vector<3x4x4xf32>,
    %c0_241 = arith.constant 0 : index
    %c0_242 = arith.constant 0 : index
    %c0_243 = arith.constant 0 : index
    %168 = vector.load %arg7[%c0_241, %c0_242, %c0_243] : memref<3x20x20xf32, #tpu.memory_space<vmem>>, vector<3x8x4xf32>
    %c0_244 = arith.constant 0 : index
    %c0_245 = arith.constant 0 : index
    %c1_246 = arith.constant 1 : index
    %169 = vector.load %arg7[%c0_244, %c0_245, %c1_246] : memref<3x20x20xf32, #tpu.memory_space<vmem>>, vector<3x8x4xf32>
    %170 = arith.addf %168, %169 : vector<3x8x4xf32>
    %c0_247 = arith.constant 0 : index
    %c0_248 = arith.constant 0 : index
    %c2_249 = arith.constant 2 : index
    %171 = vector.load %arg7[%c0_247, %c0_248, %c2_249] : memref<3x20x20xf32, #tpu.memory_space<vmem>>, vector<3x8x4xf32>
    %172 = arith.addf %170, %171 : vector<3x8x4xf32>
    %c0_250 = arith.constant 0 : index
    %c0_251 = arith.constant 0 : index
    %c3_252 = arith.constant 3 : index
    %173 = vector.load %arg7[%c0_250, %c0_251, %c3_252] : memref<3x20x20xf32, #tpu.memory_space<vmem>>, vector<3x8x4xf32>
    %174 = arith.addf %172, %173 : vector<3x8x4xf32>
    %c0_253 = arith.constant 0 : index
    %c0_254 = arith.constant 0 : index
    %c4_255 = arith.constant 4 : index
    %175 = vector.load %arg7[%c0_253, %c0_254, %c4_255] : memref<3x20x20xf32, #tpu.memory_space<vmem>>, vector<3x8x4xf32>
    %176 = arith.addf %174, %175 : vector<3x8x4xf32>
    %c0_256 = arith.constant 0 : index
    %c0_257 = arith.constant 0 : index
    %c0_258 = arith.constant 0 : index
    %177 = vector.load %arg8[%c0_256, %c0_257, %c0_258] : memref<3x20x20xf32, #tpu.memory_space<vmem>>, vector<3x8x4xf32>
    tpu.vector_store %arg8[%c0_256, %c0_257, %c0_258], %176 {strides = array<i32>} : memref<3x20x20xf32, #tpu.memory_space<vmem>>, vector<3x8x4xf32>,
    %c0_259 = arith.constant 0 : index
    %c0_260 = arith.constant 0 : index
    %c0_261 = arith.constant 0 : index
    %178 = vector.load %arg8[%c0_259, %c0_260, %c0_261] : memref<3x20x20xf32, #tpu.memory_space<vmem>>, vector<3x4x4xf32>
    %cst_262 = arith.constant 0.011170336 : f32
    %179 = vector.broadcast %cst_262 : f32 to vector<3x4x4xf32>
    %180 = arith.mulf %179, %178 : vector<3x4x4xf32>
    %c0_263 = arith.constant 0 : index
    %c1_264 = arith.constant 1 : index
    %c0_265 = arith.constant 0 : index
    %181 = vector.load %arg8[%c0_263, %c1_264, %c0_265] : memref<3x20x20xf32, #tpu.memory_space<vmem>>, vector<3x4x4xf32>
    %cst_266 = arith.constant 0.0236476026 : f32
    %182 = vector.broadcast %cst_266 : f32 to vector<3x4x4xf32>
    %183 = arith.mulf %182, %181 : vector<3x4x4xf32>
    %184 = arith.addf %180, %183 : vector<3x4x4xf32>
    %c0_267 = arith.constant 0 : index
    %c2_268 = arith.constant 2 : index
    %c0_269 = arith.constant 0 : index
    %185 = vector.load %arg8[%c0_267, %c2_268, %c0_269] : memref<3x20x20xf32, #tpu.memory_space<vmem>>, vector<3x4x4xf32>
    %cst_270 = arith.constant 0.0303641222 : f32
    %186 = vector.broadcast %cst_270 : f32 to vector<3x4x4xf32>
    %187 = arith.mulf %186, %185 : vector<3x4x4xf32>
    %188 = arith.addf %184, %187 : vector<3x4x4xf32>
    %c0_271 = arith.constant 0 : index
    %c3_272 = arith.constant 3 : index
    %c0_273 = arith.constant 0 : index
    %189 = vector.load %arg8[%c0_271, %c3_272, %c0_273] : memref<3x20x20xf32, #tpu.memory_space<vmem>>, vector<3x4x4xf32>
    %cst_274 = arith.constant 0.0236476026 : f32
    %190 = vector.broadcast %cst_274 : f32 to vector<3x4x4xf32>
    %191 = arith.mulf %190, %189 : vector<3x4x4xf32>
    %192 = arith.addf %188, %191 : vector<3x4x4xf32>
    %c0_275 = arith.constant 0 : index
    %c4_276 = arith.constant 4 : index
    %c0_277 = arith.constant 0 : index
    %193 = vector.load %arg8[%c0_275, %c4_276, %c0_277] : memref<3x20x20xf32, #tpu.memory_space<vmem>>, vector<3x4x4xf32>
    %cst_278 = arith.constant 0.011170336 : f32
    %194 = vector.broadcast %cst_278 : f32 to vector<3x4x4xf32>
    %195 = arith.mulf %194, %193 : vector<3x4x4xf32>
    %196 = arith.addf %192, %195 : vector<3x4x4xf32>
    %c0_279 = arith.constant 0 : index
    %c0_280 = arith.constant 0 : index
    %c0_281 = arith.constant 0 : index
    %197 = vector.load %arg7[%c0_279, %c0_280, %c0_281] : memref<3x20x20xf32, #tpu.memory_space<vmem>>, vector<3x4x8xf32>
    %c0_282 = arith.constant 0 : index
    %c1_283 = arith.constant 1 : index
    %c0_284 = arith.constant 0 : index
    %198 = vector.load %arg7[%c0_282, %c1_283, %c0_284] : memref<3x20x20xf32, #tpu.memory_space<vmem>>, vector<3x4x8xf32>
    %199 = arith.addf %197, %198 : vector<3x4x8xf32>
    %c0_285 = arith.constant 0 : index
    %c2_286 = arith.constant 2 : index
    %c0_287 = arith.constant 0 : index
    %200 = vector.load %arg7[%c0_285, %c2_286, %c0_287] : memref<3x20x20xf32, #tpu.memory_space<vmem>>, vector<3x4x8xf32>
    %201 = arith.addf %199, %200 : vector<3x4x8xf32>
    %c0_288 = arith.constant 0 : index
    %c3_289 = arith.constant 3 : index
    %c0_290 = arith.constant 0 : index
    %202 = vector.load %arg7[%c0_288, %c3_289, %c0_290] : memref<3x20x20xf32, #tpu.memory_space<vmem>>, vector<3x4x8xf32>
    %203 = arith.addf %201, %202 : vector<3x4x8xf32>
    %c0_291 = arith.constant 0 : index
    %c4_292 = arith.constant 4 : index
    %c0_293 = arith.constant 0 : index
    %204 = vector.load %arg7[%c0_291, %c4_292, %c0_293] : memref<3x20x20xf32, #tpu.memory_space<vmem>>, vector<3x4x8xf32>
    %205 = arith.addf %203, %204 : vector<3x4x8xf32>
    %c0_294 = arith.constant 0 : index
    %c0_295 = arith.constant 0 : index
    %c0_296 = arith.constant 0 : index
    %206 = vector.load %arg8[%c0_294, %c0_295, %c0_296] : memref<3x20x20xf32, #tpu.memory_space<vmem>>, vector<3x4x8xf32>
    tpu.vector_store %arg8[%c0_294, %c0_295, %c0_296], %205 {strides = array<i32>} : memref<3x20x20xf32, #tpu.memory_space<vmem>>, vector<3x4x8xf32>,
    %c0_297 = arith.constant 0 : index
    %c0_298 = arith.constant 0 : index
    %c0_299 = arith.constant 0 : index
    %207 = vector.load %arg8[%c0_297, %c0_298, %c0_299] : memref<3x20x20xf32, #tpu.memory_space<vmem>>, vector<3x4x4xf32>
    %cst_300 = arith.constant 0.011170336 : f32
    %208 = vector.broadcast %cst_300 : f32 to vector<3x4x4xf32>
    %209 = arith.mulf %208, %207 : vector<3x4x4xf32>
    %210 = arith.addf %196, %209 : vector<3x4x4xf32>
    %c0_301 = arith.constant 0 : index
    %c0_302 = arith.constant 0 : index
    %c1_303 = arith.constant 1 : index
    %211 = vector.load %arg8[%c0_301, %c0_302, %c1_303] : memref<3x20x20xf32, #tpu.memory_space<vmem>>, vector<3x4x4xf32>
    %cst_304 = arith.constant 0.0236476026 : f32
    %212 = vector.broadcast %cst_304 : f32 to vector<3x4x4xf32>
    %213 = arith.mulf %212, %211 : vector<3x4x4xf32>
    %214 = arith.addf %210, %213 : vector<3x4x4xf32>
    %c0_305 = arith.constant 0 : index
    %c0_306 = arith.constant 0 : index
    %c2_307 = arith.constant 2 : index
    %215 = vector.load %arg8[%c0_305, %c0_306, %c2_307] : memref<3x20x20xf32, #tpu.memory_space<vmem>>, vector<3x4x4xf32>
    %cst_308 = arith.constant 0.0303641222 : f32
    %216 = vector.broadcast %cst_308 : f32 to vector<3x4x4xf32>
    %217 = arith.mulf %216, %215 : vector<3x4x4xf32>
    %218 = arith.addf %214, %217 : vector<3x4x4xf32>
    %c0_309 = arith.constant 0 : index
    %c0_310 = arith.constant 0 : index
    %c3_311 = arith.constant 3 : index
    %219 = vector.load %arg8[%c0_309, %c0_310, %c3_311] : memref<3x20x20xf32, #tpu.memory_space<vmem>>, vector<3x4x4xf32>
    %cst_312 = arith.constant 0.0236476026 : f32
    %220 = vector.broadcast %cst_312 : f32 to vector<3x4x4xf32>
    %221 = arith.mulf %220, %219 : vector<3x4x4xf32>
    %222 = arith.addf %218, %221 : vector<3x4x4xf32>
    %c0_313 = arith.constant 0 : index
    %c0_314 = arith.constant 0 : index
    %c4_315 = arith.constant 4 : index
    %223 = vector.load %arg8[%c0_313, %c0_314, %c4_315] : memref<3x20x20xf32, #tpu.memory_space<vmem>>, vector<3x4x4xf32>
    %cst_316 = arith.constant 0.011170336 : f32
    %224 = vector.broadcast %cst_316 : f32 to vector<3x4x4xf32>
    %225 = arith.mulf %224, %223 : vector<3x4x4xf32>
    %226 = arith.addf %222, %225 : vector<3x4x4xf32>
    %227 = arith.subf %160, %226 : vector<3x4x4xf32>
    %c0_317 = arith.constant 0 : index
    %c0_318 = arith.constant 0 : index
    %c0_319 = arith.constant 0 : index
    %228 = vector.load %arg4[%c0_317, %c0_318, %c0_319] : memref<3x4x4xf32, #tpu.memory_space<vmem>>, vector<3x4x4xf32>
    tpu.vector_store %arg4[%c0_317, %c0_318, %c0_319], %227 {strides = array<i32>} : memref<3x4x4xf32, #tpu.memory_space<vmem>>, vector<3x4x4xf32>,
    %c0_320 = arith.constant 0 : index
    %c0_321 = arith.constant 0 : index
    %c0_322 = arith.constant 0 : index
    %229 = vector.load %arg7[%c0_320, %c0_321, %c0_322] : memref<3x20x20xf32, #tpu.memory_space<vmem>>, vector<3x4x4xf32>
    tpu.vector_store %arg7[%c0_320, %c0_321, %c0_322], %226 {strides = array<i32>} : memref<3x20x20xf32, #tpu.memory_space<vmem>>, vector<3x4x4xf32>,
    %c0_323 = arith.constant 0 : index
    %c0_324 = arith.constant 0 : index
    %c0_325 = arith.constant 0 : index
    %230 = tpu.strided_load %arg7[%c0_323, %c0_324, %c0_325] {strides = array<i32: 1, 2, 1>} : memref<3x20x20xf32, #tpu.memory_space<vmem>>, vector<3x2x4xf32>
    %c0_326 = arith.constant 0 : index
    %c1_327 = arith.constant 1 : index
    %c0_328 = arith.constant 0 : index
    %231 = tpu.strided_load %arg7[%c0_326, %c1_327, %c0_328] {strides = array<i32: 1, 2, 1>} : memref<3x20x20xf32, #tpu.memory_space<vmem>>, vector<3x2x4xf32>
    %232 = arith.addf %230, %231 : vector<3x2x4xf32>
    %233 = tpu.transpose %232, [0, 2, 1] : vector<3x2x4xf32> -> vector<3x4x2xf32>
    %c0_329 = arith.constant 0 : index
    %c0_330 = arith.constant 0 : index
    %c0_331 = arith.constant 0 : index
    %234 = vector.load %arg9[%c0_329, %c0_330, %c0_331] : memref<3x16x8xf32, #tpu.memory_space<vmem>>, vector<3x4x2xf32>
    tpu.vector_store %arg9[%c0_329, %c0_330, %c0_331], %233 {strides = array<i32>} : memref<3x16x8xf32, #tpu.memory_space<vmem>>, vector<3x4x2xf32>,
    %c0_332 = arith.constant 0 : index
    %c0_333 = arith.constant 0 : index
    %c0_334 = arith.constant 0 : index
    %235 = tpu.strided_load %arg9[%c0_332, %c0_333, %c0_334] {strides = array<i32: 1, 2, 1>} : memref<3x16x8xf32, #tpu.memory_space<vmem>>, vector<3x2x2xf32>
    %c0_335 = arith.constant 0 : index
    %c1_336 = arith.constant 1 : index
    %c0_337 = arith.constant 0 : index
    %236 = tpu.strided_load %arg9[%c0_335, %c1_336, %c0_337] {strides = array<i32: 1, 2, 1>} : memref<3x16x8xf32, #tpu.memory_space<vmem>>, vector<3x2x2xf32>
    %237 = arith.addf %235, %236 : vector<3x2x2xf32>
    %238 = tpu.transpose %237, [0, 2, 1] : vector<3x2x2xf32> -> vector<3x2x2xf32>
    %cst_338 = arith.constant 2.500000e-01 : f32
    %239 = vector.broadcast %cst_338 : f32 to vector<3x2x2xf32>
    %240 = arith.mulf %239, %238 : vector<3x2x2xf32>
    %cst_339 = arith.constant 0.000000e+00 : f32
    %241 = vector.broadcast %cst_339 : f32 to vector<3x2x6xf32>
    %c0_340 = arith.constant 0 : index
    %c0_341 = arith.constant 0 : index
    %c0_342 = arith.constant 0 : index
    %242 = vector.load %arg7[%c0_340, %c0_341, %c0_342] : memref<3x20x20xf32, #tpu.memory_space<vmem>>, vector<3x2x6xf32>
    tpu.vector_store %arg7[%c0_340, %c0_341, %c0_342], %241 {strides = array<i32>} : memref<3x20x20xf32, #tpu.memory_space<vmem>>, vector<3x2x6xf32>,
    %c0_343 = arith.constant 0 : index
    %c4_344 = arith.constant 4 : index
    %c0_345 = arith.constant 0 : index
    %243 = vector.load %arg7[%c0_343, %c4_344, %c0_345] : memref<3x20x20xf32, #tpu.memory_space<vmem>>, vector<3x2x6xf32>
    tpu.vector_store %arg7[%c0_343, %c4_344, %c0_345], %241 {strides = array<i32>} : memref<3x20x20xf32, #tpu.memory_space<vmem>>, vector<3x2x6xf32>,
    %cst_346 = arith.constant 0.000000e+00 : f32
    %244 = vector.broadcast %cst_346 : f32 to vector<3x2x2xf32>
    %c0_347 = arith.constant 0 : index
    %c2_348 = arith.constant 2 : index
    %c0_349 = arith.constant 0 : index
    %245 = vector.load %arg7[%c0_347, %c2_348, %c0_349] : memref<3x20x20xf32, #tpu.memory_space<vmem>>, vector<3x2x2xf32>
    tpu.vector_store %arg7[%c0_347, %c2_348, %c0_349], %244 {strides = array<i32>} : memref<3x20x20xf32, #tpu.memory_space<vmem>>, vector<3x2x2xf32>,
    %c0_350 = arith.constant 0 : index
    %c2_351 = arith.constant 2 : index
    %c4_352 = arith.constant 4 : index
    %246 = vector.load %arg7[%c0_350, %c2_351, %c4_352] : memref<3x20x20xf32, #tpu.memory_space<vmem>>, vector<3x2x2xf32>
    tpu.vector_store %arg7[%c0_350, %c2_351, %c4_352], %244 {strides = array<i32>} : memref<3x20x20xf32, #tpu.memory_space<vmem>>, vector<3x2x2xf32>,
    %c0_353 = arith.constant 0 : index
    %c2_354 = arith.constant 2 : index
    %c2_355 = arith.constant 2 : index
    %247 = vector.load %arg7[%c0_353, %c2_354, %c2_355] : memref<3x20x20xf32, #tpu.memory_space<vmem>>, vector<3x2x2xf32>
    tpu.vector_store %arg7[%c0_353, %c2_354, %c2_355], %240 {strides = array<i32>} : memref<3x20x20xf32, #tpu.memory_space<vmem>>, vector<3x2x2xf32>,
    %c0_356 = arith.constant 0 : index
    %c0_357 = arith.constant 0 : index
    %c0_358 = arith.constant 0 : index
    %248 = vector.load %arg7[%c0_356, %c0_357, %c0_358] : memref<3x20x20xf32, #tpu.memory_space<vmem>>, vector<3x6x2xf32>
    %c0_359 = arith.constant 0 : index
    %c0_360 = arith.constant 0 : index
    %c1_361 = arith.constant 1 : index
    %249 = vector.load %arg7[%c0_359, %c0_360, %c1_361] : memref<3x20x20xf32, #tpu.memory_space<vmem>>, vector<3x6x2xf32>
    %250 = arith.addf %248, %249 : vector<3x6x2xf32>
    %c0_362 = arith.constant 0 : index
    %c0_363 = arith.constant 0 : index
    %c2_364 = arith.constant 2 : index
    %251 = vector.load %arg7[%c0_362, %c0_363, %c2_364] : memref<3x20x20xf32, #tpu.memory_space<vmem>>, vector<3x6x2xf32>
    %252 = arith.addf %250, %251 : vector<3x6x2xf32>
    %c0_365 = arith.constant 0 : index
    %c0_366 = arith.constant 0 : index
    %c3_367 = arith.constant 3 : index
    %253 = vector.load %arg7[%c0_365, %c0_366, %c3_367] : memref<3x20x20xf32, #tpu.memory_space<vmem>>, vector<3x6x2xf32>
    %254 = arith.addf %252, %253 : vector<3x6x2xf32>
    %c0_368 = arith.constant 0 : index
    %c0_369 = arith.constant 0 : index
    %c4_370 = arith.constant 4 : index
    %255 = vector.load %arg7[%c0_368, %c0_369, %c4_370] : memref<3x20x20xf32, #tpu.memory_space<vmem>>, vector<3x6x2xf32>
    %256 = arith.addf %254, %255 : vector<3x6x2xf32>
    %c0_371 = arith.constant 0 : index
    %c0_372 = arith.constant 0 : index
    %c0_373 = arith.constant 0 : index
    %257 = vector.load %arg8[%c0_371, %c0_372, %c0_373] : memref<3x20x20xf32, #tpu.memory_space<vmem>>, vector<3x6x2xf32>
    tpu.vector_store %arg8[%c0_371, %c0_372, %c0_373], %256 {strides = array<i32>} : memref<3x20x20xf32, #tpu.memory_space<vmem>>, vector<3x6x2xf32>,
    %c0_374 = arith.constant 0 : index
    %c0_375 = arith.constant 0 : index
    %c0_376 = arith.constant 0 : index
    %258 = vector.load %arg8[%c0_374, %c0_375, %c0_376] : memref<3x20x20xf32, #tpu.memory_space<vmem>>, vector<3x2x2xf32>
    %cst_377 = arith.constant 0.011170336 : f32
    %259 = vector.broadcast %cst_377 : f32 to vector<3x2x2xf32>
    %260 = arith.mulf %259, %258 : vector<3x2x2xf32>
    %c0_378 = arith.constant 0 : index
    %c1_379 = arith.constant 1 : index
    %c0_380 = arith.constant 0 : index
    %261 = vector.load %arg8[%c0_378, %c1_379, %c0_380] : memref<3x20x20xf32, #tpu.memory_space<vmem>>, vector<3x2x2xf32>
    %cst_381 = arith.constant 0.0236476026 : f32
    %262 = vector.broadcast %cst_381 : f32 to vector<3x2x2xf32>
    %263 = arith.mulf %262, %261 : vector<3x2x2xf32>
    %264 = arith.addf %260, %263 : vector<3x2x2xf32>
    %c0_382 = arith.constant 0 : index
    %c2_383 = arith.constant 2 : index
    %c0_384 = arith.constant 0 : index
    %265 = vector.load %arg8[%c0_382, %c2_383, %c0_384] : memref<3x20x20xf32, #tpu.memory_space<vmem>>, vector<3x2x2xf32>
    %cst_385 = arith.constant 0.0303641222 : f32
    %266 = vector.broadcast %cst_385 : f32 to vector<3x2x2xf32>
    %267 = arith.mulf %266, %265 : vector<3x2x2xf32>
    %268 = arith.addf %264, %267 : vector<3x2x2xf32>
    %c0_386 = arith.constant 0 : index
    %c3_387 = arith.constant 3 : index
    %c0_388 = arith.constant 0 : index
    %269 = vector.load %arg8[%c0_386, %c3_387, %c0_388] : memref<3x20x20xf32, #tpu.memory_space<vmem>>, vector<3x2x2xf32>
    %cst_389 = arith.constant 0.0236476026 : f32
    %270 = vector.broadcast %cst_389 : f32 to vector<3x2x2xf32>
    %271 = arith.mulf %270, %269 : vector<3x2x2xf32>
    %272 = arith.addf %268, %271 : vector<3x2x2xf32>
    %c0_390 = arith.constant 0 : index
    %c4_391 = arith.constant 4 : index
    %c0_392 = arith.constant 0 : index
    %273 = vector.load %arg8[%c0_390, %c4_391, %c0_392] : memref<3x20x20xf32, #tpu.memory_space<vmem>>, vector<3x2x2xf32>
    %cst_393 = arith.constant 0.011170336 : f32
    %274 = vector.broadcast %cst_393 : f32 to vector<3x2x2xf32>
    %275 = arith.mulf %274, %273 : vector<3x2x2xf32>
    %276 = arith.addf %272, %275 : vector<3x2x2xf32>
    %c0_394 = arith.constant 0 : index
    %c0_395 = arith.constant 0 : index
    %c0_396 = arith.constant 0 : index
    %277 = vector.load %arg7[%c0_394, %c0_395, %c0_396] : memref<3x20x20xf32, #tpu.memory_space<vmem>>, vector<3x2x6xf32>
    %c0_397 = arith.constant 0 : index
    %c1_398 = arith.constant 1 : index
    %c0_399 = arith.constant 0 : index
    %278 = vector.load %arg7[%c0_397, %c1_398, %c0_399] : memref<3x20x20xf32, #tpu.memory_space<vmem>>, vector<3x2x6xf32>
    %279 = arith.addf %277, %278 : vector<3x2x6xf32>
    %c0_400 = arith.constant 0 : index
    %c2_401 = arith.constant 2 : index
    %c0_402 = arith.constant 0 : index
    %280 = vector.load %arg7[%c0_400, %c2_401, %c0_402] : memref<3x20x20xf32, #tpu.memory_space<vmem>>, vector<3x2x6xf32>
    %281 = arith.addf %279, %280 : vector<3x2x6xf32>
    %c0_403 = arith.constant 0 : index
    %c3_404 = arith.constant 3 : index
    %c0_405 = arith.constant 0 : index
    %282 = vector.load %arg7[%c0_403, %c3_404, %c0_405] : memref<3x20x20xf32, #tpu.memory_space<vmem>>, vector<3x2x6xf32>
    %283 = arith.addf %281, %282 : vector<3x2x6xf32>
    %c0_406 = arith.constant 0 : index
    %c4_407 = arith.constant 4 : index
    %c0_408 = arith.constant 0 : index
    %284 = vector.load %arg7[%c0_406, %c4_407, %c0_408] : memref<3x20x20xf32, #tpu.memory_space<vmem>>, vector<3x2x6xf32>
    %285 = arith.addf %283, %284 : vector<3x2x6xf32>
    %c0_409 = arith.constant 0 : index
    %c0_410 = arith.constant 0 : index
    %c0_411 = arith.constant 0 : index
    %286 = vector.load %arg8[%c0_409, %c0_410, %c0_411] : memref<3x20x20xf32, #tpu.memory_space<vmem>>, vector<3x2x6xf32>
    tpu.vector_store %arg8[%c0_409, %c0_410, %c0_411], %285 {strides = array<i32>} : memref<3x20x20xf32, #tpu.memory_space<vmem>>, vector<3x2x6xf32>,
    %c0_412 = arith.constant 0 : index
    %c0_413 = arith.constant 0 : index
    %c0_414 = arith.constant 0 : index
    %287 = vector.load %arg8[%c0_412, %c0_413, %c0_414] : memref<3x20x20xf32, #tpu.memory_space<vmem>>, vector<3x2x2xf32>
    %cst_415 = arith.constant 0.011170336 : f32
    %288 = vector.broadcast %cst_415 : f32 to vector<3x2x2xf32>
    %289 = arith.mulf %288, %287 : vector<3x2x2xf32>
    %290 = arith.addf %276, %289 : vector<3x2x2xf32>
    %c0_416 = arith.constant 0 : index
    %c0_417 = arith.constant 0 : index
    %c1_418 = arith.constant 1 : index
    %291 = vector.load %arg8[%c0_416, %c0_417, %c1_418] : memref<3x20x20xf32, #tpu.memory_space<vmem>>, vector<3x2x2xf32>
    %cst_419 = arith.constant 0.0236476026 : f32
    %292 = vector.broadcast %cst_419 : f32 to vector<3x2x2xf32>
    %293 = arith.mulf %292, %291 : vector<3x2x2xf32>
    %294 = arith.addf %290, %293 : vector<3x2x2xf32>
    %c0_420 = arith.constant 0 : index
    %c0_421 = arith.constant 0 : index
    %c2_422 = arith.constant 2 : index
    %295 = vector.load %arg8[%c0_420, %c0_421, %c2_422] : memref<3x20x20xf32, #tpu.memory_space<vmem>>, vector<3x2x2xf32>
    %cst_423 = arith.constant 0.0303641222 : f32
    %296 = vector.broadcast %cst_423 : f32 to vector<3x2x2xf32>
    %297 = arith.mulf %296, %295 : vector<3x2x2xf32>
    %298 = arith.addf %294, %297 : vector<3x2x2xf32>
    %c0_424 = arith.constant 0 : index
    %c0_425 = arith.constant 0 : index
    %c3_426 = arith.constant 3 : index
    %299 = vector.load %arg8[%c0_424, %c0_425, %c3_426] : memref<3x20x20xf32, #tpu.memory_space<vmem>>, vector<3x2x2xf32>
    %cst_427 = arith.constant 0.0236476026 : f32
    %300 = vector.broadcast %cst_427 : f32 to vector<3x2x2xf32>
    %301 = arith.mulf %300, %299 : vector<3x2x2xf32>
    %302 = arith.addf %298, %301 : vector<3x2x2xf32>
    %c0_428 = arith.constant 0 : index
    %c0_429 = arith.constant 0 : index
    %c4_430 = arith.constant 4 : index
    %303 = vector.load %arg8[%c0_428, %c0_429, %c4_430] : memref<3x20x20xf32, #tpu.memory_space<vmem>>, vector<3x2x2xf32>
    %cst_431 = arith.constant 0.011170336 : f32
    %304 = vector.broadcast %cst_431 : f32 to vector<3x2x2xf32>
    %305 = arith.mulf %304, %303 : vector<3x2x2xf32>
    %306 = arith.addf %302, %305 : vector<3x2x2xf32>
    %307 = arith.subf %240, %306 : vector<3x2x2xf32>
    %c0_432 = arith.constant 0 : index
    %c0_433 = arith.constant 0 : index
    %c0_434 = arith.constant 0 : index
    %308 = vector.load %arg5[%c0_432, %c0_433, %c0_434] : memref<3x2x2xf32, #tpu.memory_space<vmem>>, vector<3x2x2xf32>
    tpu.vector_store %arg5[%c0_432, %c0_433, %c0_434], %307 {strides = array<i32>} : memref<3x2x2xf32, #tpu.memory_space<vmem>>, vector<3x2x2xf32>,
    %c0_435 = arith.constant 0 : index
    %c0_436 = arith.constant 0 : index
    %c0_437 = arith.constant 0 : index
    %309 = vector.load %arg7[%c0_435, %c0_436, %c0_437] : memref<3x20x20xf32, #tpu.memory_space<vmem>>, vector<3x2x2xf32>
    tpu.vector_store %arg7[%c0_435, %c0_436, %c0_437], %306 {strides = array<i32>} : memref<3x20x20xf32, #tpu.memory_space<vmem>>, vector<3x2x2xf32>,
    %c0_438 = arith.constant 0 : index
    %c0_439 = arith.constant 0 : index
    %c0_440 = arith.constant 0 : index
    %310 = tpu.strided_load %arg7[%c0_438, %c0_439, %c0_440] {strides = array<i32: 1, 2, 1>} : memref<3x20x20xf32, #tpu.memory_space<vmem>>, vector<3x1x2xf32>
    %c0_441 = arith.constant 0 : index
    %c1_442 = arith.constant 1 : index
    %c0_443 = arith.constant 0 : index
    %311 = tpu.strided_load %arg7[%c0_441, %c1_442, %c0_443] {strides = array<i32: 1, 2, 1>} : memref<3x20x20xf32, #tpu.memory_space<vmem>>, vector<3x1x2xf32>
    %312 = arith.addf %310, %311 : vector<3x1x2xf32>
    %313 = tpu.transpose %312, [0, 2, 1] : vector<3x1x2xf32> -> vector<3x2x1xf32>
    %c0_444 = arith.constant 0 : index
    %c0_445 = arith.constant 0 : index
    %c0_446 = arith.constant 0 : index
    %314 = vector.load %arg9[%c0_444, %c0_445, %c0_446] : memref<3x16x8xf32, #tpu.memory_space<vmem>>, vector<3x2x1xf32>
    tpu.vector_store %arg9[%c0_444, %c0_445, %c0_446], %313 {strides = array<i32>} : memref<3x16x8xf32, #tpu.memory_space<vmem>>, vector<3x2x1xf32>,
    %c0_447 = arith.constant 0 : index
    %c0_448 = arith.constant 0 : index
    %c0_449 = arith.constant 0 : index
    %315 = tpu.strided_load %arg9[%c0_447, %c0_448, %c0_449] {strides = array<i32: 1, 2, 1>} : memref<3x16x8xf32, #tpu.memory_space<vmem>>, vector<3x1x1xf32>
    %c0_450 = arith.constant 0 : index
    %c1_451 = arith.constant 1 : index
    %c0_452 = arith.constant 0 : index
    %316 = tpu.strided_load %arg9[%c0_450, %c1_451, %c0_452] {strides = array<i32: 1, 2, 1>} : memref<3x16x8xf32, #tpu.memory_space<vmem>>, vector<3x1x1xf32>
    %317 = arith.addf %315, %316 : vector<3x1x1xf32>
    %318 = tpu.transpose %317, [0, 2, 1] : vector<3x1x1xf32> -> vector<3x1x1xf32>
    %cst_453 = arith.constant 2.500000e-01 : f32
    %319 = vector.broadcast %cst_453 : f32 to vector<3x1x1xf32>
    %320 = arith.mulf %319, %318 : vector<3x1x1xf32>
    %c0_454 = arith.constant 0 : index
    %c0_455 = arith.constant 0 : index
    %c0_456 = arith.constant 0 : index
    %321 = vector.load %arg6[%c0_454, %c0_455, %c0_456] : memref<3x1x1xf32, #tpu.memory_space<vmem>>, vector<3x1x1xf32>
    tpu.vector_store %arg6[%c0_454, %c0_455, %c0_456], %320 {strides = array<i32>} : memref<3x1x1xf32, #tpu.memory_space<vmem>>, vector<3x1x1xf32>,
    return
  }
  func.func @transform_0(%arg0: i32) -> (i32, i32, i32) {
    %c0_i32 = arith.constant 0 : i32
    %c0_i32_0 = arith.constant 0 : i32
    %c0_i32_1 = arith.constant 0 : i32
    return %arg0, %c0_i32, %c0_i32_0 : i32, i32, i32
  }
  func.func @transform_1(%arg0: i32) -> (i32, i32, i32) {
    %c0_i32 = arith.constant 0 : i32
    %c0_i32_0 = arith.constant 0 : i32
    %c0_i32_1 = arith.constant 0 : i32
    return %arg0, %c0_i32, %c0_i32_0 : i32, i32, i32
  }
  func.func @transform_2(%arg0: i32) -> (i32, i32, i32) {
    %c0_i32 = arith.constant 0 : i32
    %c0_i32_0 = arith.constant 0 : i32
    %c0_i32_1 = arith.constant 0 : i32
    return %arg0, %c0_i32, %c0_i32_0 : i32, i32, i32
  }
  func.func @transform_3(%arg0: i32) -> (i32, i32, i32) {
    %c0_i32 = arith.constant 0 : i32
    %c0_i32_0 = arith.constant 0 : i32
    %c0_i32_1 = arith.constant 0 : i32
    return %arg0, %c0_i32, %c0_i32_0 : i32, i32, i32
  }
  func.func @transform_4(%arg0: i32) -> (i32, i32, i32) {
    %c0_i32 = arith.constant 0 : i32
    %c0_i32_0 = arith.constant 0 : i32
    %c0_i32_1 = arith.constant 0 : i32
    return %arg0, %c0_i32, %c0_i32_0 : i32, i32, i32
  }
  func.func @transform_5(%arg0: i32) -> (i32, i32, i32) {
    %c0_i32 = arith.constant 0 : i32
    %c0_i32_0 = arith.constant 0 : i32
    %c0_i32_1 = arith.constant 0 : i32
    return %arg0, %c0_i32, %c0_i32_0 : i32, i32, i32
  }
}

</mosaic_0001>

<bundles_post_ra>
// kernel: tpu_custom_call.1
= control target key start
LH: loop header
LB: loop body
LE: loop exit
PB: predicated region body
PF: predicated region fallthrough
CT: control target
= control target key end

     0   :  { %s3744_s0 = inlined_call_operand.hbm [shape: f32[6,16,16], index: 0, kind: input, shape index: {}]   ;;  %s3745_s1 = inlined_call_operand.hbm [shape: f32[6,16,16], index: 1, kind: output, shape index: {0}]   ;;  %s3746_s2 = inlined_call_operand.hbm [shape: f32[6,8,8], index: 2, kind: output, shape index: {1}]   ;;  %s3747_s3 = inlined_call_operand.vmem [shape: f32[6,4,4], index: 3, kind: output, shape index: {2}]   ;;  %s3748_s4 = inlined_call_operand.vmem [shape: f32[6,2,2], index: 4, kind: output, shape index: {3}]   ;;  %s3749_s5 = inlined_call_operand.vmem [shape: f32[6,1,1], index: 5, kind: output, shape index: {4}]  }
   0x1   :  { %3752 = sst [smem:[#allocation14_spill]] %s3744_s0 }
   0x2   :  { %11 = vsyncpa [#allocation6], 0 }
   0x3   :  { %13 = vsyncpa [#allocation6 + $0x1], 0 }
   0x4   :  { %14 = vsyncpa [#allocation7], 0 }
   0x5   :  { %16 = vsyncpa [#allocation7 + $0x1], 0 }
   0x6   :  { %17 = vsyncpa [#allocation10], 0 }
   0x7   :  { %19 = vsyncpa [#allocation10 + $0x1], 0  ;;  %s2988_s18 = smov 0   ;;  %s2990_s19 = smov 0  }
   0x8   :  { %s2992_s20 = smov 0   ;;  %s2994_s21 = smov 0  }
   0x9 LB: > { %s3009_s22 = sadd.s32 4294967295, %s2943_s21   ;;  %s2737_s23 = sadd.s32 4294967294, %s2943_s21   ;;  %s2943_s21 = sphi %s2994_s21, %s3765_s21   ;;  %s2939_s20 = sphi %s2992_s20, %s3764_s20   ;;  %s2935_s19 = sphi %s2990_s19, %s3763_s19   ;;  %s2931_s18 = sphi %s2988_s18, %s3762_s18  }
   0xa   : > { %s3013_s24 = sadd.s32 1, %s2943_s21   ;;  %s32_s25 = sadd.s32 1, %s2939_s20 }
   0xb   : > { %s29_s26 = ssub.s32 %s2943_s21, %s3013_s24  ;;  %p39_p0 = scmp.ne.s32.totalorder %s2939_s20, %s2935_s19 }
   0xc   : > { %p30_p1 = scmp.eq.s32.totalorder %s29_s26, 0  ;;  %p40_p2 = scmp.eq.s32.totalorder %s2943_s21, 0 }
   0xd   : > { %p45_p3 = scmp.ne.s32.totalorder %s2935_s19, %s2931_s18  ;;  %p46_p4 = scmp.eq.s32.totalorder %s3009_s22, 0 }
   0xe   : > { %s3025_s27 = scalar_select %p30_p1, %s2939_s20, %s32_s25  }
   0xf   : > { %p41_p5 = por %p40_p2, %p39_p0  ;;  %p3027_p6 = por %p46_p4, %p45_p3 }
  0x10   : > { %p69_p7 = scmp.eq.s32.totalorder %s3009_s22, 1  ;;  %p75_p8 = scmp.eq.s32.totalorder %s2737_s23, 1 }
  0x11   : > { %s3753_s28 = scalar_select %p3027_p6, 1, 0 }
  0x12   : > { %p2777_p10 = scmp.lt.s32.totalorder %s2943_s21, 2  ;;  %p3034_p11 = por %p69_p7, %p39_p0 }
  0x13   : > { %p3038_p12 = por %p75_p8, %p45_p3  ;;  %s199_s6 = sand.u32 1, %s2939_s20  }
  0x14   : > { %s3754_s29 = scalar_select %p3034_p11, 1, 0 }
  0x15   : > { %s3755_s30 = scalar_select %p3038_p12, 1, 0 }
  0x16   : > { %s2755_s7 = smul.u32 768, %s2943_s21  ;;  %s3756_s0 = sld [smem:[#allocation14_spill]] }
  0x17   : > { %s2757_s8 = smul.u32 48, %s199_s6  ;;  %p3049_p13 = pnand %p2777_p10, %p41_p5 }
  0x18   : > { %s3055_s15 = scalar_lea.sflag [#allocation6], %s199_s6 }
  0x19   : > { %s203_s13 = scalar_lea.vmem [#allocation5], %s2757_s8  ;;  %p2823_p1 = pneg %p3049_p13 }
  0x1a   : > { %s211_s14 = sshll.u32 %s203_s13, 4  ;;  %s3053_s14 = int_to_ptr.vmem [resolvable:$true] %s211_s14 }
  0x1c   : > { %s3047_s11 = scalar_lea.hbm %s3756_s0, %s2755_s7  ;;  %s2826_s25 = scalar_lea.hbm %s3756_s0, 1536 }
  0x1d   : > { %s2821_s16 = scalar_lea.hbm %s3047_s11, 768  ;;  %p2827_p4 = scmp.lt.s32.totalorder %s3047_s11, %s3756_s0 }
  0x1e   : > { %p2822_p0 = scmp.ne.s32.totalorder %s3047_s11, %s2821_s16  ;;  %p2828_p5 = scmp.lt.s32.totalorder %s2826_s25, %s2821_s16 }
  0x20   : > { %p2824_p2 = pnand %p2823_p1, %p2822_p0  ;;  %p2829_p7 = por %p2828_p5, %p2827_p4 }
  0x22   : > { %p2825_p3 = pneg %p2824_p2 }
  0x24   : > { %p2830_p8 = pnand %p2829_p7, %p2825_p3 }
  0x26   : > { %2833 = shalt.err (!%p2830_p8)
}
  0x27   : > { %s2834_s6 = scalar_lea.vmem %s3053_s14, 768  ;;  %s2945_s8 = smov [#allocation5]  }
  0x28   : > { %p2835_p10 = scmp.ne.s32.totalorder %s3053_s14, %s2834_s6  ;;  %s2839_s9 = sshll.u32 %s2945_s8, 4  ;;  %s2840_s9 = int_to_ptr.vmem [resolvable:$false] %s2839_s9 }
  0x29   : > { %s2841_s10 = scalar_lea.vmem %s2840_s9, 1536  ;;  %p2842_p2 = scmp.lt.s32.totalorder %s3053_s14, %s2840_s9 }
  0x2a   : > { %p2837_p9 = pnand %p2835_p10, %p2823_p1  ;;  %p2843_p12 = scmp.lt.s32.totalorder %s2841_s10, %s2834_s6 }
  0x2c   : > { %p2838_p0 = pneg %p2837_p9  ;;  %p2844_p11 = por %p2843_p12, %p2842_p2 }
  0x2e   : > { %p2845_p6 = pnand %p2844_p11, %p2838_p0 }
  0x30   : > { %2848 = shalt.err (!%p2845_p6)
}
  0x31   : > { %s2946_s13 = smov 128   ;;  %s2947_s16 = smov 8  }
  0x32   : > { %2769 = dma.hbm_to_vmem [thread:$0]  (!%p3049_p13), %s3047_s11, 768, %s3053_s14, %s3055_s15, %s2946_s13, %s2946_s13, %s2947_s16  }
  0x33   : > { %p2742_p9 = scmp.ge.s32.totalorder %s2943_s21, 1  ;;  %p219_p1 = scmp.lt.s32.totalorder %s2943_s21, 3 }
  0x35   : > { %p220_p3 = pnand %p2742_p9, %p219_p1 }
  0x36   : > { %s3079_s17 = sand.u32 (!%p220_p3), 1, %s2935_s19   ;;  %p3758_p6 = scmp.ne.s32.totalorder (!%p220_p3), %s3753_s28, 0 }
  0x37   : > { %223 = sbr.rel (%p220_p3) target bundleno = 2918 (0xb66), region = 24  ;;  %s226_s25 = scalar_lea.sflag (!%p220_p3), [#allocation6], %s3079_s17 }
  0x38   : > { %s2758_s23 = smul.u32 (!%p220_p3), 48, %s3079_s17 }
  0x3a   : > { %s3085_s26 = scalar_lea.vmem (!%p220_p3), [#allocation5], %s2758_s23 }
  0x3c   : > { %2918 = dma.done.wait (%p3758_p6), %s226_s25, 768  }
  0x3d   : > { %2920 = vsyncadd (%p3758_p6), %s226_s25, 4294966528  ;;  %vm301_vm0 = vcmask 156672   ;;  %vm308_vm1 = vcmask 15360   ;;  %vm315_vm2 = vcmask 162960   ;;  %v2948_v0 = vmov 0.0   ;;  %v3122_v1 = vld [vmem:[%s3085_s26] sm:$0xff] }
  0x3e   : > { %302 = vst.msk [vmem:[#allocation2] sm:$0x3] %vm301_vm0, %v2948_v0  ;;  %303 = vst.msk [vmem:[#allocation2 + $0x18] sm:$0x3] %vm301_vm0, %v2948_v0  ;;  %v3125_v2 = vld [vmem:[%s3085_s26 + $0x10] sm:$0xff]  ;;  %s2949_s28 = smov 2  }
  0x3f   : > { %309 = vst.msk [vmem:[#allocation2 + $0x2] sm:$0xff] %vm308_vm1, %v2948_v0  ;;  %310 = vst.msk [vmem:[#allocation2 + $0xa] sm:$0xff] %vm308_vm1, %v2948_v0  ;;  %328 = vrot.lane.b32.xlu0 %v3122_v1, %s2949_s28  ;;  %332 = vrot.lane.b32.xlu1 %v3125_v2, %s2949_s28  ;;  %v3132_v3 = vld [vmem:[%s3085_s26 + $0x8] sm:$0xff]  ;;  %v3135_v4 = vld [vmem:[%s3085_s26 + $0x18] sm:$0xff]  ;;  %vm346_vm3 = vcmask 146448   ;;  %s2950_s11 = smov 127  }
  0x40   : > { %304 = vst.msk [vmem:[#allocation2 + $0x30] sm:$0x3] %vm301_vm0, %v2948_v0  ;;  %305 = vst.msk [vmem:[#allocation2 + $0x12] sm:$0x3] %vm301_vm0, %v2948_v0  ;;  %v3142_v5 = vld [vmem:[%s3085_s26 + $0x28] sm:$0xff]  ;;  %v3145_v6 = vld [vmem:[%s3085_s26 + $0x20] sm:$0xff] }
  0x41   : > { %306 = vst.msk [vmem:[#allocation2 + $0x2a] sm:$0x3] %vm301_vm0, %v2948_v0  ;;  %307 = vst.msk [vmem:[#allocation2 + $0x42] sm:$0x3] %vm301_vm0, %v2948_v0  ;;  %s2951_s12 = smov 126   ;;  %s2952_s14 = smov 125  }
  0x42   : > { %311 = vst.msk [vmem:[#allocation2 + $0x1a] sm:$0xff] %vm308_vm1, %v2948_v0  ;;  %312 = vst.msk [vmem:[#allocation2 + $0x22] sm:$0xff] %vm308_vm1, %v2948_v0  ;;  %s2953_s15 = smov 124   ;;  %vm515_vm4 = vcmask 130048   ;;  %vm518_vm5 = vcmask 125952   ;;  %vm664_vm6 = vcmask 162816  }
  0x43   : > { %313 = vst.msk [vmem:[#allocation2 + $0x32] sm:$0xff] %vm308_vm1, %v2948_v0  ;;  %314 = vst.msk [vmem:[#allocation2 + $0x3a] sm:$0xff] %vm308_vm1, %v2948_v0  ;;  %330 = vrot.lane.b32.xlu0 %v3132_v3, %s2949_s28  ;;  %334 = vrot.lane.b32.xlu1 %v3135_v4, %s2949_s28  ;;  %s3358_s7 = scalar_lea.vmem [#allocation8], %s2758_s23  ;;  %vm943_vm7 = vcmask 64512   ;;  %vm1073_vm8 = vcmask 97360   ;;  %vm1063_vm9 = vcmask 91136  }
  0x44   : > { %316 = vst.msk [vmem:[#allocation2 + $0x2] sm:$0xff] %vm315_vm2, %v2948_v0  ;;  %318 = vst.msk [vmem:[#allocation2 + $0x1a] sm:$0xff] %vm315_vm2, %v2948_v0  ;;  %vm1089_vm10 = vcmask 80912   ;;  %vm1202_vm11 = vcmask 60416   ;;  %vm1277_vm12 = vcmask 97280   ;;  %s2759_s6 = smul.u32 24, %s3079_s17 }
  0x45   : > { %317 = vst.msk [vmem:[#allocation2 + $0xa] sm:$0xff] %vm315_vm2, %v2948_v0  ;;  %319 = vst.msk [vmem:[#allocation2 + $0x22] sm:$0xff] %vm315_vm2, %v2948_v0  ;;  %vm1586_vm13 = vcmask 11264   ;;  %vm1590_vm14 = vcmask 60464   ;;  %vm1467_vm15 = vcmask 31744   ;;  %vm1579_vm0 = vcmask 58368  }
  0x46   : > { %320 = vst.msk [vmem:[#allocation2 + $0x32] sm:$0xff] %vm315_vm2, %v2948_v0  ;;  %321 = vst.msk [vmem:[#allocation2 + $0x3a] sm:$0xff] %vm315_vm2, %v2948_v0  ;;  %s3484_s8 = scalar_lea.vmem [#allocation9], %s2759_s6  ;;  %s278_s9 = smul.u32 3, %s3009_s22  ;;  %vm1814_vm2 = vcmask 27648  }
  0x47   : > { %338 = vrot.lane.b32.xlu1 %v3142_v5, %s2949_s28  ;;  %336 = vrot.lane.b32.xlu0 %v3145_v6, %s2949_s28  ;;  %s2501_s16 = scalar_lea.sflag [#allocation7], %s3079_s17  ;;  %p3759_p13 = scmp.ne.s32.totalorder %s3754_s29, 0 }
  0x48   : > { %p279_p11 = scmp.lt.s32.totalorder %s278_s9, 5 }
  0x4a   : > { %s3767_s9 = smov (!%p279_p11, %s278_s9), 5 }
  0x4b   : > { %s2743_s10 = sshll.u32 %s3767_s9, 2  ;;  %s2744_s25 = sshll.u32 %s3767_s9, 1 }
  0x4c   : > { %s282_s23 = scalar_lea.vmem %s3747_s3, %s2743_s10 }
  0xb1   : > { %v329_v7 = vpop.permute.xlu0 %328  ;;  %v333_v8 = vpop.permute.xlu1 %332 }
  0xb2   : > { %347 = vst.msk [vmem:[#allocation2 + $0x2] sm:$0xff] %vm346_vm3, %v329_v7  ;;  %349 = vst.msk [vmem:[#allocation2 + $0x1a] sm:$0xff] %vm346_vm3, %v333_v8 }
  0xb5   : > { %v331_v9 = vpop.permute.xlu0 %330  ;;  %v335_v10 = vpop.permute.xlu1 %334 }
  0xb6   : > { %348 = vst.msk [vmem:[#allocation2 + $0xa] sm:$0xff] %vm346_vm3, %v331_v9  ;;  %350 = vst.msk [vmem:[#allocation2 + $0x22] sm:$0xff] %vm346_vm3, %v335_v10 }
  0xb9   : > { %v3151_v11 = vld [vmem:[#allocation2] sm:$0xff]  ;;  %v339_v12 = vpop.permute.xlu1 %338  ;;  %v337_v13 = vpop.permute.xlu0 %336  ;;  %v3159_v15 = vld [vmem:[#allocation2 + $0x18] sm:$0xff] }
  0xba   : > { %371 = vrot.lane.b32.xlu0 %v3151_v11, %s2950_s11  ;;  %352 = vst.msk [vmem:[#allocation2 + $0x3a] sm:$0xff] %vm346_vm3, %v339_v12  ;;  %351 = vst.msk [vmem:[#allocation2 + $0x32] sm:$0xff] %vm346_vm3, %v337_v13  ;;  %v616_v55 = vld [vmem:[#allocation2 + $0x1] sm:$0xff]  ;;  %v618_v10 = vld [vmem:[#allocation2 + $0x19] sm:$0xff]  ;;  %vm2044_vm3 = vcmask 9216  }
  0xbb   : > { %v622_v8 = vadd.f32 %v616_v55, %v3151_v11 }
  0xbd   : > { %v3155_v14 = vld [vmem:[#allocation2 + $0x8] sm:$0xff]  ;;  %v3163_v16 = vld [vmem:[#allocation2 + $0x10] sm:$0xf]  ;;  %v3171_v18 = vld [vmem:[#allocation2 + $0x20] sm:$0xff] }
  0xbe   : > { %373 = vrot.lane.b32.xlu1 %v3155_v14, %s2950_s11  ;;  %v3165_v17 = vld [vmem:[#allocation2 + $0x28] sm:$0xf]  ;;  %375 = vrot.lane.b32.xlu0 %v3163_v16, %s2950_s11 }
  0xbf   : > { %v617_v56 = vld [vmem:[#allocation2 + $0x9] sm:$0xff] }
  0xc0   : > { %v623_v9 = vadd.f32 %v617_v56, %v3155_v14  ;;  %v641_v55 = vld [vmem:[#allocation2 + $0xb] sm:$0xff] }
  0xc1   : > { %v3173_v19 = vld [vmem:[#allocation2 + $0x38] sm:$0xff]  ;;  %v3179_v20 = vld [vmem:[#allocation2 + $0x30] sm:$0xff]  ;;  %v3185_v21 = vld [vmem:[#allocation2 + $0x40] sm:$0xf] }
  0xc2   : > { %377 = vrot.lane.b32.xlu1 %v3159_v15, %s2950_s11  ;;  %379 = vrot.lane.b32.xlu0 %v3171_v18, %s2950_s11 }
  0xc6   : > { %381 = vrot.lane.b32.xlu1 %v3165_v17, %s2950_s11  ;;  %383 = vrot.lane.b32.xlu0 %v3179_v20, %s2950_s11 }
  0xca   : > { %385 = vrot.lane.b32.xlu1 %v3173_v19, %s2950_s11  ;;  %387 = vrot.lane.b32.xlu0 %v3185_v21, %s2950_s11 }
  0xce   : > { %407 = vrot.lane.b32.xlu1 %v3151_v11, %s2951_s12  ;;  %409 = vrot.lane.b32.xlu0 %v3155_v14, %s2951_s12 }
  0xd2   : > { %411 = vrot.lane.b32.xlu1 %v3163_v16, %s2951_s12  ;;  %413 = vrot.lane.b32.xlu0 %v3159_v15, %s2951_s12 }
  0xd6   : > { %415 = vrot.lane.b32.xlu1 %v3171_v18, %s2951_s12  ;;  %417 = vrot.lane.b32.xlu0 %v3165_v17, %s2951_s12 }
  0xda   : > { %419 = vrot.lane.b32.xlu1 %v3179_v20, %s2951_s12  ;;  %421 = vrot.lane.b32.xlu0 %v3173_v19, %s2951_s12 }
  0xde   : > { %423 = vrot.lane.b32.xlu1 %v3185_v21, %s2951_s12  ;;  %443 = vrot.lane.b32.xlu0 %v3151_v11, %s2952_s14 }
  0xe2   : > { %445 = vrot.lane.b32.xlu1 %v3155_v14, %s2952_s14  ;;  %447 = vrot.lane.b32.xlu0 %v3163_v16, %s2952_s14 }
  0xe6   : > { %449 = vrot.lane.b32.xlu1 %v3159_v15, %s2952_s14  ;;  %451 = vrot.lane.b32.xlu0 %v3171_v18, %s2952_s14 }
  0xea   : > { %453 = vrot.lane.b32.xlu1 %v3165_v17, %s2952_s14  ;;  %455 = vrot.lane.b32.xlu0 %v3179_v20, %s2952_s14 }
  0xee   : > { %457 = vrot.lane.b32.xlu1 %v3173_v19, %s2952_s14  ;;  %459 = vrot.lane.b32.xlu0 %v3185_v21, %s2952_s14 }
  0xf2   : > { %479 = vrot.lane.b32.xlu1 %v3151_v11, %s2953_s15  ;;  %481 = vrot.lane.b32.xlu0 %v3155_v14, %s2953_s15 }
  0xf6   : > { %483 = vrot.lane.b32.xlu1 %v3163_v16, %s2953_s15  ;;  %485 = vrot.lane.b32.xlu0 %v3159_v15, %s2953_s15 }
  0xfa   : > { %487 = vrot.lane.b32.xlu1 %v3171_v18, %s2953_s15  ;;  %489 = vrot.lane.b32.xlu0 %v3165_v17, %s2953_s15 }
  0xfe   : > { %491 = vrot.lane.b32.xlu1 %v3179_v20, %s2953_s15  ;;  %493 = vrot.lane.b32.xlu0 %v3173_v19, %s2953_s15 }
 0x102   : > { %495 = vrot.lane.b32.xlu1 %v3185_v21, %s2953_s15 }
 0x12c   : > { %v372_v23 = vpop.permute.xlu0 %371 }
 0x12d   : > { %v398_v45 = vadd.f32 %v3151_v11, %v372_v23 }
 0x130   : > { %v374_v22 = vpop.permute.xlu1 %373  ;;  %v376_v25 = vpop.permute.xlu0 %375 }
 0x131   : > { %v400_v49 = vadd.f32 %v376_v25, %v3163_v16  ;;  %v399_v57 = vadd.f32 %v3155_v14, %v374_v22  ;;  %v624_v14 = vadd.f32 %v618_v10, %v3159_v15 }
 0x134   : > { %v378_v24 = vpop.permute.xlu1 %377  ;;  %v380_v27 = vpop.permute.xlu0 %379 }
 0x135   : > { %v402_v58 = vadd.f32 %v3171_v18, %v380_v27  ;;  %v401_v12 = vadd.f32 %v3159_v15, %v378_v24  ;;  %v628_v27 = vld [vmem:[#allocation2 + $0x2] sm:$0xff] }
 0x136   : > { %v634_v11 = vadd.f32 %v628_v27, %v622_v8  ;;  %v640_v24 = vld [vmem:[#allocation2 + $0x3] sm:$0xff]  ;;  %v632_v8 = vld [vmem:[#allocation2 + $0x32] sm:$0xff] }
 0x138   : > { %v3241_v26 = vpop.permute.xlu1 %381  ;;  %v384_v29 = vpop.permute.xlu0 %383  ;;  %v646_v56 = vadd.f32 %v640_v24, %v634_v11  ;;  %v655_v24 = vld [vmem:[#allocation2 + $0x24] sm:$0xff] }
 0x139   : > { %v404_v13 = vadd.f32 %v3179_v20, %v384_v29  ;;  %v403_v29 = vadd.f32 %v3241_v26, %v3165_v17 }
 0x13c   : > { %v3243_v28 = vpop.permute.xlu1 %385  ;;  %v388_v31 = vpop.permute.xlu0 %387 }
 0x140   : > { %v408_v30 = vpop.permute.xlu1 %407  ;;  %v410_v33 = vpop.permute.xlu0 %409 }
 0x141   : > { %v434_v48 = vadd.f32 %v408_v30, %v398_v45  ;;  %v435_v62 = vadd.f32 %v410_v33, %v399_v57  ;;  %v629_v30 = vld [vmem:[#allocation2 + $0xa] sm:$0xff]  ;;  %v630_v45 = vld [vmem:[#allocation2 + $0x1a] sm:$0xff] }
 0x144   : > { %v412_v32 = vpop.permute.xlu1 %411  ;;  %v414_v35 = vpop.permute.xlu0 %413 }
 0x145   : > { %v436_v53 = vadd.f32 %v412_v32, %v400_v49  ;;  %v437_v32 = vadd.f32 %v414_v35, %v401_v12 }
 0x148   : > { %v416_v34 = vpop.permute.xlu1 %415  ;;  %v418_v37 = vpop.permute.xlu0 %417 }
 0x149   : > { %v438_v63 = vadd.f32 %v416_v34, %v402_v58 }
 0x14c   : > { %v420_v36 = vpop.permute.xlu1 %419  ;;  %v3245_v39 = vpop.permute.xlu0 %421 }
 0x14d   : > { %v440_v33 = vadd.f32 %v420_v36, %v404_v13 }
 0x150   : > { %v424_v38 = vpop.permute.xlu1 %423  ;;  %v444_v41 = vpop.permute.xlu0 %443 }
 0x151   : > { %v470_v50 = vadd.f32 %v444_v41, %v434_v48  ;;  %v619_v48 = vld [vmem:[#allocation2 + $0x21] sm:$0xff] }
 0x152   : > { %v625_v57 = vadd.f32 %v619_v48, %v3171_v18 }
 0x154   : > { %v446_v40 = vpop.permute.xlu1 %445  ;;  %v448_v43 = vpop.permute.xlu0 %447 }
 0x155   : > { %v472_v59 = vadd.f32 %v448_v43, %v436_v53  ;;  %v471_v16 = vadd.f32 %v446_v40, %v435_v62  ;;  %v635_v43 = vadd.f32 %v629_v30, %v623_v9  ;;  %v406_v40 = vadd.f32 %v388_v31, %v3185_v21  ;;  %v631_v21 = vld [vmem:[#allocation2 + $0x22] sm:$0xff] }
 0x156   : > { %v642_v31 = vld [vmem:[#allocation2 + $0x1b] sm:$0xff] }
 0x157   : > { %v647_v26 = vadd.f32 %v641_v55, %v635_v43 }
 0x158   : > { %v450_v42 = vpop.permute.xlu1 %449  ;;  %v452_v46 = vpop.permute.xlu0 %451 }
 0x159   : > { %v474_v22 = vadd.f32 %v452_v46, %v438_v63  ;;  %v473_v46 = vadd.f32 %v450_v42, %v437_v32  ;;  %v620_v42 = vld [vmem:[#allocation2 + $0x31] sm:$0xff]  ;;  %v643_v63 = vld [vmem:[#allocation2 + $0x23] sm:$0xff] }
 0x15c   : > { %v3247_v44 = vpop.permute.xlu1 %453  ;;  %v456_v51 = vpop.permute.xlu0 %455 }
 0x15d   : > { %v476_v49 = vadd.f32 %v456_v51, %v440_v33  ;;  %v405_v51 = vadd.f32 %v3173_v19, %v3243_v28 }
 0x15f   : > { %v441_v9 = vadd.f32 %v3245_v39, %v405_v51 }
 0x160   : > { %v3250_v47 = vpop.permute.xlu1 %457  ;;  %v460_v60 = vpop.permute.xlu0 %459 }
 0x161   : > { %v477_v33 = vadd.f32 %v3250_v47, %v441_v9 }
 0x164   : > { %v480_v52 = vpop.permute.xlu1 %479  ;;  %v482_v23 = vpop.permute.xlu0 %481 }
 0x165   : > { %v506_v54 = vadd.f32 %v480_v52, %v470_v50  ;;  %v507_v34 = vadd.f32 %v482_v23, %v471_v16  ;;  %v439_v50 = vadd.f32 %v418_v37, %v403_v29  ;;  %v442_v52 = vadd.f32 %v424_v38, %v406_v40  ;;  %v652_v37 = vld [vmem:[#allocation2 + $0x4] sm:$0xff]  ;;  %v653_v38 = vld [vmem:[#allocation2 + $0xc] sm:$0xff]  ;;  %v633_v16 = vld [vmem:[#allocation2 + $0x3a] sm:$0xff] }
 0x166   : > { %v659_v30 = vadd.f32 %v653_v38, %v647_v26 }
 0x167   : > { %516 = vst.msk [vmem:[#allocation3] sm:$0xff] %vm515_vm4, %v506_v54  ;;  %517 = vst.msk [vmem:[#allocation3 + $0x8] sm:$0xff] %vm515_vm4, %v507_v34  ;;  %v636_v54 = vadd.f32 %v630_v45, %v624_v14  ;;  %v475_v58 = vadd.f32 %v3247_v44, %v439_v50  ;;  %v658_v44 = vadd.f32 %v652_v37, %v646_v56 }
 0x168   : > { %v484_v61 = vpop.permute.xlu1 %483  ;;  %v486_v35 = vpop.permute.xlu0 %485 }
 0x169   : > { %v508_v7 = vadd.f32 %v484_v61, %v472_v59  ;;  %v509_v15 = vadd.f32 %v486_v35, %v473_v46  ;;  %v478_v59 = vadd.f32 %v460_v60, %v442_v52  ;;  %v621_v61 = vld [vmem:[#allocation2 + $0x39] sm:$0xff]  ;;  %v637_v60 = vadd.f32 %v631_v21, %v625_v57 }
 0x16a   : > { %v648_v13 = vadd.f32 %v642_v31, %v636_v54  ;;  %v627_v32 = vadd.f32 %v621_v61, %v3173_v19  ;;  %v645_v57 = vld [vmem:[#allocation2 + $0x3b] sm:$0xff] }
 0x16b   : > { %519 = vst.msk [vmem:[#allocation3 + $0x10] sm:$0xf] %vm518_vm5, %v508_v7  ;;  %v654_v7 = vld [vmem:[#allocation2 + $0x1c] sm:$0xff]  ;;  %v649_v29 = vadd.f32 %v643_v63, %v637_v60 }
 0x16c   : > { %v488_v25 = vpop.permute.xlu1 %487  ;;  %520 = vst.msk [vmem:[#allocation3 + $0x18] sm:$0xff] %vm515_vm4, %v509_v15  ;;  %v490_v62 = vpop.permute.xlu0 %489  ;;  %v660_v40 = vadd.f32 %v654_v7, %v648_v13  ;;  %v639_v52 = vadd.f32 %v633_v16, %v627_v32  ;;  %v644_v15 = vld [vmem:[#allocation2 + $0x33] sm:$0xff] }
 0x16d   : > { %v510_v41 = vadd.f32 %v488_v25, %v474_v22  ;;  %v511_v10 = vadd.f32 %v490_v62, %v475_v58  ;;  %v626_v22 = vadd.f32 %v620_v42, %v3179_v20  ;;  %v661_v58 = vadd.f32 %v655_v24, %v649_v29 }
 0x16e   : > { %v526_v17 = vld [vmem:[#allocation3] sm:$0xff]  ;;  %v527_v23 = vld [vmem:[#allocation3 + $0x8] sm:$0xff]  ;;  %v651_v7 = vadd.f32 %v645_v57, %v639_v52 }
 0x16f   : > { %521 = vst.msk [vmem:[#allocation3 + $0x20] sm:$0xff] %vm515_vm4, %v510_v41  ;;  %v532_v12 = vmul.f32 0.011170336, %v526_v17  ;;  %v538_v25 = vld [vmem:[#allocation3 + $0x1] sm:$0xff]  ;;  %v638_v46 = vadd.f32 %v632_v8, %v626_v22  ;;  %v533_v26 = vmul.f32 0.011170336, %v527_v23 }
 0x170   : > { %v492_v36 = vpop.permute.xlu1 %491  ;;  %v556_v27 = vld [vmem:[#allocation3 + $0x2] sm:$0xff]  ;;  %522 = vst.msk [vmem:[#allocation3 + $0x28] sm:$0xf] %vm518_vm5, %v511_v10  ;;  %v544_v11 = vmul.f32 0.023647603, %v538_v25  ;;  %v494_v20 = vpop.permute.xlu0 %493  ;;  %v656_v8 = vld [vmem:[#allocation2 + $0x34] sm:$0xff] }
 0x171   : > { %v512_v53 = vadd.f32 %v492_v36, %v476_v49  ;;  %v574_v34 = vld [vmem:[#allocation3 + $0x3] sm:$0xff]  ;;  %v513_v48 = vadd.f32 %v494_v20, %v477_v33  ;;  %v562_v47 = vmul.f32 0.030364122, %v556_v27  ;;  %v650_v37 = vadd.f32 %v644_v15, %v638_v46 }
 0x172   : > { %v592_v41 = vld [vmem:[#allocation3 + $0x4] sm:$0xff]  ;;  %v593_v45 = vld [vmem:[#allocation3 + $0xc] sm:$0xff]  ;;  %v550_v19 = vadd.f32 %v544_v11, %v532_v12  ;;  %v580_v56 = vmul.f32 0.023647603, %v574_v34 }
 0x173   : > { %523 = vst.msk [vmem:[#allocation3 + $0x30] sm:$0xff] %vm515_vm4, %v512_v53  ;;  %v539_v39 = vld [vmem:[#allocation3 + $0x9] sm:$0xff]  ;;  %v528_v49 = vld [vmem:[#allocation3 + $0x18] sm:$0xff]  ;;  %524 = vst.msk [vmem:[#allocation3 + $0x38] sm:$0xff] %vm515_vm4, %v513_v48  ;;  %v598_v31 = vmul.f32 0.011170336, %v592_v41  ;;  %v662_v32 = vadd.f32 %v656_v8, %v650_v37 }
 0x174   : > { %v496_v18 = vpop.permute.xlu1 %495  ;;  %v557_v14 = vld [vmem:[#allocation3 + $0xa] sm:$0xff]  ;;  %665 = vst.msk [vmem:[#allocation3] sm:$0xff] %vm664_vm6, %v658_v44  ;;  %v545_v50 = vmul.f32 0.023647603, %v539_v39  ;;  %v568_v55 = vadd.f32 %v562_v47, %v550_v19  ;;  %v534_v42 = vmul.f32 0.011170336, %v528_v49 }
 0x175   : > { %v514_v28 = vadd.f32 %v496_v18, %v478_v59  ;;  %v575_v43 = vld [vmem:[#allocation3 + $0xb] sm:$0xff]  ;;  %v657_v59 = vld [vmem:[#allocation2 + $0x3c] sm:$0xff]  ;;  %v563_v18 = vmul.f32 0.030364122, %v557_v14  ;;  %v599_v22 = vmul.f32 0.011170336, %v593_v45 }
 0x176   : > { %666 = vst.msk [vmem:[#allocation3 + $0x8] sm:$0xff] %vm664_vm6, %v659_v30  ;;  %v540_v35 = vld [vmem:[#allocation3 + $0x19] sm:$0xff]  ;;  %v586_v21 = vadd.f32 %v580_v56, %v568_v55  ;;  %v551_v63 = vadd.f32 %v545_v50, %v533_v26  ;;  %v581_v12 = vmul.f32 0.023647603, %v575_v43  ;;  %v663_v14 = vadd.f32 %v657_v59, %v651_v7 }
 0x177   : > { %525 = vst.msk [vmem:[#allocation3 + $0x40] sm:$0xf] %vm518_vm5, %v514_v28  ;;  %v558_v36 = vld [vmem:[#allocation3 + $0x1a] sm:$0xff]  ;;  %v546_v51 = vmul.f32 0.023647603, %v540_v35  ;;  %v559_v61 = vld [vmem:[#allocation3 + $0x22] sm:$0xff] }
 0x178   : > { %v576_v53 = vld [vmem:[#allocation3 + $0x1b] sm:$0xff]  ;;  %v577_v62 = vld [vmem:[#allocation3 + $0x23] sm:$0xff]  ;;  %v604_v28 = vadd.f32 %v598_v31, %v586_v21  ;;  %v569_v23 = vadd.f32 %v563_v18, %v551_v63  ;;  %v564_v30 = vmul.f32 0.030364122, %v558_v36  ;;  %v565_v36 = vmul.f32 0.030364122, %v559_v61 }
 0x179   : > { %v3281_v54 = vld [vmem:[#allocation3 + $0x1c] sm:$0xff]  ;;  %v595_v9 = vld [vmem:[#allocation3 + $0x24] sm:$0xff]  ;;  %v552_v44 = vadd.f32 %v546_v51, %v534_v42  ;;  %v582_v50 = vmul.f32 0.023647603, %v576_v53  ;;  %v583_v51 = vmul.f32 0.023647603, %v577_v62 }
 0x17a   : > { %v529_v17 = vld [vmem:[#allocation3 + $0x20] sm:$0xff]  ;;  %667 = vst.msk [vmem:[#allocation3 + $0x18] sm:$0xff] %vm664_vm6, %v660_v40  ;;  %v530_v60 = vld [vmem:[#allocation3 + $0x30] sm:$0xff]  ;;  %v531_v33 = vld [vmem:[#allocation3 + $0x38] sm:$0xff]  ;;  %v587_v11 = vadd.f32 %v581_v12, %v569_v23  ;;  %v600_v56 = vmul.f32 0.011170336, %v3281_v54 }
 0x17b   : > { %v541_v38 = vld [vmem:[#allocation3 + $0x21] sm:$0xff]  ;;  %v542_v34 = vld [vmem:[#allocation3 + $0x31] sm:$0xff]  ;;  %v535_v48 = vmul.f32 0.011170336, %v529_v17  ;;  %v570_v19 = vadd.f32 %v564_v30, %v552_v44  ;;  %v536_v21 = vmul.f32 0.011170336, %v530_v60 }
 0x17c   : > { %v3285_v10 = vld [vmem:[#allocation3] sm:$0xff]  ;;  %668 = vst.msk [vmem:[#allocation3 + $0x20] sm:$0xff] %vm664_vm6, %v661_v58  ;;  %v560_v41 = vld [vmem:[#allocation3 + $0x32] sm:$0xff]  ;;  %v605_v46 = vadd.f32 %v599_v22, %v587_v11  ;;  %v547_v49 = vmul.f32 0.023647603, %v541_v38  ;;  %vm2037_vm5 = vcmask 41984  }
 0x17d   : > { %v3288_v13 = vmul.f32 0.023647603, %v3285_v10  ;;  %v3291_v16 = vld [vmem:[#allocation3 + $0x8] sm:$0xff]  ;;  %v3297_v27 = vmul.f32 0.011170336, %v3285_v10  ;;  %v578_v43 = vld [vmem:[#allocation3 + $0x33] sm:$0xff]  ;;  %v588_v26 = vadd.f32 %v582_v50, %v570_v19 }
 0x17e   : > { %v3294_v25 = vmul.f32 0.023647603, %v3291_v16  ;;  %v3302_v39 = vmul.f32 0.011170336, %v3291_v16  ;;  %v596_v45 = vld [vmem:[#allocation3 + $0x34] sm:$0xff]  ;;  %v597_v40 = vld [vmem:[#allocation3 + $0x3c] sm:$0xff]  ;;  %v553_v17 = vadd.f32 %v547_v49, %v535_v48 }
 0x17f   : > { %701 = vrot.lane.b32.xlu0 %v3288_v13, %s2950_s11  ;;  %v543_v20 = vld [vmem:[#allocation3 + $0x39] sm:$0xff]  ;;  %v3307_v24 = vadd.f32 %v3297_v27, %v604_v28  ;;  %669 = vst.msk [vmem:[#allocation3 + $0x30] sm:$0xff] %vm664_vm6, %v662_v32  ;;  %v548_v31 = vmul.f32 0.023647603, %v542_v34  ;;  %v606_v59 = vadd.f32 %v600_v56, %v588_v26  ;;  %v566_v37 = vmul.f32 0.030364122, %v560_v41 }
 0x180   : > { %703 = vrot.lane.b32.xlu1 %v3294_v25, %s2950_s11  ;;  %v561_v47 = vld [vmem:[#allocation3 + $0x3a] sm:$0xff]  ;;  %v3314_v55 = vadd.f32 %v3302_v39, %v605_v46  ;;  %v571_v58 = vadd.f32 %v565_v36, %v553_v17  ;;  %v601_v38 = vmul.f32 0.011170336, %v595_v9  ;;  %v584_v12 = vmul.f32 0.023647603, %v578_v43 }
 0x181   : > { %v579_v29 = vld [vmem:[#allocation3 + $0x3b] sm:$0xff]  ;;  %v554_v53 = vadd.f32 %v548_v31, %v536_v21  ;;  %v549_v62 = vmul.f32 0.023647603, %v543_v20  ;;  %v602_v30 = vmul.f32 0.011170336, %v596_v45 }
 0x182   : > { %670 = vst.msk [vmem:[#allocation3 + $0x38] sm:$0xff] %vm664_vm6, %v663_v14  ;;  %v673_v35 = vld [vmem:[#allocation3 + $0x18] sm:$0xff]  ;;  %v589_v63 = vadd.f32 %v583_v51, %v571_v58  ;;  %v537_v32 = vmul.f32 0.011170336, %v531_v33  ;;  %v725_v34 = vmul.f32 0.030364122, %v3285_v10 }
 0x183   : > { %v691_v52 = vmul.f32 0.023647603, %v673_v35  ;;  %v3311_v15 = vmul.f32 0.011170336, %v673_v35  ;;  %v674_v57 = vld [vmem:[#allocation3 + $0x20] sm:$0xff]  ;;  %v572_v7 = vadd.f32 %v566_v37, %v554_v53  ;;  %vm2064_vm6 = vcmask 25616  }
 0x184   : > { %v692_v42 = vmul.f32 0.023647603, %v674_v57  ;;  %v680_v18 = vmul.f32 0.011170336, %v674_v57  ;;  %v607_v60 = vadd.f32 %v601_v38, %v589_v63  ;;  %v726_v11 = vmul.f32 0.030364122, %v3291_v16 }
 0x185   : > { %705 = vrot.lane.b32.xlu0 %v691_v52, %s2950_s11  ;;  %v3320_v54 = vadd.f32 %v3311_v15, %v606_v59  ;;  %v590_v23 = vadd.f32 %v584_v12, %v572_v7  ;;  %v567_v14 = vmul.f32 0.030364122, %v561_v47  ;;  %v555_v48 = vadd.f32 %v549_v62, %v537_v32 }
 0x186   : > { %707 = vrot.lane.b32.xlu1 %v692_v42, %s2950_s11  ;;  %v675_v61 = vld [vmem:[#allocation3 + $0x30] sm:$0xff]  ;;  %v686_v9 = vadd.f32 %v680_v18, %v607_v60  ;;  %v585_v20 = vmul.f32 0.023647603, %v579_v29  ;;  %v727_v46 = vmul.f32 0.030364122, %v673_v35 }
 0x187   : > { %v693_v8 = vmul.f32 0.023647603, %v675_v61  ;;  %v681_v22 = vmul.f32 0.011170336, %v675_v61  ;;  %v608_v41 = vadd.f32 %v602_v30, %v590_v23  ;;  %v573_v19 = vadd.f32 %v567_v14, %v555_v48 }
 0x188   : > { %v728_v45 = vmul.f32 0.030364122, %v674_v57  ;;  %v603_v36 = vmul.f32 0.011170336, %v597_v40  ;;  %v729_v16 = vmul.f32 0.030364122, %v675_v61 }
 0x189   : > { %v676_v28 = vld [vmem:[#allocation3 + $0x38] sm:$0xff]  ;;  %709 = vrot.lane.b32.xlu0 %v693_v8, %s2950_s11  ;;  %v687_v43 = vadd.f32 %v681_v22, %v608_v41  ;;  %v591_v50 = vadd.f32 %v585_v20, %v573_v19 }
 0x18a   : > { %v694_v44 = vmul.f32 0.023647603, %v676_v28  ;;  %v682_v49 = vmul.f32 0.011170336, %v676_v28  ;;  %v730_v33 = vmul.f32 0.030364122, %v676_v28 }
 0x18b   : > { %v609_v10 = vadd.f32 %v603_v36, %v591_v50 }
 0x18c   : > { %711 = vrot.lane.b32.xlu1 %v694_v44, %s2950_s11 }
 0x18d   : > { %737 = vrot.lane.b32.xlu0 %v725_v34, %s2951_s12  ;;  %v688_v47 = vadd.f32 %v682_v49, %v609_v10 }
 0x190   : > { %739 = vrot.lane.b32.xlu1 %v726_v11, %s2951_s12 }
 0x191   : > { %741 = vrot.lane.b32.xlu0 %v727_v46, %s2951_s12 }
 0x194   : > { %743 = vrot.lane.b32.xlu1 %v728_v45, %s2951_s12 }
 0x195   : > { %745 = vrot.lane.b32.xlu0 %v729_v16, %s2951_s12 }
 0x198   : > { %747 = vrot.lane.b32.xlu1 %v730_v33, %s2951_s12 }
 0x199   : > { %761 = vrot.lane.b32.xlu0 %v3288_v13, %s2952_s14 }
 0x19c   : > { %763 = vrot.lane.b32.xlu1 %v3294_v25, %s2952_s14 }
 0x19d   : > { %765 = vrot.lane.b32.xlu0 %v691_v52, %s2952_s14 }
 0x1a0   : > { %767 = vrot.lane.b32.xlu1 %v692_v42, %s2952_s14 }
 0x1a1   : > { %769 = vrot.lane.b32.xlu0 %v693_v8, %s2952_s14 }
 0x1a4   : > { %771 = vrot.lane.b32.xlu1 %v694_v44, %s2952_s14 }
 0x1a5   : > { %791 = vrot.lane.b32.xlu0 %v3297_v27, %s2953_s15 }
 0x1a8   : > { %793 = vrot.lane.b32.xlu1 %v3302_v39, %s2953_s15 }
 0x1a9   : > { %795 = vrot.lane.b32.xlu0 %v3311_v15, %s2953_s15 }
 0x1ac   : > { %797 = vrot.lane.b32.xlu1 %v680_v18, %s2953_s15 }
 0x1ad   : > { %799 = vrot.lane.b32.xlu0 %v681_v22, %s2953_s15 }
 0x1b0   : > { %801 = vrot.lane.b32.xlu1 %v682_v49, %s2953_s15 }
 0x1f1   : > { %v702_v13 = vpop.permute.xlu0 %701 }
 0x1f2   : > { %v704_v25 = vpop.permute.xlu1 %703  ;;  %v719_v51 = vadd.f32 %v702_v13, %v3307_v24 }
 0x1f3   : > { %v720_v58 = vadd.f32 %v704_v25, %v3314_v55 }
 0x1f7   : > { %v706_v29 = vpop.permute.xlu0 %705 }
 0x1f8   : > { %v708_v40 = vpop.permute.xlu1 %707  ;;  %v721_v61 = vadd.f32 %v706_v29, %v3320_v54 }
 0x1f9   : > { %v722_v63 = vadd.f32 %v708_v40, %v686_v9 }
 0x1fb   : > { %v710_v35 = vpop.permute.xlu0 %709 }
 0x1fc   : > { %v723_v22 = vadd.f32 %v710_v35, %v687_v43 }
 0x1fe   : > { %v712_v52 = vpop.permute.xlu1 %711 }
 0x1ff   : > { %v738_v56 = vpop.permute.xlu0 %737  ;;  %v724_v23 = vadd.f32 %v712_v52, %v688_v47 }
 0x200   : > { %v755_v53 = vadd.f32 %v738_v56, %v719_v51 }
 0x202   : > { %v740_v27 = vpop.permute.xlu1 %739 }
 0x203   : > { %v742_v57 = vpop.permute.xlu0 %741  ;;  %v756_v38 = vadd.f32 %v740_v27, %v720_v58 }
 0x204   : > { %v757_v28 = vadd.f32 %v742_v57, %v721_v61 }
 0x206   : > { %v744_v17 = vpop.permute.xlu1 %743 }
 0x207   : > { %v746_v39 = vpop.permute.xlu0 %745  ;;  %v758_v60 = vadd.f32 %v744_v17, %v722_v63 }
 0x208   : > { %v759_v32 = vadd.f32 %v746_v39, %v723_v22 }
 0x20a   : > { %v748_v26 = vpop.permute.xlu1 %747 }
 0x20b   : > { %v762_v21 = vpop.permute.xlu0 %761  ;;  %v760_v41 = vadd.f32 %v748_v26, %v724_v23 }
 0x20c   : > { %v779_v18 = vadd.f32 %v762_v21, %v755_v53 }
 0x20e   : > { %v764_v15 = vpop.permute.xlu1 %763 }
 0x20f   : > { %v766_v31 = vpop.permute.xlu0 %765  ;;  %v780_v7 = vadd.f32 %v764_v15, %v756_v38 }
 0x210   : > { %v781_v24 = vadd.f32 %v766_v31, %v757_v28 }
 0x212   : > { %v768_v42 = vpop.permute.xlu1 %767 }
 0x213   : > { %v770_v59 = vpop.permute.xlu0 %769  ;;  %v782_v30 = vadd.f32 %v768_v42, %v758_v60 }
 0x216   : > { %v772_v37 = vpop.permute.xlu1 %771 }
 0x217   : > { %v792_v8 = vpop.permute.xlu0 %791  ;;  %v784_v48 = vadd.f32 %v772_v37, %v760_v41 }
 0x218   : > { %v809_v12 = vadd.f32 %v792_v8, %v779_v18 }
 0x21a   : > { %v794_v44 = vpop.permute.xlu1 %793  ;;  %v815_v55 = vsub.f32 %v3122_v1, %v809_v12  ;;  %827 = vst.msk [vmem:[#allocation2] sm:$0xff] %vm515_vm4, %v809_v12 }
 0x21b   : > { %v810_v62 = vadd.f32 %v794_v44, %v780_v7  ;;  %v796_v9 = vpop.permute.xlu0 %795 }
 0x21c   : > { %821 = vst.msk [vmem:[%s3358_s7] sm:$0xff] %vm515_vm4, %v815_v55  ;;  %v811_v1 = vadd.f32 %v796_v9, %v781_v24 }
 0x21d   : > { %v816_v54 = vsub.f32 %v3132_v3, %v810_v62  ;;  %828 = vst.msk [vmem:[#allocation2 + $0x8] sm:$0xff] %vm515_vm4, %v810_v62  ;;  %v783_v3 = vadd.f32 %v770_v59, %v759_v32 }
 0x21e   : > { %v798_v34 = vpop.permute.xlu1 %797  ;;  %v817_v14 = vsub.f32 %v3125_v2, %v811_v1  ;;  %829 = vst.msk [vmem:[#allocation2 + $0x18] sm:$0xff] %vm515_vm4, %v811_v1 }
 0x21f   : > { %822 = vst.msk [vmem:[%s3358_s7 + $0x8] sm:$0xff] %vm515_vm4, %v816_v54  ;;  %v812_v11 = vadd.f32 %v798_v34, %v782_v30  ;;  %v800_v20 = vpop.permute.xlu0 %799 }
 0x220   : > { %823 = vst.msk [vmem:[%s3358_s7 + $0x10] sm:$0xff] %vm515_vm4, %v817_v14  ;;  %v813_v19 = vadd.f32 %v800_v20, %v783_v3 }
 0x221   : > { %v818_v43 = vsub.f32 %v3135_v4, %v812_v11  ;;  %830 = vst.msk [vmem:[#allocation2 + $0x20] sm:$0xff] %vm515_vm4, %v812_v11 }
 0x222   : > { %v802_v46 = vpop.permute.xlu1 %801  ;;  %v819_v49 = vsub.f32 %v3145_v6, %v813_v19  ;;  %831 = vst.msk [vmem:[#allocation2 + $0x30] sm:$0xff] %vm515_vm4, %v813_v19 }
 0x223   : > { %824 = vst.msk [vmem:[%s3358_s7 + $0x18] sm:$0xff] %vm515_vm4, %v818_v43  ;;  %v814_v45 = vadd.f32 %v802_v46, %v784_v48 }
 0x224   : > { %v833_v2 = vld [vmem:[#allocation2] ss:$2 sm:$0xff]  ;;  %v839_v36 = vld [vmem:[#allocation2 + $0x1] ss:$2 sm:$0xff]  ;;  %825 = vst.msk [vmem:[%s3358_s7 + $0x20] sm:$0xff] %vm515_vm4, %v819_v49 }
 0x225   : > { %v820_v4 = vsub.f32 %v3142_v5, %v814_v45  ;;  %832 = vst.msk [vmem:[#allocation2 + $0x38] sm:$0xff] %vm515_vm4, %v814_v45  ;;  %v844_v50 = vadd.f32 %v839_v36, %v833_v2 }
 0x226   : > { %1070 = vst.msk [vmem:[#allocation2 + $0x2] sm:$0xff] %vm308_vm1, %v2948_v0 }
 0x227   : > { %826 = vst.msk [vmem:[%s3358_s7 + $0x28] sm:$0xff] %vm515_vm4, %v820_v4  ;;  %847 = vxpose.xlu0.b32.start.end [1/1] (short) (narrow) %v844_v50, 16  ;;  %vm2048_vm4 = vcmask 42016  }
 0x228   : > { %v835_v10 = vld [vmem:[#allocation2 + $0x18] ss:$2 sm:$0xff]  ;;  %v841_v16 = vld [vmem:[#allocation2 + $0x19] ss:$2 sm:$0xff]  ;;  %1074 = vst.msk [vmem:[#allocation2 + $0x2] sm:$0xff] %vm1073_vm8, %v2948_v0 }
 0x229   : > { %v845_v6 = vadd.f32 %v841_v16, %v835_v10  ;;  %1071 = vst.msk [vmem:[#allocation2 + $0x1a] sm:$0xff] %vm308_vm1, %v2948_v0 }
 0x22a   : > { %1075 = vst.msk [vmem:[#allocation2 + $0x1a] sm:$0xff] %vm1073_vm8, %v2948_v0 }
 0x22b   : > { %879 = vxpose.xlu1.b32.start.end [1/1] (short) (narrow) %v845_v6, 16  ;;  %1064 = vst.msk [vmem:[#allocation2] sm:$0x3] %vm1063_vm9, %v2948_v0  ;;  %1065 = vst.msk [vmem:[#allocation2 + $0x18] sm:$0x3] %vm1063_vm9, %v2948_v0 }
 0x22c   : > { %v837_v33 = vld [vmem:[#allocation2 + $0x30] ss:$2 sm:$0xff]  ;;  %v843_v5 = vld [vmem:[#allocation2 + $0x31] ss:$2 sm:$0xff]  ;;  %1067 = vst.msk [vmem:[#allocation2 + $0xa] sm:$0x3] %vm1063_vm9, %v2948_v0 }
 0x22d   : > { %v846_v47 = vadd.f32 %v843_v5, %v837_v33  ;;  %1072 = vst.msk [vmem:[#allocation2 + $0x32] sm:$0xff] %vm308_vm1, %v2948_v0  ;;  %vm1606_vm1 = vcmask 44048  }
 0x22e   : > { %1076 = vst.msk [vmem:[#allocation2 + $0x32] sm:$0xff] %vm1073_vm8, %v2948_v0  ;;  %vm2384_vm8 = vcmask 1024  }
 0x22f   : > { %911 = vxpose.xlu0.b32.start.end [1/1] (short) (narrow) %v846_v47, 16  ;;  %1066 = vst.msk [vmem:[#allocation2 + $0x30] sm:$0x3] %vm1063_vm9, %v2948_v0  ;;  %1068 = vst.msk [vmem:[#allocation2 + $0x22] sm:$0x3] %vm1063_vm9, %v2948_v0 }
 0x230   : > { %1069 = vst.msk [vmem:[#allocation2 + $0x3a] sm:$0x3] %vm1063_vm9, %v2948_v0 }
 0x2a3   : > { %v863_v13 = vpop.trf.xlu0 }
 0x2a4   : > { %944 = vst.msk [vmem:[#allocation4] sm:$0xff] %vm943_vm7, %v863_v13 }
 0x2a7   : > { %v895_v25 = vpop.trf.xlu1  ;;  %v864_v29 = vpop.trf.xlu0 }
 0x2a8   : > { %946 = vst.msk [vmem:[#allocation4 + $0x10] sm:$0xff] %vm943_vm7, %v895_v25  ;;  %945 = vst.msk [vmem:[#allocation4 + $0x8] sm:$0xff] %vm943_vm7, %v864_v29 }
 0x2ab   : > { %v896_v40 = vpop.trf.xlu1  ;;  %v927_v35 = vpop.trf.xlu0 }
 0x2ac   : > { %947 = vst.msk [vmem:[#allocation4 + $0x18] sm:$0xff] %vm943_vm7, %v896_v40  ;;  %948 = vst.msk [vmem:[#allocation4 + $0x20] sm:$0xff] %vm943_vm7, %v927_v35 }
 0x2af   : > { %v928_v52 = vpop.trf.xlu0  ;;  %v950_v56 = vld [vmem:[#allocation4] ss:$2 sm:$0xff]  ;;  %v956_v27 = vld [vmem:[#allocation4 + $0x1] ss:$2 sm:$0xff] }
 0x2b0   : > { %949 = vst.msk [vmem:[#allocation4 + $0x28] sm:$0xff] %vm943_vm7, %v928_v52  ;;  %v961_v57 = vadd.f32 %v956_v27, %v950_v56 }
 0x2b2   : > { %964 = vxpose.xlu0.b32.start.end [1/1] (short) (narrow) %v961_v57, 8 }
 0x2b3   : > { %v952_v17 = vld [vmem:[#allocation4 + $0x10] ss:$2 sm:$0xff]  ;;  %v958_v39 = vld [vmem:[#allocation4 + $0x11] ss:$2 sm:$0xff] }
 0x2b4   : > { %v962_v26 = vadd.f32 %v958_v39, %v952_v17 }
 0x2b6   : > { %996 = vxpose.xlu0.b32.start.end [1/1] (short) (narrow) %v962_v26, 8 }
 0x2b7   : > { %v954_v21 = vld [vmem:[#allocation4 + $0x20] ss:$2 sm:$0xff]  ;;  %v960_v15 = vld [vmem:[#allocation4 + $0x21] ss:$2 sm:$0xff] }
 0x2b8   : > { %v963_v31 = vadd.f32 %v960_v15, %v954_v21 }
 0x2ba   : > { %1028 = vxpose.xlu1.b32.start.end [1/1] (short) (narrow) %v963_v31, 8 }
 0x32e   : > { %v980_v42 = vpop.trf.xlu0 }
 0x32f   : > { %v3395_v51 = vmul.f32 0.25, %v980_v42 }
 0x331   : > { %1080 = vrot.lane.b32.xlu0 %v3395_v51, %s2949_s28 }
 0x332   : > { %v1012_v58 = vpop.trf.xlu0 }
 0x333   : > { %v3405_v59 = vmul.f32 0.25, %v1012_v58 }
 0x335   : > { %1082 = vrot.lane.b32.xlu1 %v3405_v59, %s2949_s28 }
 0x336   : > { %v1044_v53 = vpop.trf.xlu1 }
 0x337   : > { %v3409_v37 = vmul.f32 0.25, %v1044_v53 }
 0x339   : > { %1084 = vrot.lane.b32.xlu1 %v3409_v37, %s2949_s28 }
 0x3a3   : > { %v1081_v38 = vpop.permute.xlu0 %1080 }
 0x3a4   : > { %1090 = vst.msk [vmem:[#allocation2 + $0x2] sm:$0xff] %vm1089_vm10, %v1081_v38 }
 0x3a7   : > { %v1083_v61 = vpop.permute.xlu1 %1082 }
 0x3a8   : > { %1091 = vst.msk [vmem:[#allocation2 + $0x1a] sm:$0xff] %vm1089_vm10, %v1083_v61 }
 0x3ab   : > { %v1085_v18 = vpop.permute.xlu1 %1084  ;;  %v1093_v63 = vld [vmem:[#allocation2] sm:$0xff]  ;;  %v1094_v8 = vld [vmem:[#allocation2 + $0x8] sm:$0xf] }
 0x3ac   : > { %1092 = vst.msk [vmem:[#allocation2 + $0x32] sm:$0xff] %vm1089_vm10, %v1085_v18  ;;  %1105 = vrot.lane.b32.xlu1 %v1093_v63, %s2950_s11  ;;  %v1253_v19 = vld [vmem:[#allocation2 + $0x1] sm:$0xff] }
 0x3ad   : > { %v1256_v16 = vadd.f32 %v1253_v19, %v1093_v63  ;;  %v1259_v40 = vld [vmem:[#allocation2 + $0x2] sm:$0xff] }
 0x3ae   : > { %v1265_v53 = vld [vmem:[#allocation2 + $0x3] sm:$0xff] }
 0x3af   : > { %v3414_v7 = vld [vmem:[#allocation2 + $0x18] sm:$0xff]  ;;  %v1096_v28 = vld [vmem:[#allocation2 + $0x20] sm:$0xf]  ;;  %v1262_v57 = vadd.f32 %v1259_v40, %v1256_v16 }
 0x3b0   : > { %1109 = vrot.lane.b32.xlu0 %v3414_v7, %s2950_s11  ;;  %1107 = vrot.lane.b32.xlu1 %v1094_v8, %s2950_s11  ;;  %v1254_v6 = vld [vmem:[#allocation2 + $0x19] sm:$0xff] }
 0x3b1   : > { %v1257_v17 = vadd.f32 %v1254_v6, %v3414_v7  ;;  %v1260_v39 = vld [vmem:[#allocation2 + $0x1a] sm:$0xff] }
 0x3b3   : > { %v3419_v12 = vld [vmem:[#allocation2 + $0x30] sm:$0xff]  ;;  %v3424_v44 = vld [vmem:[#allocation2 + $0x38] sm:$0xf] }
 0x3b4   : > { %1113 = vrot.lane.b32.xlu0 %v3419_v12, %s2950_s11  ;;  %1111 = vrot.lane.b32.xlu1 %v1096_v28, %s2950_s11  ;;  %v1255_v26 = vld [vmem:[#allocation2 + $0x31] sm:$0xff] }
 0x3b5   : > { %v1273_v6 = vld [vmem:[#allocation2 + $0x34] sm:$0xff] }
 0x3b8   : > { %1129 = vrot.lane.b32.xlu0 %v1093_v63, %s2951_s12  ;;  %1115 = vrot.lane.b32.xlu1 %v3424_v44, %s2950_s11 }
 0x3bc   : > { %1133 = vrot.lane.b32.xlu0 %v3414_v7, %s2951_s12  ;;  %1131 = vrot.lane.b32.xlu1 %v1094_v8, %s2951_s12 }
 0x3c0   : > { %1137 = vrot.lane.b32.xlu0 %v3419_v12, %s2951_s12  ;;  %1135 = vrot.lane.b32.xlu1 %v1096_v28, %s2951_s12 }
 0x3c4   : > { %1153 = vrot.lane.b32.xlu0 %v1093_v63, %s2952_s14  ;;  %1139 = vrot.lane.b32.xlu1 %v3424_v44, %s2951_s12 }
 0x3c8   : > { %1157 = vrot.lane.b32.xlu0 %v3414_v7, %s2952_s14  ;;  %1155 = vrot.lane.b32.xlu1 %v1094_v8, %s2952_s14 }
 0x3cc   : > { %1161 = vrot.lane.b32.xlu0 %v3419_v12, %s2952_s14  ;;  %1159 = vrot.lane.b32.xlu1 %v1096_v28, %s2952_s14 }
 0x3d0   : > { %1177 = vrot.lane.b32.xlu0 %v1093_v63, %s2953_s15  ;;  %1163 = vrot.lane.b32.xlu1 %v3424_v44, %s2952_s14 }
 0x3d4   : > { %1181 = vrot.lane.b32.xlu0 %v3414_v7, %s2953_s15  ;;  %1179 = vrot.lane.b32.xlu1 %v1094_v8, %s2953_s15 }
 0x3d8   : > { %1185 = vrot.lane.b32.xlu0 %v3419_v12, %s2953_s15  ;;  %1183 = vrot.lane.b32.xlu1 %v1096_v28, %s2953_s15 }
 0x3dc   : > { %1187 = vrot.lane.b32.xlu1 %v3424_v44, %s2953_s15 }
 0x41e   : > { %v1106_v60 = vpop.permute.xlu1 %1105 }
 0x41f   : > { %v1123_v14 = vadd.f32 %v1106_v60, %v1093_v63  ;;  %v1263_v63 = vadd.f32 %v1260_v39, %v1257_v17  ;;  %v1266_v60 = vld [vmem:[#allocation2 + $0x1b] sm:$0xff] }
 0x422   : > { %v1108_v62 = vpop.permute.xlu1 %1107  ;;  %v1110_v22 = vpop.permute.xlu0 %1109 }
 0x423   : > { %v1124_v46 = vadd.f32 %v1108_v62, %v1094_v8  ;;  %v1125_v45 = vadd.f32 %v1110_v22, %v3414_v7  ;;  %v1268_v8 = vadd.f32 %v1265_v53, %v1262_v57  ;;  %v1258_v7 = vadd.f32 %v1255_v26, %v3419_v12 }
 0x426   : > { %v1112_v24 = vpop.permute.xlu1 %1111  ;;  %v1114_v55 = vpop.permute.xlu0 %1113 }
 0x427   : > { %v1126_v33 = vadd.f32 %v1112_v24, %v1096_v28  ;;  %v1127_v5 = vadd.f32 %v1114_v55, %v3419_v12  ;;  %v1261_v28 = vld [vmem:[#allocation2 + $0x32] sm:$0xff]  ;;  %v1271_v24 = vld [vmem:[#allocation2 + $0x4] sm:$0xff] }
 0x42a   : > { %v1116_v23 = vpop.permute.xlu1 %1115  ;;  %v1130_v30 = vpop.permute.xlu0 %1129 }
 0x42b   : > { %v1147_v20 = vadd.f32 %v1130_v30, %v1123_v14  ;;  %v1128_v21 = vadd.f32 %v1116_v23, %v3424_v44  ;;  %v1274_v23 = vadd.f32 %v1271_v24, %v1268_v8  ;;  %v1264_v30 = vadd.f32 %v1261_v28, %v1258_v7  ;;  %v1272_v14 = vld [vmem:[#allocation2 + $0x1c] sm:$0xff] }
 0x42e   : > { %v1132_v54 = vpop.permute.xlu1 %1131  ;;  %v1134_v9 = vpop.permute.xlu0 %1133 }
 0x42f   : > { %v1148_v4 = vadd.f32 %v1132_v54, %v1124_v46  ;;  %v1149_v50 = vadd.f32 %v1134_v9, %v1125_v45  ;;  %v1269_v54 = vadd.f32 %v1266_v60, %v1263_v63  ;;  %v1267_v9 = vld [vmem:[#allocation2 + $0x33] sm:$0xff] }
 0x430   : > { %v1270_v19 = vadd.f32 %v1267_v9, %v1264_v30 }
 0x432   : > { %v1136_v32 = vpop.permute.xlu1 %1135  ;;  %v1138_v1 = vpop.permute.xlu0 %1137 }
 0x433   : > { %v1150_v35 = vadd.f32 %v1136_v32, %v1126_v33  ;;  %v1151_v52 = vadd.f32 %v1138_v1, %v1127_v5 }
 0x436   : > { %v1140_v34 = vpop.permute.xlu1 %1139  ;;  %v1154_v41 = vpop.permute.xlu0 %1153 }
 0x437   : > { %v1171_v49 = vadd.f32 %v1154_v41, %v1147_v20  ;;  %v1152_v38 = vadd.f32 %v1140_v34, %v1128_v21  ;;  %v1275_v20 = vadd.f32 %v1272_v14, %v1269_v54 }
 0x43a   : > { %v1156_v11 = vpop.permute.xlu1 %1155  ;;  %v1158_v3 = vpop.permute.xlu0 %1157 }
 0x43b   : > { %v1172_v47 = vadd.f32 %v1156_v11, %v1148_v4  ;;  %v1173_v13 = vadd.f32 %v1158_v3, %v1149_v50 }
 0x43e   : > { %v1160_v48 = vpop.permute.xlu1 %1159  ;;  %v1162_v43 = vpop.permute.xlu0 %1161 }
 0x43f   : > { %v1174_v15 = vadd.f32 %v1160_v48, %v1150_v35  ;;  %v1175_v31 = vadd.f32 %v1162_v43, %v1151_v52 }
 0x442   : > { %v1164_v2 = vpop.permute.xlu1 %1163  ;;  %v1178_v36 = vpop.permute.xlu0 %1177 }
 0x443   : > { %v1195_v10 = vadd.f32 %v1178_v36, %v1171_v49  ;;  %v1176_v62 = vadd.f32 %v1164_v2, %v1152_v38 }
 0x445   : > { %1201 = vst.msk [vmem:[#allocation3] sm:$0xff] %vm943_vm7, %v1195_v10 }
 0x446   : > { %v1180_v25 = vpop.permute.xlu1 %1179  ;;  %v1182_v29 = vpop.permute.xlu0 %1181 }
 0x447   : > { %v1196_v56 = vadd.f32 %v1180_v25, %v1172_v47  ;;  %v1197_v27 = vadd.f32 %v1182_v29, %v1173_v13  ;;  %v1276_v25 = vadd.f32 %v1273_v6, %v1270_v19 }
 0x449   : > { %1203 = vst.msk [vmem:[#allocation3 + $0x8] sm:$0xf] %vm1202_vm11, %v1196_v56 }
 0x44a   : > { %1204 = vst.msk [vmem:[#allocation3 + $0x18] sm:$0xff] %vm943_vm7, %v1197_v27  ;;  %v1184_v42 = vpop.permute.xlu1 %1183  ;;  %v1186_v58 = vpop.permute.xlu0 %1185 }
 0x44b   : > { %v1198_v61 = vadd.f32 %v1184_v42, %v1174_v15  ;;  %v1199_v18 = vadd.f32 %v1186_v58, %v1175_v31 }
 0x44c   : > { %v1208_v44 = vld [vmem:[#allocation3] sm:$0xff] }
 0x44d   : > { %1205 = vst.msk [vmem:[#allocation3 + $0x20] sm:$0xf] %vm1202_vm11, %v1198_v61  ;;  %v1211_v41 = vmul.f32 0.011170336, %v1208_v44 }
 0x44e   : > { %1206 = vst.msk [vmem:[#allocation3 + $0x30] sm:$0xff] %vm943_vm7, %v1199_v18  ;;  %v1188_v22 = vpop.permute.xlu1 %1187 }
 0x44f   : > { %v1200_v55 = vadd.f32 %v1188_v22, %v1176_v62 }
 0x450   : > { %v1214_v32 = vld [vmem:[#allocation3 + $0x1] sm:$0xff] }
 0x451   : > { %v1223_v1 = vld [vmem:[#allocation3 + $0x2] sm:$0xff]  ;;  %1207 = vst.msk [vmem:[#allocation3 + $0x38] sm:$0xf] %vm1202_vm11, %v1200_v55  ;;  %v1217_v11 = vmul.f32 0.023647603, %v1214_v32  ;;  %v1209_v3 = vld [vmem:[#allocation3 + $0x18] sm:$0xff] }
 0x452   : > { %v1232_v12 = vld [vmem:[#allocation3 + $0x3] sm:$0xff]  ;;  %v1226_v43 = vmul.f32 0.030364122, %v1223_v1  ;;  %v1212_v10 = vmul.f32 0.011170336, %v1209_v3 }
 0x453   : > { %v1241_v34 = vld [vmem:[#allocation3 + $0x4] sm:$0xff]  ;;  %v1220_v48 = vadd.f32 %v1217_v11, %v1211_v41  ;;  %v1235_v49 = vmul.f32 0.023647603, %v1232_v12 }
 0x454   : > { %1278 = vst.msk [vmem:[#allocation3] sm:$0xff] %vm1277_vm12, %v1274_v23  ;;  %v1215_v46 = vld [vmem:[#allocation3 + $0x19] sm:$0xff]  ;;  %v1244_v5 = vmul.f32 0.011170336, %v1241_v34 }
 0x455   : > { %v1224_v45 = vld [vmem:[#allocation3 + $0x1a] sm:$0xff]  ;;  %v1229_v4 = vadd.f32 %v1226_v43, %v1220_v48  ;;  %v1218_v50 = vmul.f32 0.023647603, %v1215_v46  ;;  %v1210_v16 = vld [vmem:[#allocation3 + $0x30] sm:$0xff] }
 0x456   : > { %v1233_v2 = vld [vmem:[#allocation3 + $0x1b] sm:$0xff]  ;;  %v1227_v47 = vmul.f32 0.030364122, %v1224_v45  ;;  %v1213_v39 = vmul.f32 0.011170336, %v1210_v16 }
 0x457   : > { %v1242_v36 = vld [vmem:[#allocation3 + $0x1c] sm:$0xff]  ;;  %v1238_v33 = vadd.f32 %v1235_v49, %v1229_v4  ;;  %v1221_v13 = vadd.f32 %v1218_v50, %v1212_v10  ;;  %v1236_v52 = vmul.f32 0.023647603, %v1233_v2 }
 0x458   : > { %1279 = vst.msk [vmem:[#allocation3 + $0x18] sm:$0xff] %vm1277_vm12, %v1275_v20  ;;  %v1216_v29 = vld [vmem:[#allocation3 + $0x31] sm:$0xff]  ;;  %v1245_v31 = vmul.f32 0.011170336, %v1242_v36 }
 0x459   : > { %v1225_v40 = vld [vmem:[#allocation3 + $0x32] sm:$0xff]  ;;  %v1247_v57 = vadd.f32 %v1244_v5, %v1238_v33  ;;  %v1230_v17 = vadd.f32 %v1227_v47, %v1221_v13  ;;  %v1219_v26 = vmul.f32 0.023647603, %v1216_v29 }
 0x45a   : > { %v1234_v35 = vld [vmem:[#allocation3 + $0x33] sm:$0xff]  ;;  %v1228_v53 = vmul.f32 0.030364122, %v1225_v40 }
 0x45b   : > { %v1281_v56 = vld [vmem:[#allocation3] sm:$0xff]  ;;  %v1243_v27 = vld [vmem:[#allocation3 + $0x34] sm:$0xff]  ;;  %v1239_v42 = vadd.f32 %v1236_v52, %v1230_v17  ;;  %v1222_v58 = vadd.f32 %v1219_v26, %v1213_v39  ;;  %v1237_v8 = vmul.f32 0.023647603, %v1234_v35 }
 0x45c   : > { %v1290_v21 = vmul.f32 0.023647603, %v1281_v56  ;;  %1280 = vst.msk [vmem:[#allocation3 + $0x30] sm:$0xff] %vm1277_vm12, %v1276_v25  ;;  %v1284_v15 = vmul.f32 0.011170336, %v1281_v56 }
 0x45d   : > { %v1248_v18 = vadd.f32 %v1245_v31, %v1239_v42  ;;  %v1231_v63 = vadd.f32 %v1228_v53, %v1222_v58  ;;  %v1246_v62 = vmul.f32 0.011170336, %v1243_v27  ;;  %v1308_v55 = vmul.f32 0.030364122, %v1281_v56 }
 0x45e   : > { %1296 = vrot.lane.b32.xlu0 %v1290_v21, %s2950_s11  ;;  %v1287_v38 = vadd.f32 %v1284_v15, %v1247_v57 }
 0x45f   : > { %v1282_v61 = vld [vmem:[#allocation3 + $0x18] sm:$0xff]  ;;  %v1240_v60 = vadd.f32 %v1237_v8, %v1231_v63 }
 0x460   : > { %v1291_v7 = vmul.f32 0.023647603, %v1282_v61  ;;  %v1285_v28 = vmul.f32 0.011170336, %v1282_v61  ;;  %v1309_v32 = vmul.f32 0.030364122, %v1282_v61 }
 0x461   : > { %v1249_v24 = vadd.f32 %v1246_v62, %v1240_v60 }
 0x462   : > { %1298 = vrot.lane.b32.xlu1 %v1291_v7, %s2950_s11  ;;  %v1288_v44 = vadd.f32 %v1285_v28, %v1248_v18 }
 0x463   : > { %v1283_v22 = vld [vmem:[#allocation3 + $0x30] sm:$0xff] }
 0x464   : > { %v1292_v23 = vmul.f32 0.023647603, %v1283_v22  ;;  %v1286_v30 = vmul.f32 0.011170336, %v1283_v22  ;;  %v1310_v9 = vmul.f32 0.030364122, %v1283_v22 }
 0x466   : > { %1314 = vrot.lane.b32.xlu1 %v1308_v55, %s2951_s12  ;;  %1300 = vrot.lane.b32.xlu0 %v1292_v23, %s2950_s11  ;;  %v1289_v54 = vadd.f32 %v1286_v30, %v1249_v24 }
 0x46a   : > { %1318 = vrot.lane.b32.xlu1 %v1310_v9, %s2951_s12  ;;  %1316 = vrot.lane.b32.xlu0 %v1309_v32, %s2951_s12 }
 0x46e   : > { %1328 = vrot.lane.b32.xlu1 %v1291_v7, %s2952_s14  ;;  %1326 = vrot.lane.b32.xlu0 %v1290_v21, %s2952_s14 }
 0x472   : > { %1341 = vrot.lane.b32.xlu1 %v1284_v15, %s2953_s15  ;;  %1330 = vrot.lane.b32.xlu0 %v1292_v23, %s2952_s14 }
 0x476   : > { %1343 = vrot.lane.b32.xlu0 %v1285_v28, %s2953_s15  ;;  %1345 = vrot.lane.b32.xlu1 %v1286_v30, %s2953_s15 }
 0x4d0   : > { %v1297_v1 = vpop.permute.xlu0 %1296 }
 0x4d1   : > { %v1305_v14 = vadd.f32 %v1297_v1, %v1287_v38 }
 0x4d4   : > { %v1299_v12 = vpop.permute.xlu1 %1298 }
 0x4d5   : > { %v1306_v19 = vadd.f32 %v1299_v12, %v1288_v44 }
 0x4d8   : > { %v1315_v34 = vpop.permute.xlu1 %1314  ;;  %v1301_v41 = vpop.permute.xlu0 %1300 }
 0x4d9   : > { %v1323_v20 = vadd.f32 %v1315_v34, %v1305_v14  ;;  %v1307_v46 = vadd.f32 %v1301_v41, %v1289_v54 }
 0x4dc   : > { %v1319_v11 = vpop.permute.xlu1 %1318  ;;  %v1317_v3 = vpop.permute.xlu0 %1316 }
 0x4dd   : > { %v1325_v36 = vadd.f32 %v1319_v11, %v1307_v46  ;;  %v1324_v4 = vadd.f32 %v1317_v3, %v1306_v19 }
 0x4e0   : > { %v1329_v48 = vpop.permute.xlu1 %1328  ;;  %v1327_v43 = vpop.permute.xlu0 %1326 }
 0x4e1   : > { %v1335_v45 = vadd.f32 %v1327_v43, %v1323_v20  ;;  %v1336_v10 = vadd.f32 %v1329_v48, %v1324_v4 }
 0x4e4   : > { %v1342_v49 = vpop.permute.xlu1 %1341  ;;  %v1331_v2 = vpop.permute.xlu0 %1330 }
 0x4e5   : > { %v1350_v50 = vadd.f32 %v1342_v49, %v1335_v45  ;;  %v1337_v6 = vadd.f32 %v1331_v2, %v1325_v36 }
 0x4e7   : > { %v1353_v16 = vsub.f32 %v3395_v51, %v1350_v50  ;;  %1359 = vst.msk [vmem:[#allocation2] sm:$0xff] %vm943_vm7, %v1350_v50 }
 0x4e8   : > { %v1346_v33 = vpop.permute.xlu1 %1345  ;;  %v1344_v5 = vpop.permute.xlu0 %1343 }
 0x4e9   : > { %1356 = vst.msk [vmem:[%s3484_s8] sm:$0xff] %vm943_vm7, %v1353_v16  ;;  %v1352_v47 = vadd.f32 %v1346_v33, %v1337_v6  ;;  %v1351_v13 = vadd.f32 %v1344_v5, %v1336_v10 }
 0x4eb   : > { %v1355_v25 = vsub.f32 %v3409_v37, %v1352_v47  ;;  %1361 = vst.msk [vmem:[#allocation2 + $0x30] sm:$0xff] %vm943_vm7, %v1352_v47  ;;  %v1354_v51 = vsub.f32 %v3405_v59, %v1351_v13  ;;  %1360 = vst.msk [vmem:[#allocation2 + $0x18] sm:$0xff] %vm943_vm7, %v1351_v13 }
 0x4ed   : > { %1358 = vst.msk [vmem:[%s3484_s8 + $0x10] sm:$0xff] %vm943_vm7, %v1355_v25  ;;  %1357 = vst.msk [vmem:[%s3484_s8 + $0x8] sm:$0xff] %vm943_vm7, %v1354_v51  ;;  %vm2122_vm7 = vcmask 13312  }
 0x4ee   : > { %v1362_v29 = vld [vmem:[#allocation2] ss:$2 sm:$0xf]  ;;  %v1365_v40 = vld [vmem:[#allocation2 + $0x1] ss:$2 sm:$0xf] }
 0x4ef   : > { %v1368_v35 = vadd.f32 %v1365_v40, %v1362_v29  ;;  %1587 = vst.msk [vmem:[#allocation2 + $0x2] sm:$0xf] %vm1586_vm13, %v2948_v0 }
 0x4f0   : > { %1591 = vst.msk [vmem:[#allocation2 + $0x2] sm:$0xf] %vm1590_vm14, %v2948_v0 }
 0x4f1   : > { %1371 = vxpose.xlu0.b32.start.end [1/1] (short) (narrow) %v1368_v35, 8  ;;  %1580 = vst.msk [vmem:[#allocation2] sm:$0x3] %vm1579_vm0, %v2948_v0  ;;  %1583 = vst.msk [vmem:[#allocation2 + $0x6] sm:$0x3] %vm1579_vm0, %v2948_v0 }
 0x4f2   : > { %v1364_v37 = vld [vmem:[#allocation2 + $0x30] ss:$2 sm:$0xf]  ;;  %v1367_v59 = vld [vmem:[#allocation2 + $0x31] ss:$2 sm:$0xf] }
 0x4f3   : > { %v1370_v52 = vadd.f32 %v1367_v59, %v1364_v37  ;;  %1589 = vst.msk [vmem:[#allocation2 + $0x32] sm:$0xf] %vm1586_vm13, %v2948_v0  ;;  %v1363_v56 = vld [vmem:[#allocation2 + $0x18] ss:$2 sm:$0xf] }
 0x4f4   : > { %v1366_v27 = vld [vmem:[#allocation2 + $0x19] ss:$2 sm:$0xf]  ;;  %1593 = vst.msk [vmem:[#allocation2 + $0x32] sm:$0xf] %vm1590_vm14, %v2948_v0 }
 0x4f5   : > { %v1369_v57 = vadd.f32 %v1366_v27, %v1363_v56  ;;  %1588 = vst.msk [vmem:[#allocation2 + $0x1a] sm:$0xf] %vm1586_vm13, %v2948_v0  ;;  %1435 = vxpose.xlu0.b32.start.end [1/1] (short) (narrow) %v1370_v52, 8 }
 0x4f6   : > { %1592 = vst.msk [vmem:[#allocation2 + $0x1a] sm:$0xf] %vm1590_vm14, %v2948_v0 }
 0x4f7   : > { %1403 = vxpose.xlu1.b32.start.end [1/1] (short) (narrow) %v1369_v57, 8  ;;  %1581 = vst.msk [vmem:[#allocation2 + $0x18] sm:$0x3] %vm1579_vm0, %v2948_v0  ;;  %1582 = vst.msk [vmem:[#allocation2 + $0x30] sm:$0x3] %vm1579_vm0, %v2948_v0 }
 0x4f8   : > { %1584 = vst.msk [vmem:[#allocation2 + $0x1e] sm:$0x3] %vm1579_vm0, %v2948_v0  ;;  %1585 = vst.msk [vmem:[#allocation2 + $0x36] sm:$0x3] %vm1579_vm0, %v2948_v0 }
 0x56d   : > { %v1387_v17 = vpop.trf.xlu0 }
 0x56e   : > { %1468 = vst.msk [vmem:[#allocation4] sm:$0xff] %vm1467_vm15, %v1387_v17 }
 0x571   : > { %v1451_v39 = vpop.trf.xlu0 }
 0x572   : > { %1470 = vst.msk [vmem:[#allocation4 + $0x20] sm:$0xff] %vm1467_vm15, %v1451_v39 }
 0x573   : > { %v1419_v26 = vpop.trf.xlu1 }
 0x574   : > { %1469 = vst.msk [vmem:[#allocation4 + $0x10] sm:$0xff] %vm1467_vm15, %v1419_v26 }
 0x575   : > { %v1471_v21 = vld [vmem:[#allocation4] ss:$2 sm:$0xf]  ;;  %v1474_v15 = vld [vmem:[#allocation4 + $0x1] ss:$2 sm:$0xf] }
 0x576   : > { %v1477_v31 = vadd.f32 %v1474_v15, %v1471_v21 }
 0x578   : > { %1480 = vxpose.xlu0.b32.start.end [1/1] (short) (narrow) %v1477_v31, 8 }
 0x579   : > { %v1473_v42 = vld [vmem:[#allocation4 + $0x20] ss:$2 sm:$0xf]  ;;  %v1476_v58 = vld [vmem:[#allocation4 + $0x21] ss:$2 sm:$0xf] }
 0x57a   : > { %v1479_v18 = vadd.f32 %v1476_v58, %v1473_v42 }
 0x57b   : > { %v1472_v53 = vld [vmem:[#allocation4 + $0x10] ss:$2 sm:$0xf]  ;;  %v1475_v38 = vld [vmem:[#allocation4 + $0x11] ss:$2 sm:$0xf] }
 0x57c   : > { %v1478_v61 = vadd.f32 %v1475_v38, %v1472_v53 }
 0x57e   : > { %1512 = vxpose.xlu0.b32.start.end [1/1] (short) (narrow) %v1478_v61, 8 }
 0x582   : > { %1544 = vxpose.xlu0.b32.start.end [1/1] (short) (narrow) %v1479_v18, 8 }
 0x5f4   : > { %v1496_v63 = vpop.trf.xlu0 }
 0x5f5   : > { %v3511_v8 = vmul.f32 0.25, %v1496_v63 }
 0x5f7   : > { %1597 = vrot.lane.b32.xlu1 %v3511_v8, %s2949_s28 }
 0x5fa   : > { %v1528_v7 = vpop.trf.xlu0 }
 0x5fb   : > { %v3521_v28 = vmul.f32 0.25, %v1528_v7 }
 0x5fd   : > { %1599 = vrot.lane.b32.xlu0 %v3521_v28, %s2949_s28 }
 0x5fe   : > { %v1560_v60 = vpop.trf.xlu0 }
 0x5ff   : > { %v3525_v62 = vmul.f32 0.25, %v1560_v60 }
 0x601   : > { %1601 = vrot.lane.b32.xlu1 %v3525_v62, %s2949_s28 }
 0x669   : > { %v1598_v44 = vpop.permute.xlu1 %1597 }
 0x66a   : > { %1607 = vst.msk [vmem:[#allocation2 + $0x2] sm:$0xf] %vm1606_vm1, %v1598_v44 }
 0x66f   : > { %v1600_v22 = vpop.permute.xlu0 %1599 }
 0x670   : > { %1608 = vst.msk [vmem:[#allocation2 + $0x1a] sm:$0xf] %vm1606_vm1, %v1600_v22 }
 0x671   : > { %v1610_v24 = vld [vmem:[#allocation2] sm:$0xff] }
 0x672   : > { %1628 = vrot.lane.b32.xlu0 %v1610_v24, %s2951_s12  ;;  %1616 = vrot.lane.b32.xlu1 %v1610_v24, %s2950_s11  ;;  %v1709_v3 = vld [vmem:[#allocation2] sm:$0xf]  ;;  %v1730_v26 = vld [vmem:[#allocation2 + $0x4] sm:$0xf] }
 0x673   : > { %v1602_v55 = vpop.permute.xlu1 %1601  ;;  %v1712_v14 = vld [vmem:[#allocation2 + $0x1] sm:$0xf] }
 0x674   : > { %1609 = vst.msk [vmem:[#allocation2 + $0x32] sm:$0xf] %vm1606_vm1, %v1602_v55  ;;  %v1715_v20 = vadd.f32 %v1712_v14, %v1709_v3  ;;  %v1718_v4 = vld [vmem:[#allocation2 + $0x2] sm:$0xf] }
 0x675   : > { %v1724_v35 = vld [vmem:[#allocation2 + $0x3] sm:$0xf] }
 0x676   : > { %v1721_v5 = vadd.f32 %v1718_v4, %v1715_v20  ;;  %2041 = vst.msk [vmem:[#allocation2 + $0x4] sm:$0x3] %vm2037_vm5, %v2948_v0 }
 0x677   : > { %v1611_v23 = vld [vmem:[#allocation2 + $0x18] sm:$0xff] }
 0x678   : > { %1618 = vrot.lane.b32.xlu1 %v1611_v23, %s2950_s11  ;;  %v1710_v50 = vld [vmem:[#allocation2 + $0x18] sm:$0xf]  ;;  %v1727_v52 = vadd.f32 %v1724_v35, %v1721_v5 }
 0x679   : > { %v1713_v10 = vld [vmem:[#allocation2 + $0x19] sm:$0xf] }
 0x67a   : > { %v1716_v51 = vadd.f32 %v1713_v10, %v1710_v50  ;;  %v1719_v57 = vld [vmem:[#allocation2 + $0x1a] sm:$0xf]  ;;  %v1733_v15 = vadd.f32 %v1730_v26, %v1727_v52 }
 0x67b   : > { %v1612_v30 = vld [vmem:[#allocation2 + $0x30] sm:$0xff]  ;;  %v1725_v38 = vld [vmem:[#allocation2 + $0x1b] sm:$0xf] }
 0x67c   : > { %1632 = vrot.lane.b32.xlu0 %v1612_v30, %s2951_s12  ;;  %1620 = vrot.lane.b32.xlu1 %v1612_v30, %s2950_s11  ;;  %v1711_v45 = vld [vmem:[#allocation2 + $0x30] sm:$0xf]  ;;  %v1722_v39 = vadd.f32 %v1719_v57, %v1716_v51  ;;  %v1732_v63 = vld [vmem:[#allocation2 + $0x34] sm:$0xf] }
 0x67d   : > { %v1714_v49 = vld [vmem:[#allocation2 + $0x31] sm:$0xf] }
 0x67e   : > { %v1717_v47 = vadd.f32 %v1714_v49, %v1711_v45  ;;  %v1720_v40 = vld [vmem:[#allocation2 + $0x32] sm:$0xf]  ;;  %v1728_v18 = vadd.f32 %v1725_v38, %v1722_v39 }
 0x67f   : > { %v1726_v21 = vld [vmem:[#allocation2 + $0x33] sm:$0xf] }
 0x680   : > { %1642 = vrot.lane.b32.xlu0 %v1611_v23, %s2952_s14  ;;  %1630 = vrot.lane.b32.xlu1 %v1611_v23, %s2951_s12  ;;  %v1723_v56 = vadd.f32 %v1720_v40, %v1717_v47  ;;  %2043 = vst.msk [vmem:[#allocation2 + $0x34] sm:$0x3] %vm2037_vm5, %v2948_v0 }
 0x682   : > { %v1729_v31 = vadd.f32 %v1726_v21, %v1723_v56 }
 0x684   : > { %1652 = vrot.lane.b32.xlu0 %v1610_v24, %s2953_s15  ;;  %1640 = vrot.lane.b32.xlu1 %v1610_v24, %s2952_s14  ;;  %v1735_v7 = vadd.f32 %v1732_v63, %v1729_v31 }
 0x688   : > { %1656 = vrot.lane.b32.xlu0 %v1612_v30, %s2953_s15  ;;  %1644 = vrot.lane.b32.xlu1 %v1612_v30, %s2952_s14 }
 0x68c   : > { %1654 = vrot.lane.b32.xlu1 %v1611_v23, %s2953_s15 }
 0x6e4   : > { %v1617_v54 = vpop.permute.xlu1 %1616  ;;  %v1629_v9 = vpop.permute.xlu0 %1628 }
 0x6e5   : > { %v1625_v34 = vadd.f32 %v1617_v54, %v1610_v24  ;;  %v1731_v24 = vld [vmem:[#allocation2 + $0x1c] sm:$0xf] }
 0x6e6   : > { %2042 = vst.msk [vmem:[#allocation2 + $0x1c] sm:$0x3] %vm2037_vm5, %v2948_v0 }
 0x6e7   : > { %v1637_v48 = vadd.f32 %v1629_v9, %v1625_v34 }
 0x6ea   : > { %v1619_v32 = vpop.permute.xlu1 %1618 }
 0x6eb   : > { %v1626_v2 = vadd.f32 %v1619_v32, %v1611_v23  ;;  %v1734_v23 = vadd.f32 %v1731_v24, %v1728_v18 }
 0x6ee   : > { %v1621_v1 = vpop.permute.xlu1 %1620  ;;  %v1633_v12 = vpop.permute.xlu0 %1632 }
 0x6ef   : > { %v1627_v43 = vadd.f32 %v1621_v1, %v1612_v30 }
 0x6f1   : > { %v1639_v16 = vadd.f32 %v1633_v12, %v1627_v43 }
 0x6f2   : > { %v1631_v41 = vpop.permute.xlu1 %1630  ;;  %v1643_v11 = vpop.permute.xlu0 %1642 }
 0x6f3   : > { %v1638_v6 = vadd.f32 %v1631_v41, %v1626_v2 }
 0x6f5   : > { %v1650_v37 = vadd.f32 %v1643_v11, %v1638_v6 }
 0x6f6   : > { %v1641_v19 = vpop.permute.xlu1 %1640  ;;  %v1653_v46 = vpop.permute.xlu0 %1652 }
 0x6f7   : > { %v1649_v36 = vadd.f32 %v1641_v19, %v1637_v48 }
 0x6f9   : > { %v1661_v33 = vadd.f32 %v1653_v46, %v1649_v36 }
 0x6fa   : > { %v1645_v13 = vpop.permute.xlu1 %1644  ;;  %v1657_v29 = vpop.permute.xlu0 %1656 }
 0x6fb   : > { %1664 = vst.msk [vmem:[#allocation3] sm:$0xff] %vm1467_vm15, %v1661_v33  ;;  %v1651_v25 = vadd.f32 %v1645_v13, %v1639_v16 }
 0x6fd   : > { %v1663_v59 = vadd.f32 %v1657_v29, %v1651_v25 }
 0x6fe   : > { %v1655_v27 = vpop.permute.xlu1 %1654 }
 0x6ff   : > { %1666 = vst.msk [vmem:[#allocation3 + $0x30] sm:$0xff] %vm1467_vm15, %v1663_v59  ;;  %v1662_v17 = vadd.f32 %v1655_v27, %v1650_v37 }
 0x701   : > { %1665 = vst.msk [vmem:[#allocation3 + $0x18] sm:$0xff] %vm1467_vm15, %v1662_v17 }
 0x702   : > { %v1667_v42 = vld [vmem:[#allocation3] sm:$0xf]  ;;  %v1700_v59 = vld [vmem:[#allocation3 + $0x4] sm:$0xf] }
 0x703   : > { %v1673_v58 = vld [vmem:[#allocation3 + $0x1] sm:$0xf]  ;;  %v1670_v36 = vmul.f32 0.011170336, %v1667_v42  ;;  %v1703_v39 = vmul.f32 0.011170336, %v1700_v59 }
 0x704   : > { %v1682_v53 = vld [vmem:[#allocation3 + $0x2] sm:$0xf]  ;;  %v1676_v2 = vmul.f32 0.023647603, %v1673_v58 }
 0x705   : > { %v1691_v61 = vld [vmem:[#allocation3 + $0x3] sm:$0xf]  ;;  %v1685_v33 = vmul.f32 0.030364122, %v1682_v53 }
 0x706   : > { %1736 = vst.msk [vmem:[#allocation3] sm:$0xf] %vm1202_vm11, %v1733_v15  ;;  %v1669_v60 = vld [vmem:[#allocation3 + $0x30] sm:$0xf]  ;;  %v1679_v50 = vadd.f32 %v1676_v2, %v1670_v36  ;;  %v1694_v40 = vmul.f32 0.023647603, %v1691_v61 }
 0x707   : > { %v1675_v44 = vld [vmem:[#allocation3 + $0x31] sm:$0xf]  ;;  %v1672_v16 = vmul.f32 0.011170336, %v1669_v60 }
 0x708   : > { %v1684_v22 = vld [vmem:[#allocation3 + $0x32] sm:$0xf]  ;;  %v1668_v30 = vld [vmem:[#allocation3 + $0x18] sm:$0xf]  ;;  %v1678_v10 = vmul.f32 0.023647603, %v1675_v44  ;;  %v1688_v13 = vadd.f32 %v1685_v33, %v1679_v50 }
 0x709   : > { %v1693_v55 = vld [vmem:[#allocation3 + $0x33] sm:$0xf]  ;;  %v1674_v54 = vld [vmem:[#allocation3 + $0x19] sm:$0xf]  ;;  %v1671_v45 = vmul.f32 0.011170336, %v1668_v30 }
 0x70a   : > { %1738 = vst.msk [vmem:[#allocation3 + $0x30] sm:$0xf] %vm1202_vm11, %v1735_v7  ;;  %v1683_v9 = vld [vmem:[#allocation3 + $0x1a] sm:$0xf]  ;;  %v1677_v49 = vmul.f32 0.023647603, %v1674_v54  ;;  %v1681_v25 = vadd.f32 %v1678_v10, %v1672_v16  ;;  %v1697_v56 = vadd.f32 %v1694_v40, %v1688_v13 }
 0x70b   : > { %v1692_v32 = vld [vmem:[#allocation3 + $0x1b] sm:$0xf]  ;;  %v1686_v6 = vmul.f32 0.030364122, %v1683_v9  ;;  %v1687_v35 = vmul.f32 0.030364122, %v1684_v22 }
 0x70c   : > { %1737 = vst.msk [vmem:[#allocation3 + $0x18] sm:$0xf] %vm1202_vm11, %v1734_v23  ;;  %v1680_v4 = vadd.f32 %v1677_v49, %v1671_v45  ;;  %v1695_v51 = vmul.f32 0.023647603, %v1692_v32  ;;  %v1701_v29 = vld [vmem:[#allocation3 + $0x1c] sm:$0xf]  ;;  %v1706_v42 = vadd.f32 %v1703_v39, %v1697_v56 }
 0x70d   : > { %v1739_v1 = vld [vmem:[#allocation3] sm:$0xf]  ;;  %v1690_v27 = vadd.f32 %v1687_v35, %v1681_v25  ;;  %v1704_v57 = vmul.f32 0.011170336, %v1701_v29  ;;  %v1696_v26 = vmul.f32 0.023647603, %v1693_v55 }
 0x70e   : > { %v1748_v12 = vmul.f32 0.023647603, %v1739_v1  ;;  %v1766_v48 = vmul.f32 0.030364122, %v1739_v1  ;;  %v1742_v19 = vmul.f32 0.011170336, %v1739_v1  ;;  %v1689_v5 = vadd.f32 %v1686_v6, %v1680_v4 }
 0x70f   : > { %v1702_v15 = vld [vmem:[#allocation3 + $0x34] sm:$0xf]  ;;  %v1699_v58 = vadd.f32 %v1696_v26, %v1690_v27 }
 0x710   : > { %1754 = vrot.lane.b32.xlu1 %v1748_v12, %s2950_s11  ;;  %v1698_v37 = vadd.f32 %v1695_v51, %v1689_v5  ;;  %v1705_v38 = vmul.f32 0.011170336, %v1702_v15  ;;  %v1745_v63 = vadd.f32 %v1742_v19, %v1706_v42 }
 0x711   : > { %v1741_v34 = vld [vmem:[#allocation3 + $0x30] sm:$0xf] }
 0x712   : > { %v1750_v41 = vmul.f32 0.023647603, %v1741_v34  ;;  %v1768_v43 = vmul.f32 0.030364122, %v1741_v34  ;;  %v1744_v46 = vmul.f32 0.011170336, %v1741_v34  ;;  %v1707_v21 = vadd.f32 %v1704_v57, %v1698_v37 }
 0x713   : > { %v1740_v11 = vld [vmem:[#allocation3 + $0x18] sm:$0xf]  ;;  %v1708_v7 = vadd.f32 %v1705_v38, %v1699_v58 }
 0x714   : > { %1758 = vrot.lane.b32.xlu1 %v1750_v41, %s2950_s11  ;;  %v1749_v3 = vmul.f32 0.023647603, %v1740_v11  ;;  %v1767_v14 = vmul.f32 0.030364122, %v1740_v11  ;;  %v1743_v20 = vmul.f32 0.011170336, %v1740_v11 }
 0x715   : > { %v1747_v55 = vadd.f32 %v1744_v46, %v1708_v7 }
 0x716   : > { %1756 = vrot.lane.b32.xlu0 %v1749_v3, %s2950_s11  ;;  %v1746_v18 = vadd.f32 %v1743_v20, %v1707_v21 }
 0x718   : > { %1774 = vrot.lane.b32.xlu1 %v1767_v14, %s2951_s12 }
 0x71a   : > { %1772 = vrot.lane.b32.xlu0 %v1766_v48, %s2951_s12 }
 0x71c   : > { %1784 = vrot.lane.b32.xlu1 %v1748_v12, %s2952_s14 }
 0x71e   : > { %1776 = vrot.lane.b32.xlu0 %v1768_v43, %s2951_s12 }
 0x720   : > { %1788 = vrot.lane.b32.xlu1 %v1750_v41, %s2952_s14 }
 0x722   : > { %1786 = vrot.lane.b32.xlu0 %v1749_v3, %s2952_s14 }
 0x724   : > { %1801 = vrot.lane.b32.xlu1 %v1743_v20, %s2953_s15 }
 0x726   : > { %1799 = vrot.lane.b32.xlu0 %v1742_v19, %s2953_s15 }
 0x72a   : > { %1803 = vrot.lane.b32.xlu0 %v1744_v46, %s2953_s15 }
 0x782   : > { %v1755_v47 = vpop.permute.xlu1 %1754 }
 0x783   : > { %v1763_v22 = vadd.f32 %v1755_v47, %v1745_v63 }
 0x786   : > { %v1759_v52 = vpop.permute.xlu1 %1758 }
 0x787   : > { %v1765_v9 = vadd.f32 %v1759_v52, %v1747_v55 }
 0x788   : > { %v1757_v17 = vpop.permute.xlu0 %1756 }
 0x789   : > { %v1764_v60 = vadd.f32 %v1757_v17, %v1746_v18 }
 0x78a   : > { %v1775_v31 = vpop.permute.xlu1 %1774 }
 0x78b   : > { %v1782_v23 = vadd.f32 %v1775_v31, %v1764_v60 }
 0x78c   : > { %v1773_v53 = vpop.permute.xlu0 %1772 }
 0x78d   : > { %v1781_v30 = vadd.f32 %v1773_v53, %v1763_v22 }
 0x78e   : > { %v1785_v61 = vpop.permute.xlu1 %1784 }
 0x78f   : > { %v1793_v12 = vadd.f32 %v1785_v61, %v1781_v30 }
 0x790   : > { %v1777_v44 = vpop.permute.xlu0 %1776 }
 0x791   : > { %v1783_v34 = vadd.f32 %v1777_v44, %v1765_v9 }
 0x792   : > { %v1789_v24 = vpop.permute.xlu1 %1788 }
 0x793   : > { %v1795_v48 = vadd.f32 %v1789_v24, %v1783_v34 }
 0x794   : > { %v1787_v54 = vpop.permute.xlu0 %1786 }
 0x795   : > { %v1794_v32 = vadd.f32 %v1787_v54, %v1782_v23 }
 0x796   : > { %v1802_v1 = vpop.permute.xlu1 %1801 }
 0x797   : > { %v1809_v41 = vadd.f32 %v1802_v1, %v1794_v32 }
 0x798   : > { %v1800_v11 = vpop.permute.xlu0 %1799 }
 0x799   : > { %v1812_v3 = vsub.f32 %v3521_v28, %v1809_v41  ;;  %1819 = vst.msk [vmem:[#allocation2 + $0x18] sm:$0xf] %vm1814_vm2, %v1809_v41  ;;  %v1808_v14 = vadd.f32 %v1800_v11, %v1793_v12 }
 0x79b   : > { %1816 = vst.msk [vmem:[%s282_s23 + $0x4] sm:$0xf] %vm1814_vm2, %v1812_v3  ;;  %v1811_v43 = vsub.f32 %v3511_v8, %v1808_v14  ;;  %1818 = vst.msk [vmem:[#allocation2] sm:$0xf] %vm1814_vm2, %v1808_v14 }
 0x79c   : > { %v1804_v20 = vpop.permute.xlu0 %1803 }
 0x79d   : > { %1815 = vst.msk [vmem:[%s282_s23] sm:$0xf] %vm1814_vm2, %v1811_v43  ;;  %v1810_v19 = vadd.f32 %v1804_v20, %v1795_v48 }
 0x79f   : > { %v1813_v46 = vsub.f32 %v3525_v62, %v1810_v19  ;;  %1820 = vst.msk [vmem:[#allocation2 + $0x30] sm:$0xf] %vm1814_vm2, %v1810_v19 }
 0x7a0   : > { %v1822_v28 = vld [vmem:[#allocation2 + $0x18] ss:$2 sm:$0x3]  ;;  %v1825_v45 = vld [vmem:[#allocation2 + $0x19] ss:$2 sm:$0x3] }
 0x7a1   : > { %1817 = vst.msk [vmem:[%s282_s23 + $0x8] sm:$0xf] %vm1814_vm2, %v1813_v46  ;;  %v1828_v49 = vadd.f32 %v1825_v45, %v1822_v28 }
 0x7a2   : > { %2046 = vst.msk [vmem:[#allocation2 + $0x1a] sm:$0x3] %vm2044_vm3, %v2948_v0  ;;  %v1821_v8 = vld [vmem:[#allocation2] ss:$2 sm:$0x3] }
 0x7a3   : > { %2050 = vst.msk [vmem:[#allocation2 + $0x1a] sm:$0x3] %vm2048_vm4, %v2948_v0  ;;  %v1824_v2 = vld [vmem:[#allocation2 + $0x1] ss:$2 sm:$0x3]  ;;  %1862 = vxpose.xlu0.b32.start.end [1/1] (short) (narrow) %v1828_v49, 8 }
 0x7a4   : > { %v1827_v36 = vadd.f32 %v1824_v2, %v1821_v8  ;;  %2045 = vst.msk [vmem:[#allocation2 + $0x2] sm:$0x3] %vm2044_vm3, %v2948_v0 }
 0x7a5   : > { %2049 = vst.msk [vmem:[#allocation2 + $0x2] sm:$0x3] %vm2048_vm4, %v2948_v0 }
 0x7a6   : > { %1830 = vxpose.xlu1.b32.start.end [1/1] (short) (narrow) %v1827_v36, 8  ;;  %v1823_v62 = vld [vmem:[#allocation2 + $0x30] ss:$2 sm:$0x3]  ;;  %2038 = vst.msk [vmem:[#allocation2] sm:$0x3] %vm2037_vm5, %v2948_v0 }
 0x7a7   : > { %v1826_v4 = vld [vmem:[#allocation2 + $0x31] ss:$2 sm:$0x3]  ;;  %2039 = vst.msk [vmem:[#allocation2 + $0x18] sm:$0x3] %vm2037_vm5, %v2948_v0 }
 0x7a8   : > { %v1829_v50 = vadd.f32 %v1826_v4, %v1823_v62  ;;  %2047 = vst.msk [vmem:[#allocation2 + $0x32] sm:$0x3] %vm2044_vm3, %v2948_v0 }
 0x7a9   : > { %2051 = vst.msk [vmem:[#allocation2 + $0x32] sm:$0x3] %vm2048_vm4, %v2948_v0 }
 0x7aa   : > { %1894 = vxpose.xlu0.b32.start.end [1/1] (short) (narrow) %v1829_v50, 8  ;;  %2040 = vst.msk [vmem:[#allocation2 + $0x30] sm:$0x3] %vm2037_vm5, %v2948_v0 }
 0x7ad   : > { %v2168_v61 = vld [vmem:[#allocation2] sm:$0x3] }
 0x7ae   : > { %v2169_v54 = vld [vmem:[#allocation2 + $0x18] sm:$0x3] }
 0x7b1   : > { %v2170_v55 = vld [vmem:[#allocation2 + $0x30] sm:$0x3] }
 0x81f   : > { %v1878_v10 = vpop.trf.xlu0 }
 0x820   : > { %1927 = vst.msk [vmem:[#allocation4 + $0x10] sm:$0xf] %vm1586_vm13, %v1878_v10  ;;  %v2189_v10 = vld [vmem:[#allocation2 + $0x4] sm:$0x3] }
 0x822   : > { %v1846_v16 = vpop.trf.xlu1 }
 0x823   : > { %1926 = vst.msk [vmem:[#allocation4] sm:$0xf] %vm1586_vm13, %v1846_v16 }
 0x826   : > { %v1910_v6 = vpop.trf.xlu0 }
 0x827   : > { %1928 = vst.msk [vmem:[#allocation4 + $0x20] sm:$0xf] %vm1586_vm13, %v1910_v6  ;;  %v1930_v33 = vld [vmem:[#allocation4 + $0x10] ss:$2 sm:$0x3] }
 0x828   : > { %v1933_v5 = vld [vmem:[#allocation4 + $0x11] ss:$2 sm:$0x3] }
 0x829   : > { %v1936_v51 = vadd.f32 %v1933_v5, %v1930_v33 }
 0x82a   : > { %v1929_v47 = vld [vmem:[#allocation4] ss:$2 sm:$0x3]  ;;  %v1932_v13 = vld [vmem:[#allocation4 + $0x1] ss:$2 sm:$0x3] }
 0x82b   : > { %v1935_v25 = vadd.f32 %v1932_v13, %v1929_v47  ;;  %v2191_v13 = vld [vmem:[#allocation2 + $0x34] sm:$0x3] }
 0x82d   : > { %1938 = vxpose.xlu0.b32.start.end [1/1] (short) (narrow) %v1935_v25, 8 }
 0x82e   : > { %v1931_v29 = vld [vmem:[#allocation4 + $0x20] ss:$2 sm:$0x3]  ;;  %v1934_v40 = vld [vmem:[#allocation4 + $0x21] ss:$2 sm:$0x3] }
 0x82f   : > { %v1937_v35 = vadd.f32 %v1934_v40, %v1931_v29 }
 0x831   : > { %1970 = vxpose.xlu0.b32.start.end [1/1] (short) (narrow) %v1936_v51, 8  ;;  %2002 = vxpose.xlu1.b32.start.end [1/1] (short) (narrow) %v1937_v35, 8  ;;  %v2190_v35 = vld [vmem:[#allocation2 + $0x1c] sm:$0x3] }
 0x8a9   : > { %v1954_v37 = vpop.trf.xlu0 }
 0x8aa   : > { %v3599_v59 = vmul.f32 0.25, %v1954_v37 }
 0x8ac   : > { %2055 = vrot.lane.b32.xlu0 %v3599_v59, %s2949_s28 }
 0x8ad   : > { %v1986_v52 = vpop.trf.xlu0  ;;  %v2018_v56 = vpop.trf.xlu1 }
 0x8ae   : > { %v3603_v27 = vmul.f32 0.25, %v1986_v52  ;;  %v3607_v57 = vmul.f32 0.25, %v2018_v56 }
 0x8b0   : > { %2057 = vrot.lane.b32.xlu1 %v3603_v27, %s2949_s28 }
 0x8b4   : > { %2059 = vrot.lane.b32.xlu1 %v3607_v57, %s2949_s28 }
 0x91e   : > { %v2056_v0 = vpop.permute.xlu0 %2055 }
 0x91f   : > { %2065 = vst.msk [vmem:[#allocation2 + $0x2] sm:$0x3] %vm2064_vm6, %v2056_v0 }
 0x922   : > { %v2058_v17 = vpop.permute.xlu1 %2057 }
 0x923   : > { %2066 = vst.msk [vmem:[#allocation2 + $0x1a] sm:$0x3] %vm2064_vm6, %v2058_v17 }
 0x926   : > { %v2060_v39 = vpop.permute.xlu1 %2059  ;;  %v2068_v26 = vld [vmem:[#allocation2] sm:$0x3f] }
 0x927   : > { %2074 = vrot.lane.b32.xlu1 %v2068_v26, %s2950_s11  ;;  %2067 = vst.msk [vmem:[#allocation2 + $0x32] sm:$0x3] %vm2064_vm6, %v2060_v39  ;;  %v2171_v63 = vld [vmem:[#allocation2 + $0x1] sm:$0x3]  ;;  %v2183_v28 = vld [vmem:[#allocation2 + $0x3] sm:$0x3] }
 0x928   : > { %v2174_v60 = vadd.f32 %v2171_v63, %v2168_v61  ;;  %v2177_v30 = vld [vmem:[#allocation2 + $0x2] sm:$0x3] }
 0x92a   : > { %v2069_v21 = vld [vmem:[#allocation2 + $0x18] sm:$0x3f]  ;;  %v2180_v34 = vadd.f32 %v2177_v30, %v2174_v60 }
 0x92b   : > { %2076 = vrot.lane.b32.xlu1 %v2069_v21, %s2950_s11  ;;  %v2172_v9 = vld [vmem:[#allocation2 + $0x19] sm:$0x3]  ;;  %v2184_v5 = vld [vmem:[#allocation2 + $0x1b] sm:$0x3] }
 0x92c   : > { %v2175_v20 = vadd.f32 %v2172_v9, %v2169_v54  ;;  %v2186_v2 = vadd.f32 %v2183_v28, %v2180_v34  ;;  %v2178_v36 = vld [vmem:[#allocation2 + $0x1a] sm:$0x3] }
 0x92e   : > { %v2070_v15 = vld [vmem:[#allocation2 + $0x30] sm:$0x3f]  ;;  %v2181_v16 = vadd.f32 %v2178_v36, %v2175_v20  ;;  %v2192_v33 = vadd.f32 %v2189_v10, %v2186_v2 }
 0x92f   : > { %2078 = vrot.lane.b32.xlu0 %v2070_v15, %s2950_s11  ;;  %2086 = vrot.lane.b32.xlu1 %v2068_v26, %s2951_s12  ;;  %v2173_v23 = vld [vmem:[#allocation2 + $0x31] sm:$0x3]  ;;  %v2185_v6 = vld [vmem:[#allocation2 + $0x33] sm:$0x3] }
 0x930   : > { %v2176_v3 = vadd.f32 %v2173_v23, %v2170_v55  ;;  %v2179_v45 = vld [vmem:[#allocation2 + $0x32] sm:$0x3]  ;;  %v2187_v25 = vadd.f32 %v2184_v5, %v2181_v16 }
 0x932   : > { %v2182_v62 = vadd.f32 %v2179_v45, %v2176_v3 }
 0x933   : > { %2088 = vrot.lane.b32.xlu0 %v2069_v21, %s2951_s12  ;;  %2090 = vrot.lane.b32.xlu1 %v2070_v15, %s2951_s12 }
 0x934   : > { %v2188_v47 = vadd.f32 %v2185_v6, %v2182_v62 }
 0x936   : > { %v2194_v0 = vadd.f32 %v2191_v13, %v2188_v47 }
 0x937   : > { %2098 = vrot.lane.b32.xlu0 %v2068_v26, %s2952_s14  ;;  %2100 = vrot.lane.b32.xlu1 %v2069_v21, %s2952_s14 }
 0x93b   : > { %2102 = vrot.lane.b32.xlu0 %v2070_v15, %s2952_s14  ;;  %2110 = vrot.lane.b32.xlu1 %v2068_v26, %s2953_s15 }
 0x93f   : > { %2112 = vrot.lane.b32.xlu0 %v2069_v21, %s2953_s15  ;;  %2114 = vrot.lane.b32.xlu1 %v2070_v15, %s2953_s15 }
 0x999   : > { %v2075_v31 = vpop.permute.xlu1 %2074 }
 0x99a   : > { %v2083_v7 = vadd.f32 %v2075_v31, %v2068_v26 }
 0x99d   : > { %v2077_v42 = vpop.permute.xlu1 %2076 }
 0x99e   : > { %v2084_v32 = vadd.f32 %v2077_v42, %v2069_v21  ;;  %v2193_v21 = vadd.f32 %v2190_v35, %v2187_v25 }
 0x9a1   : > { %v2087_v58 = vpop.permute.xlu1 %2086  ;;  %v2079_v53 = vpop.permute.xlu0 %2078 }
 0x9a2   : > { %v2095_v24 = vadd.f32 %v2087_v58, %v2083_v7  ;;  %v2085_v1 = vadd.f32 %v2079_v53, %v2070_v15 }
 0x9a5   : > { %v2091_v38 = vpop.permute.xlu1 %2090  ;;  %v2089_v18 = vpop.permute.xlu0 %2088 }
 0x9a6   : > { %v2097_v14 = vadd.f32 %v2091_v38, %v2085_v1  ;;  %v2096_v48 = vadd.f32 %v2089_v18, %v2084_v32 }
 0x9a9   : > { %v2101_v44 = vpop.permute.xlu1 %2100  ;;  %v2099_v22 = vpop.permute.xlu0 %2098 }
 0x9aa   : > { %v2107_v12 = vadd.f32 %v2099_v22, %v2095_v24  ;;  %v2108_v19 = vadd.f32 %v2101_v44, %v2096_v48 }
 0x9ad   : > { %v2111_v41 = vpop.permute.xlu1 %2110  ;;  %v2103_v11 = vpop.permute.xlu0 %2102 }
 0x9ae   : > { %v2119_v43 = vadd.f32 %v2111_v41, %v2107_v12  ;;  %v2109_v46 = vadd.f32 %v2103_v11, %v2097_v14 }
 0x9b0   : > { %2123 = vst.msk [vmem:[#allocation3] sm:$0x3f] %vm2122_vm7, %v2119_v43 }
 0x9b1   : > { %v2115_v49 = vpop.permute.xlu1 %2114  ;;  %v2113_v8 = vpop.permute.xlu0 %2112 }
 0x9b2   : > { %v2121_v4 = vadd.f32 %v2115_v49, %v2109_v46  ;;  %v2120_v50 = vadd.f32 %v2113_v8, %v2108_v19 }
 0x9b4   : > { %2124 = vst.msk [vmem:[#allocation3 + $0x18] sm:$0x3f] %vm2122_vm7, %v2120_v50  ;;  %2125 = vst.msk [vmem:[#allocation3 + $0x30] sm:$0x3f] %vm2122_vm7, %v2121_v4 }
 0x9b7   : > { %v2126_v51 = vld [vmem:[#allocation3] sm:$0x3]  ;;  %v2141_v40 = vld [vmem:[#allocation3 + $0x2] sm:$0x3]  ;;  %v2159_v26 = vld [vmem:[#allocation3 + $0x4] sm:$0x3] }
 0x9b8   : > { %v2132_v29 = vld [vmem:[#allocation3 + $0x1] sm:$0x3]  ;;  %v2129_v37 = vmul.f32 0.011170336, %v2126_v51  ;;  %v2150_v56 = vld [vmem:[#allocation3 + $0x3] sm:$0x3] }
 0x9b9   : > { %2195 = vst.msk [vmem:[#allocation3] sm:$0x3] %vm2037_vm5, %v2192_v33  ;;  %v2135_v52 = vmul.f32 0.023647603, %v2132_v29  ;;  %v2144_v39 = vmul.f32 0.030364122, %v2141_v40 }
 0x9ba   : > { %v2153_v38 = vmul.f32 0.023647603, %v2150_v56  ;;  %v2162_v18 = vmul.f32 0.011170336, %v2159_v26 }
 0x9bb   : > { %v2138_v17 = vadd.f32 %v2135_v52, %v2129_v37  ;;  %v2128_v15 = vld [vmem:[#allocation3 + $0x30] sm:$0x3]  ;;  %v2127_v42 = vld [vmem:[#allocation3 + $0x18] sm:$0x3]  ;;  %v2142_v7 = vld [vmem:[#allocation3 + $0x1a] sm:$0x3] }
 0x9bc   : > { %v2134_v31 = vld [vmem:[#allocation3 + $0x31] sm:$0x3]  ;;  %v2133_v58 = vld [vmem:[#allocation3 + $0x19] sm:$0x3]  ;;  %v2130_v60 = vmul.f32 0.011170336, %v2127_v42 }
 0x9bd   : > { %2197 = vst.msk [vmem:[#allocation3 + $0x30] sm:$0x3] %vm2037_vm5, %v2194_v0  ;;  %v2147_v53 = vadd.f32 %v2144_v39, %v2138_v17  ;;  %2196 = vst.msk [vmem:[#allocation3 + $0x18] sm:$0x3] %vm2037_vm5, %v2193_v21  ;;  %v2136_v61 = vmul.f32 0.023647603, %v2133_v58 }
 0x9be   : > { %v2131_v44 = vmul.f32 0.011170336, %v2128_v15  ;;  %v2137_v24 = vmul.f32 0.023647603, %v2134_v31  ;;  %v2151_v54 = vld [vmem:[#allocation3 + $0x1b] sm:$0x3] }
 0x9bf   : > { %v2156_v63 = vadd.f32 %v2153_v38, %v2147_v53  ;;  %v2145_v9 = vmul.f32 0.030364122, %v2142_v7  ;;  %v2139_v32 = vadd.f32 %v2136_v61, %v2130_v60  ;;  %v2143_v12 = vld [vmem:[#allocation3 + $0x32] sm:$0x3]  ;;  %v2160_v11 = vld [vmem:[#allocation3 + $0x1c] sm:$0x3] }
 0x9c0   : > { %v2198_v22 = vld [vmem:[#allocation3] sm:$0x3]  ;;  %v2140_v1 = vadd.f32 %v2137_v24, %v2131_v44  ;;  %v2152_v34 = vld [vmem:[#allocation3 + $0x33] sm:$0x3]  ;;  %v2146_v3 = vmul.f32 0.030364122, %v2143_v12 }
 0x9c1   : > { %v2207_v55 = vmul.f32 0.023647603, %v2198_v22  ;;  %v2201_v23 = vmul.f32 0.011170336, %v2198_v22  ;;  %v2165_v30 = vadd.f32 %v2162_v18, %v2156_v63  ;;  %v2154_v48 = vmul.f32 0.023647603, %v2151_v54 }
 0x9c2   : > { %v2148_v43 = vadd.f32 %v2145_v9, %v2139_v32  ;;  %v2161_v20 = vld [vmem:[#allocation3 + $0x34] sm:$0x3]  ;;  %v2149_v28 = vadd.f32 %v2146_v3, %v2140_v1  ;;  %v2155_v45 = vmul.f32 0.023647603, %v2152_v34  ;;  %v2163_v2 = vmul.f32 0.011170336, %v2160_v11 }
 0x9c3   : > { %2213 = vrot.lane.b32.xlu0 %v2207_v55, %s2950_s11  ;;  %v2204_v41 = vadd.f32 %v2201_v23, %v2165_v30  ;;  %v2164_v50 = vmul.f32 0.011170336, %v2161_v20  ;;  %v2225_v33 = vmul.f32 0.030364122, %v2198_v22 }
 0x9c4   : > { %v2200_v14 = vld [vmem:[#allocation3 + $0x30] sm:$0x3]  ;;  %v2199_v46 = vld [vmem:[#allocation3 + $0x18] sm:$0x3]  ;;  %v2157_v36 = vadd.f32 %v2154_v48, %v2148_v43  ;;  %v2158_v4 = vadd.f32 %v2155_v45, %v2149_v28 }
 0x9c5   : > { %v2209_v19 = vmul.f32 0.023647603, %v2200_v14  ;;  %v2208_v49 = vmul.f32 0.023647603, %v2199_v46  ;;  %v2202_v8 = vmul.f32 0.011170336, %v2199_v46 }
 0x9c6   : > { %v2203_v62 = vmul.f32 0.011170336, %v2200_v14  ;;  %v2166_v10 = vadd.f32 %v2163_v2, %v2157_v36  ;;  %v2226_v16 = vmul.f32 0.030364122, %v2199_v46  ;;  %v2167_v6 = vadd.f32 %v2164_v50, %v2158_v4 }
 0x9c7   : > { %2217 = vrot.lane.b32.xlu0 %v2209_v19, %s2950_s11  ;;  %2215 = vrot.lane.b32.xlu1 %v2208_v49, %s2950_s11  ;;  %v2227_v13 = vmul.f32 0.030364122, %v2200_v14  ;;  %s288_s11 = scalar_lea.vmem %s3748_s4, %s2744_s25 }
 0x9c8   : > { %v2205_v5 = vadd.f32 %v2202_v8, %v2166_v10  ;;  %v2206_v47 = vadd.f32 %v2203_v62, %v2167_v6 }
 0x9cb   : > { %2233 = vrot.lane.b32.xlu0 %v2226_v16, %s2951_s12  ;;  %2231 = vrot.lane.b32.xlu1 %v2225_v33, %s2951_s12 }
 0x9cf   : > { %2243 = vrot.lane.b32.xlu0 %v2207_v55, %s2952_s14  ;;  %2235 = vrot.lane.b32.xlu1 %v2227_v13, %s2951_s12  ;;  %s2550_s12 = sshll.u32 %s3484_s8, 4  ;;  %s2954_s8 = smov [#allocation8]   ;;  %s3664_s12 = int_to_ptr.vmem [resolvable:$true] %s2550_s12 }
 0x9d3   : > { %2247 = vrot.lane.b32.xlu0 %v2209_v19, %s2952_s14  ;;  %2245 = vrot.lane.b32.xlu1 %v2208_v49, %s2952_s14  ;;  %s2756_s14 = smul.u32 768, %s3009_s22 }
 0x9d5   : > { %s3660_s13 = scalar_lea.hbm %s3745_s1, %s2756_s14 }
 0x9d7   : > { %2260 = vrot.lane.b32.xlu0 %v2202_v8, %s2953_s15  ;;  %2258 = vrot.lane.b32.xlu1 %v2201_v23, %s2953_s15 }
 0x9db   : > { %2262 = vrot.lane.b32.xlu1 %v2203_v62, %s2953_s15  ;;  %s2534_s15 = sshll.u32 %s3358_s7, 4  ;;  %s2853_s7 = sshll.u32 %s2954_s8, 4  ;;  %s3662_s15 = int_to_ptr.vmem [resolvable:$true] %s2534_s15  ;;  %s2854_s7 = int_to_ptr.vmem [resolvable:$false] %s2853_s7 }
 0x9dc   : > { %s2849_s23 = scalar_lea.vmem %s3662_s15, 768  ;;  %s2855_s25 = scalar_lea.vmem %s2854_s7, 1536 }
 0x9dd   : > { %p2850_p12 = scmp.ne.s32.totalorder %s3662_s15, %s2849_s23  ;;  %p2856_p7 = scmp.lt.s32.totalorder %s3662_s15, %s2854_s7 }
 0x9de   : > { %p2857_p8 = scmp.lt.s32.totalorder %s2855_s25, %s2849_s23 }
 0x9df   : > { %p2851_p4 = pnand %p2850_p12, %p3759_p13 }
 0x9e0   : > { %p2858_p10 = por %p2857_p8, %p2856_p7 }
 0x9e1   : > { %p2852_p5 = pneg %p2851_p4 }
 0x9e3   : > { %p2859_p0 = pnand %p2858_p10, %p2852_p5 }
 0xa35   : > { %v2214_v25 = vpop.permute.xlu0 %2213 }
 0xa36   : > { %v2222_v0 = vadd.f32 %v2214_v25, %v2204_v41 }
 0xa39   : > { %v2218_v51 = vpop.permute.xlu0 %2217  ;;  %v2216_v29 = vpop.permute.xlu1 %2215 }
 0xa3a   : > { %v2223_v56 = vadd.f32 %v2216_v29, %v2205_v5  ;;  %v2224_v31 = vadd.f32 %v2218_v51, %v2206_v47 }
 0xa3d   : > { %v2234_v40 = vpop.permute.xlu0 %2233  ;;  %v2232_v35 = vpop.permute.xlu1 %2231 }
 0xa3e   : > { %v2241_v39 = vadd.f32 %v2234_v40, %v2223_v56  ;;  %v2240_v21 = vadd.f32 %v2232_v35, %v2222_v0 }
 0xa41   : > { %v2244_v37 = vpop.permute.xlu0 %2243  ;;  %v2236_v52 = vpop.permute.xlu1 %2235 }
 0xa42   : > { %v2252_v42 = vadd.f32 %v2244_v37, %v2240_v21  ;;  %v2242_v18 = vadd.f32 %v2236_v52, %v2224_v31 }
 0xa45   : > { %v2248_v17 = vpop.permute.xlu0 %2247  ;;  %v2246_v26 = vpop.permute.xlu1 %2245 }
 0xa46   : > { %v2253_v15 = vadd.f32 %v2246_v26, %v2241_v39  ;;  %v2254_v7 = vadd.f32 %v2248_v17, %v2242_v18 }
 0xa49   : > { %v2261_v58 = vpop.permute.xlu0 %2260  ;;  %v2259_v53 = vpop.permute.xlu1 %2258 }
 0xa4a   : > { %v2268_v38 = vadd.f32 %v2261_v58, %v2253_v15  ;;  %v2267_v61 = vadd.f32 %v2259_v53, %v2252_v42 }
 0xa4c   : > { %v2271_v63 = vsub.f32 %v3603_v27, %v2268_v38  ;;  %2277 = vst.msk [vmem:[#allocation2 + $0x18] sm:$0x3] %vm2044_vm3, %v2268_v38  ;;  %v2270_v60 = vsub.f32 %v3599_v59, %v2267_v61  ;;  %2276 = vst.msk [vmem:[#allocation2] sm:$0x3] %vm2044_vm3, %v2267_v61 }
 0xa4d   : > { %v2263_v44 = vpop.permute.xlu1 %2262 }
 0xa4e   : > { %2274 = vst.msk [vmem:[%s288_s11 + $0x2] sm:$0x3] %vm2044_vm3, %v2271_v63  ;;  %2273 = vst.msk [vmem:[%s288_s11] sm:$0x3] %vm2044_vm3, %v2270_v60  ;;  %v2269_v22 = vadd.f32 %v2263_v44, %v2254_v7 }
 0xa50   : > { %v2272_v24 = vsub.f32 %v3607_v57, %v2269_v22  ;;  %2278 = vst.msk [vmem:[#allocation2 + $0x30] sm:$0x3] %vm2044_vm3, %v2269_v22 }
 0xa52   : > { %2275 = vst.msk [vmem:[%s288_s11 + $0x4] sm:$0x3] %vm2044_vm3, %v2272_v24 }
 0xa53   : > { %v2280_v27 = vld [vmem:[#allocation2 + $0x18] ss:$2 sm:$0x1]  ;;  %v2283_v55 = vld [vmem:[#allocation2 + $0x19] ss:$2 sm:$0x1] }
 0xa54   : > { %v2279_v23 = vld [vmem:[#allocation2] ss:$2 sm:$0x1]  ;;  %v2282_v30 = vld [vmem:[#allocation2 + $0x1] ss:$2 sm:$0x1]  ;;  %v2286_v54 = vadd.f32 %v2283_v55, %v2280_v27 }
 0xa55   : > { %v2285_v59 = vadd.f32 %v2282_v30, %v2279_v23 }
 0xa56   : > { %2320 = vxpose.xlu1.b32.start.end [1/1] (short) (narrow) %v2286_v54, 8 }
 0xa57   : > { %2288 = vxpose.xlu0.b32.start.end [1/1] (short) (narrow) %v2285_v59, 8  ;;  %v2281_v9 = vld [vmem:[#allocation2 + $0x30] ss:$2 sm:$0x1] }
 0xa58   : > { %v2284_v32 = vld [vmem:[#allocation2 + $0x31] ss:$2 sm:$0x1] }
 0xa59   : > { %v2287_v1 = vadd.f32 %v2284_v32, %v2281_v9 }
 0xa5b   : > { %2352 = vxpose.xlu0.b32.start.end [1/1] (short) (narrow) %v2287_v1, 8 }
 0xad2   : > { %v2336_v12 = vpop.trf.xlu1 }
 0xad3   : > { %v2304_v34 = vpop.trf.xlu0  ;;  %2386 = vst.msk [vmem:[#allocation4 + $0x10] sm:$0x3] %vm2384_vm8, %v2336_v12 }
 0xad4   : > { %2385 = vst.msk [vmem:[#allocation4] sm:$0x3] %vm2384_vm8, %v2304_v34 }
 0xad7   : > { %v2368_v57 = vpop.trf.xlu0 }
 0xad8   : > { %2387 = vst.msk [vmem:[#allocation4 + $0x20] sm:$0x3] %vm2384_vm8, %v2368_v57 }
 0xada   : > { %v2389_v41 = vld [vmem:[#allocation4 + $0x10] ss:$2 sm:$0x1]  ;;  %v2392_v11 = vld [vmem:[#allocation4 + $0x11] ss:$2 sm:$0x1] }
 0xadb   : > { %v2388_v3 = vld [vmem:[#allocation4] ss:$2 sm:$0x1]  ;;  %v2391_v14 = vld [vmem:[#allocation4 + $0x1] ss:$2 sm:$0x1]  ;;  %v2395_v43 = vadd.f32 %v2392_v11, %v2389_v41 }
 0xadc   : > { %v2394_v48 = vadd.f32 %v2391_v14, %v2388_v3 }
 0xade   : > { %2397 = vxpose.xlu0.b32.start.end [1/1] (short) (narrow) %v2394_v48, 8 }
 0xadf   : > { %v2390_v20 = vld [vmem:[#allocation4 + $0x20] ss:$2 sm:$0x1]  ;;  %v2393_v19 = vld [vmem:[#allocation4 + $0x21] ss:$2 sm:$0x1] }
 0xae0   : > { %v2396_v46 = vadd.f32 %v2393_v19, %v2390_v20 }
 0xae2   : > { %2429 = vxpose.xlu0.b32.start.end [1/1] (short) (narrow) %v2395_v43, 8 }
 0xae6   : > { %2461 = vxpose.xlu0.b32.start.end [1/1] (short) (narrow) %v2396_v46, 8 }
 0xae7   : > { %2862 = shalt.err (!%p2859_p0)
}
 0xae8   : > { %s2863_s26 = scalar_lea.hbm %s3660_s13, 768  ;;  %s2867_s14 = scalar_lea.hbm %s3745_s1, 1536 }
 0xae9   : > { %p2864_p2 = scmp.ne.s32.totalorder %s3660_s13, %s2863_s26  ;;  %p2868_p3 = scmp.lt.s32.totalorder %s3660_s13, %s3745_s1 }
 0xaea   : > { %p2869_p6 = scmp.lt.s32.totalorder %s2867_s14, %s2863_s26 }
 0xaeb   : > { %p2865_p9 = pnand %p2864_p2, %p3759_p13 }
 0xaec   : > { %p2870_p11 = por %p2869_p6, %p2868_p3 }
 0xaed   : > { %p2866_p1 = pneg %p2865_p9 }
 0xaef   : > { %p2871_p12 = pnand %p2870_p11, %p2866_p1 }
 0xaf1   : > { %2874 = shalt.err (!%p2871_p12)
}
 0xaf2   : > { %s2955_s23 = smov 128   ;;  %s2956_s8 = smov 8  }
 0xaf3   : > { %2762 = dma.vmem_to_hbm [thread:$0]  (%p3759_p13), %s3662_s15, 768, %s3660_s13, %s2501_s16, %s2955_s23, %s2955_s23, %s2956_s8  }
 0xaf4   : > { %s2754_s7 = smul.u32 384, %s3009_s22  ;;  %s2506_s11 = scalar_lea.sflag [#allocation10], %s3079_s17 }
 0xaf5   : > { %s2875_s14 = scalar_lea.vmem %s3664_s12, 384  ;;  %s2957_s6 = smov [#allocation9]  }
 0xaf6   : > { %s3696_s28 = scalar_lea.hbm %s3746_s2, %s2754_s7  ;;  %p2876_p4 = scmp.ne.s32.totalorder %s3664_s12, %s2875_s14 }
 0xaf7   : > { %s2879_s10 = sshll.u32 %s2957_s6, 4  ;;  %s2880_s10 = int_to_ptr.vmem [resolvable:$false] %s2879_s10 }
 0xaf8   : > { %p2877_p5 = pnand %p2876_p4, %p3759_p13  ;;  %s2881_s0 = scalar_lea.vmem %s2880_s10, 768 }
 0xaf9   : > { %p2882_p8 = scmp.lt.s32.totalorder %s3664_s12, %s2880_s10  ;;  %p2883_p10 = scmp.lt.s32.totalorder %s2881_s0, %s2875_s14 }
 0xafa   : > { %p2878_p7 = pneg %p2877_p5 }
 0xafb   : > { %p2884_p0 = por %p2883_p10, %p2882_p8 }
 0xafd   : > { %p2885_p2 = pnand %p2884_p0, %p2878_p7 }
 0xaff   : > { %2888 = shalt.err (!%p2885_p2)
}
 0xb00   : > { %s2889_s22 = scalar_lea.hbm %s3696_s28, 384  ;;  %s2893_s13 = scalar_lea.hbm %s3746_s2, 768 }
 0xb01   : > { %p2890_p9 = scmp.ne.s32.totalorder %s3696_s28, %s2889_s22  ;;  %p2894_p6 = scmp.lt.s32.totalorder %s3696_s28, %s3746_s2 }
 0xb02   : > { %p2895_p11 = scmp.lt.s32.totalorder %s2893_s13, %s2889_s22 }
 0xb03   : > { %p2891_p1 = pnand %p2890_p9, %p3759_p13 }
 0xb04   : > { %p2896_p12 = por %p2895_p11, %p2894_p6 }
 0xb05   : > { %p2892_p3 = pneg %p2891_p1 }
 0xb07   : > { %p2897_p4 = pnand %p2896_p12, %p2892_p3 }
 0xb09   : > { %2900 = shalt.err (!%p2897_p4)
}
 0xb0a   : > { %2763 = dma.vmem_to_hbm [thread:$0]  (%p3759_p13), %s3664_s12, 384, %s3696_s28, %s2506_s11, %s2955_s23, %s2955_s23, %s2956_s8   ;;  %vm2496_vm9 = vcmask 0  }
 0xb0b   : > { %s293_s26 = scalar_lea.vmem %s3749_s5, %s3767_s9 }
 0xb5a   : > { %v2413_v28 = vpop.trf.xlu0 }
 0xb5b   : > { %v2493_v45 = vmul.f32 0.25, %v2413_v28 }
 0xb5d   : > { %2497 = vst.msk [vmem:[%s293_s26] sm:$0x1] %vm2496_vm9, %v2493_v45 }
 0xb5e   : > { %v2445_v49 = vpop.trf.xlu0 }
 0xb5f   : > { %v2494_v8 = vmul.f32 0.25, %v2445_v49 }
 0xb61   : > { %2498 = vst.msk [vmem:[%s293_s26 + $0x1] sm:$0x1] %vm2496_vm9, %v2494_v8 }
 0xb62   : > { %v2477_v2 = vpop.trf.xlu0 }
 0xb63   : > { %v2495_v36 = vmul.f32 0.25, %v2477_v2 }
 0xb65   : > { %2499 = vst.msk [vmem:[%s293_s26 + $0x2] sm:$0x1] %vm2496_vm9, %v2495_v36 }
 0xb66 PF: > { %s2577_s29 = sand.u32 1, %s2931_s18   ;;  %p3760_p13 = scmp.ne.s32.totalorder %s3755_s30, 0 }
 0xb67   : > { %p3761_p5 = scmp.ge.s32.totalorder %s2943_s21, 2  ;;  %s2578_s9 = scalar_lea.sflag [#allocation7], %s2577_s29 }
 0xb69   : > { %p2771_p7 = pnand %p3761_p5, %p3760_p13 }
 0xb6b   : > { %p2772_p8 = pneg %p2771_p7 }
 0xb6d   : > { %2922 = dma.done.wait (%p2772_p8), %s2578_s9, 768  }
 0xb6e   : > { %2924 = vsyncadd (%p2772_p8), %s2578_s9, 4294966528  ;;  %s2587_s12 = scalar_lea.sflag [#allocation10], %s2577_s29 }
 0xb6f   : > { %2926 = dma.done.wait (%p2772_p8), %s2587_s12, 384  }
 0xb70   : > { %2928 = vsyncadd (%p2772_p8), %s2587_s12, 4294966912  ;;  %p22_p10 = scmp.ge.s32.totalorder %s3013_s24, 4   ;;  %s3762_s18 = smov %s2935_s19 }
 0xb71   : > { %s3763_s19 = smov %s2939_s20  ;;  %s3764_s20 = smov %s3025_s27 }
 0xb72   : > { %s3765_s21 = smov %s3013_s24  ;;  %24 = sbr.rel (!%p22_p10) target bundleno = 9 (0x9), region = 132 }
 0xb77   :  { %2615 = vsyncpa [#allocation6], 1 }
 0xb78   :  { %2617 = vsyncpa [#allocation6 + $0x1], 1 }
 0xb79   :  { %2618 = vsyncpa [#allocation7], 1 }
 0xb7a   :  { %2620 = vsyncpa [#allocation7 + $0x1], 1 }
 0xb7b   :  { %2621 = vsyncpa [#allocation10], 1 }
 0xb7c   :  { %2623 = vsyncpa [#allocation10 + $0x1], 1 }

</bundles_post_ra>
